<compile_context>
chip_gen: v7x
topology: tpu7x:2x2x1
jax: 0.10.0
libtpu: 0.0.40
codegen_flags: <defaults>
</compile_context>

<pallas_src>
import jax
import jax.numpy as jnp
from jax.experimental import pallas as pl
from jax.experimental.pallas import tpu as pltpu


def mapping_kernel(z_ref, w0_ref, b0_ref, wm_ref, bm_ref, wl_ref, bl_ref, out_ref):
    """Fused 8-layer MLP for one batch tile.

    z_ref : (tb, L_pad)        f32   -- pipelined batch tile
    w0_ref: (L_pad, H)         bf16  -- resident (whole array in VMEM)
    b0_ref: (1, H)             f32
    wm_ref: (n_mid, H, H)      bf16  -- stacked hidden-layer weights
    bm_ref: (n_mid, 1, H)      f32
    wl_ref: (H, S_pad)         bf16
    bl_ref: (1, S_pad)         f32
    out_ref:(tb, S_pad)        f32
    """
    # Layer 0: bf16 x bf16 MXU matmul, f32 accumulate; bias + ReLU in f32.
    h = jnp.dot(z_ref[...].astype(jnp.bfloat16), w0_ref[...],
                preferred_element_type=jnp.float32) + b0_ref[...]
    h = jnp.maximum(h, 0.0)

    # Hidden layers (stacked 512x512 weights), ReLU after each.
    n_mid = wm_ref.shape[0]
    for j in range(n_mid):
        h = jnp.dot(h.astype(jnp.bfloat16), wm_ref[j],
                    preferred_element_type=jnp.float32) + bm_ref[j]
        h = jnp.maximum(h, 0.0)

    # Final layer: no ReLU; lane-dense padded output store.
    out = jnp.dot(h.astype(jnp.bfloat16), wl_ref[...],
                  preferred_element_type=jnp.float32) + bl_ref[...]
    out_ref[...] = out.astype(out_ref.dtype)


def mapping_network(z, params, *, batch_tile=256, weight_dtype=jnp.bfloat16):
    """z: (N, latent_dim); params: list of (w:(out,in), b:(out,)) PyTorch-style Linears.

    batch_tile: per-grid-step batch tile (multiple of 8).  256 is a good default
    for v5e/v6e; raise to 512 on v7x for large-N throughput.
    """
    N, L = z.shape
    n_layers = len(params)
    assert n_layers >= 3, "expected first / hidden / last layer structure"
    H = params[0][0].shape[0]                    # hidden width (512)
    S = params[-1][0].shape[0]                   # style_dim (64)
    assert params[0][0].shape == (H, L)
    assert params[-1][0].shape == (S, H)
    assert all(w.shape == (H, H) for w, _ in params[1:-1]), "hidden layers must be HxH"

    L_pad = max(128, pl.cdiv(L, 128) * 128)      # lane-dense z / first-layer K
    S_pad = max(128, pl.cdiv(S, 128) * 128)      # lane-dense output width
    f32 = jnp.float32

    # --- Parameter prep: transpose to (in, out), pad, cast weights to bf16 ---
    w0, b0 = params[0]
    w0t = jnp.pad(jnp.asarray(w0, f32).T, ((0, L_pad - L), (0, 0))).astype(weight_dtype)
    b0r = jnp.asarray(b0, f32).reshape(1, H)

    wm = jnp.stack([jnp.asarray(w, f32).T for w, _ in params[1:-1]]).astype(weight_dtype)
    bm = jnp.stack([jnp.asarray(b, f32).reshape(1, H) for _, b in params[1:-1]])

    wl, bl = params[-1]
    wlt = jnp.pad(jnp.asarray(wl, f32).T, ((0, 0), (0, S_pad - S))).astype(weight_dtype)
    blr = jnp.pad(jnp.asarray(bl, f32).reshape(1, S), ((0, 0), (0, S_pad - S)))

    # --- Batch tiling: sublane-aligned, padding-waste capped ---
    N8 = max(8, pl.cdiv(N, 8) * 8)
    if N8 <= batch_tile:
        tb = N8                                   # single grid step for small N
    else:
        cands = sorted({max(8, (batch_tile // d // 8) * 8) for d in (1, 2, 4)},
                       reverse=True)
        # minimize padded work; prefer larger tile on ties
        tb = min(cands, key=lambda t: (pl.cdiv(N8, t) * t, -t))
    N_pad = pl.cdiv(N8, tb) * tb

    z_p = jnp.asarray(z, f32)
    z_p = jnp.pad(z_p, ((0, N_pad - N), (0, L_pad - L)))

    # Whole-array, single-copy VMEM residents for weights/biases (constant
    # across grid steps -> no point double-buffering them).
    resident = pl.BlockSpec(memory_space=pltpu.MemorySpace.VMEM)

    out = pl.pallas_call(
        mapping_kernel,
        out_shape=jax.ShapeDtypeStruct((N_pad, S_pad), f32),
        grid_spec=pltpu.PrefetchScalarGridSpec(
            num_scalar_prefetch=0,
            grid=(N_pad // tb,),
            in_specs=[
                pl.BlockSpec((tb, L_pad), lambda i: (i, 0)),   # z: pipelined tiles
                resident, resident,                            # w0, b0
                resident, resident,                            # stacked hidden w, b
                resident, resident,                            # w_last, b_last
            ],
            out_specs=pl.BlockSpec((tb, S_pad), lambda i: (i, 0)),
        ),
        compiler_params=pltpu.CompilerParams(
            dimension_semantics=("parallel",)),
    )(z_p, w0t, b0r, wm, bm, wlt, blr)

    return out[:N, :S]


def mapping_ref(z, params):
    """Pure-JAX f32 reference mirroring the PyTorch forward."""
    h = z
    for i, (w, b) in enumerate(params):
        h = jnp.dot(h, w.T, precision=jax.lax.Precision.HIGHEST) + b
        if i < len(params) - 1:
            h = jax.nn.relu(h)
    return h


def mapping_ref_bf16(z, params):
    """Reference using the kernel's bf16 weight/activation quantization (f32 accumulate)."""
    h = jnp.asarray(z, jnp.float32)
    for i, (w, b) in enumerate(params):
        h = jnp.dot(h.astype(jnp.bfloat16), w.T.astype(jnp.bfloat16),
                    preferred_element_type=jnp.float32) + b
        if i < len(params) - 1:
            h = jax.nn.relu(h)
    return h


if __name__ == "__main__":
    # Module defaults: latent_dim=16, style_dim=64, hidden=512.
    latent_dim, style_dim, hidden = 16, 64, 512
    batch = 2

    # 8 linear layers: shared = 16->512 + 3x 512->512 ; exit = 3x 512->512 + 512->64
    dims = [(latent_dim, hidden)] + [(hidden, hidden)] * 6 + [(hidden, style_dim)]

    key = jax.random.PRNGKey(0)
    kz, key = jax.random.split(key)
    z = jax.random.normal(kz, (batch, latent_dim), dtype=jnp.float32)

    # Deterministic PyTorch-style Linear init: U(-1/sqrt(fan_in), 1/sqrt(fan_in)).
    params = []
    for fan_in, fan_out in dims:
        kw, kb, key = jax.random.split(key, 3)
        bound = 1.0 / (fan_in ** 0.5)
        w = jax.random.uniform(kw, (fan_out, fan_in), minval=-bound, maxval=bound,
                               dtype=jnp.float32)
        b = jax.random.uniform(kb, (fan_out,), minval=-bound, maxval=bound,
                               dtype=jnp.float32)
        params.append((w, b))

    out = mapping_network(z, params)
    out = jax.block_until_ready(out)
    assert out.shape == (batch, style_dim)

    # 1) Tight check vs a reference with the same bf16 quantization (kernel correctness).
    ref_q = mapping_ref_bf16(z, params)
    err_q = jnp.max(jnp.abs(out - ref_q))
    assert jnp.allclose(out, ref_q, atol=1e-3, rtol=1e-3), \
        f"mismatch vs bf16-quantized reference, max abs err = {err_q}"

    # 2) Loose check vs the full-f32 PyTorch mirror (bf16 weights add quantization error).
    ref = mapping_ref(z, params)
    err = jnp.max(jnp.abs(out - ref))
    assert jnp.allclose(out, ref, atol=5e-3, rtol=5e-2), \
        f"mismatch vs f32 reference, max abs err = {err}"

    print("KERNEL_OK")
</pallas_src>

<mosaic_0001>
module attributes {stable_mosaic.version = 11 : i64} {
  func.func @mapping_kernel(%arg0: i32, %arg1: memref<8x128xf32, #tpu.memory_space<vmem>>, %arg2: memref<128x512xbf16, #tpu.memory_space<vmem>>, %arg3: memref<1x512xf32, #tpu.memory_space<vmem>>, %arg4: memref<6x512x512xbf16, #tpu.memory_space<vmem>>, %arg5: memref<6x1x512xf32, #tpu.memory_space<vmem>>, %arg6: memref<512x128xbf16, #tpu.memory_space<vmem>>, %arg7: memref<1x128xf32, #tpu.memory_space<vmem>>, %arg8: memref<8x128xf32, #tpu.memory_space<vmem>>) attributes {dimension_semantics = [#tpu.dimension_semantics<parallel>], iteration_bounds = array<i64: 1>, scalar_prefetch = 0 : i64, scratch_operands = 0 : i64, tpu.core_type = #tpu.core_type<tc>, window_params = [{transform_indices = @transform_0, window_bounds = array<i64: 8, 128>}, {pipeline_mode = #tpu.pipeline_mode<synchronous>, transform_indices = @transform_1, window_bounds = array<i64: 128, 512>}, {pipeline_mode = #tpu.pipeline_mode<synchronous>, transform_indices = @transform_2, window_bounds = array<i64: 1, 512>}, {pipeline_mode = #tpu.pipeline_mode<synchronous>, transform_indices = @transform_3, window_bounds = array<i64: 6, 512, 512>}, {pipeline_mode = #tpu.pipeline_mode<synchronous>, transform_indices = @transform_4, window_bounds = array<i64: 6, 1, 512>}, {pipeline_mode = #tpu.pipeline_mode<synchronous>, transform_indices = @transform_5, window_bounds = array<i64: 512, 128>}, {pipeline_mode = #tpu.pipeline_mode<synchronous>, transform_indices = @transform_6, window_bounds = array<i64: 1, 128>}, {transform_indices = @transform_7, window_bounds = array<i64: 8, 128>}]} {
    %c0 = arith.constant 0 : index
    %c0_0 = arith.constant 0 : index
    %0 = vector.load %arg1[%c0, %c0_0] : memref<8x128xf32, #tpu.memory_space<vmem>>, vector<8x128xf32>
    %1 = arith.truncf %0 : vector<8x128xf32> to vector<8x128xbf16>
    %c0_1 = arith.constant 0 : index
    %c0_2 = arith.constant 0 : index
    %2 = vector.load %arg2[%c0_1, %c0_2] : memref<128x512xbf16, #tpu.memory_space<vmem>>, vector<128x512xbf16>
    %cst = arith.constant dense<0.000000e+00> : vector<8x512xf32>
    %3 = tpu.matmul %1, %2, %cst {dimension_numbers = #tpu.dot_dimension_numbers<[1], [0], [0], [1], [0, 0, 1, 1], [], []>} : vector<8x128xbf16>, vector<128x512xbf16>, vector<8x512xf32> -> vector<8x512xf32>
    %c0_3 = arith.constant 0 : index
    %c0_4 = arith.constant 0 : index
    %4 = vector.load %arg3[%c0_3, %c0_4] : memref<1x512xf32, #tpu.memory_space<vmem>>, vector<1x512xf32>
    %5 = vector.broadcast %4 : vector<1x512xf32> to vector<8x512xf32>
    %6 = arith.addf %3, %5 : vector<8x512xf32>
    %cst_5 = arith.constant 0.000000e+00 : f32
    %7 = vector.broadcast %cst_5 : f32 to vector<8x512xf32>
    %8 = arith.maximumf %6, %7 : vector<8x512xf32>
    %9 = arith.truncf %8 : vector<8x512xf32> to vector<8x512xbf16>
    %c0_6 = arith.constant 0 : index
    %c0_7 = arith.constant 0 : index
    %c0_8 = arith.constant 0 : index
    %10 = vector.load %arg4[%c0_6, %c0_7, %c0_8] : memref<6x512x512xbf16, #tpu.memory_space<vmem>>, vector<1x512x512xbf16>
    %11 = vector.shape_cast %10 : vector<1x512x512xbf16> to vector<512x512xbf16>
    %cst_9 = arith.constant dense<0.000000e+00> : vector<8x512xf32>
    %12 = tpu.matmul %9, %11, %cst_9 {dimension_numbers = #tpu.dot_dimension_numbers<[1], [0], [0], [1], [0, 0, 1, 1], [], []>} : vector<8x512xbf16>, vector<512x512xbf16>, vector<8x512xf32> -> vector<8x512xf32>
    %c0_10 = arith.constant 0 : index
    %c0_11 = arith.constant 0 : index
    %c0_12 = arith.constant 0 : index
    %13 = vector.load %arg5[%c0_10, %c0_11, %c0_12] : memref<6x1x512xf32, #tpu.memory_space<vmem>>, vector<1x1x512xf32>
    %14 = vector.shape_cast %13 : vector<1x1x512xf32> to vector<1x512xf32>
    %15 = vector.broadcast %14 : vector<1x512xf32> to vector<8x512xf32>
    %16 = arith.addf %12, %15 : vector<8x512xf32>
    %cst_13 = arith.constant 0.000000e+00 : f32
    %17 = vector.broadcast %cst_13 : f32 to vector<8x512xf32>
    %18 = arith.maximumf %16, %17 : vector<8x512xf32>
    %19 = arith.truncf %18 : vector<8x512xf32> to vector<8x512xbf16>
    %c1 = arith.constant 1 : index
    %c0_14 = arith.constant 0 : index
    %c0_15 = arith.constant 0 : index
    %20 = vector.load %arg4[%c1, %c0_14, %c0_15] : memref<6x512x512xbf16, #tpu.memory_space<vmem>>, vector<1x512x512xbf16>
    %21 = vector.shape_cast %20 : vector<1x512x512xbf16> to vector<512x512xbf16>
    %cst_16 = arith.constant dense<0.000000e+00> : vector<8x512xf32>
    %22 = tpu.matmul %19, %21, %cst_16 {dimension_numbers = #tpu.dot_dimension_numbers<[1], [0], [0], [1], [0, 0, 1, 1], [], []>} : vector<8x512xbf16>, vector<512x512xbf16>, vector<8x512xf32> -> vector<8x512xf32>
    %c1_17 = arith.constant 1 : index
    %c0_18 = arith.constant 0 : index
    %c0_19 = arith.constant 0 : index
    %23 = vector.load %arg5[%c1_17, %c0_18, %c0_19] : memref<6x1x512xf32, #tpu.memory_space<vmem>>, vector<1x1x512xf32>
    %24 = vector.shape_cast %23 : vector<1x1x512xf32> to vector<1x512xf32>
    %25 = vector.broadcast %24 : vector<1x512xf32> to vector<8x512xf32>
    %26 = arith.addf %22, %25 : vector<8x512xf32>
    %cst_20 = arith.constant 0.000000e+00 : f32
    %27 = vector.broadcast %cst_20 : f32 to vector<8x512xf32>
    %28 = arith.maximumf %26, %27 : vector<8x512xf32>
    %29 = arith.truncf %28 : vector<8x512xf32> to vector<8x512xbf16>
    %c2 = arith.constant 2 : index
    %c0_21 = arith.constant 0 : index
    %c0_22 = arith.constant 0 : index
    %30 = vector.load %arg4[%c2, %c0_21, %c0_22] : memref<6x512x512xbf16, #tpu.memory_space<vmem>>, vector<1x512x512xbf16>
    %31 = vector.shape_cast %30 : vector<1x512x512xbf16> to vector<512x512xbf16>
    %cst_23 = arith.constant dense<0.000000e+00> : vector<8x512xf32>
    %32 = tpu.matmul %29, %31, %cst_23 {dimension_numbers = #tpu.dot_dimension_numbers<[1], [0], [0], [1], [0, 0, 1, 1], [], []>} : vector<8x512xbf16>, vector<512x512xbf16>, vector<8x512xf32> -> vector<8x512xf32>
    %c2_24 = arith.constant 2 : index
    %c0_25 = arith.constant 0 : index
    %c0_26 = arith.constant 0 : index
    %33 = vector.load %arg5[%c2_24, %c0_25, %c0_26] : memref<6x1x512xf32, #tpu.memory_space<vmem>>, vector<1x1x512xf32>
    %34 = vector.shape_cast %33 : vector<1x1x512xf32> to vector<1x512xf32>
    %35 = vector.broadcast %34 : vector<1x512xf32> to vector<8x512xf32>
    %36 = arith.addf %32, %35 : vector<8x512xf32>
    %cst_27 = arith.constant 0.000000e+00 : f32
    %37 = vector.broadcast %cst_27 : f32 to vector<8x512xf32>
    %38 = arith.maximumf %36, %37 : vector<8x512xf32>
    %39 = arith.truncf %38 : vector<8x512xf32> to vector<8x512xbf16>
    %c3 = arith.constant 3 : index
    %c0_28 = arith.constant 0 : index
    %c0_29 = arith.constant 0 : index
    %40 = vector.load %arg4[%c3, %c0_28, %c0_29] : memref<6x512x512xbf16, #tpu.memory_space<vmem>>, vector<1x512x512xbf16>
    %41 = vector.shape_cast %40 : vector<1x512x512xbf16> to vector<512x512xbf16>
    %cst_30 = arith.constant dense<0.000000e+00> : vector<8x512xf32>
    %42 = tpu.matmul %39, %41, %cst_30 {dimension_numbers = #tpu.dot_dimension_numbers<[1], [0], [0], [1], [0, 0, 1, 1], [], []>} : vector<8x512xbf16>, vector<512x512xbf16>, vector<8x512xf32> -> vector<8x512xf32>
    %c3_31 = arith.constant 3 : index
    %c0_32 = arith.constant 0 : index
    %c0_33 = arith.constant 0 : index
    %43 = vector.load %arg5[%c3_31, %c0_32, %c0_33] : memref<6x1x512xf32, #tpu.memory_space<vmem>>, vector<1x1x512xf32>
    %44 = vector.shape_cast %43 : vector<1x1x512xf32> to vector<1x512xf32>
    %45 = vector.broadcast %44 : vector<1x512xf32> to vector<8x512xf32>
    %46 = arith.addf %42, %45 : vector<8x512xf32>
    %cst_34 = arith.constant 0.000000e+00 : f32
    %47 = vector.broadcast %cst_34 : f32 to vector<8x512xf32>
    %48 = arith.maximumf %46, %47 : vector<8x512xf32>
    %49 = arith.truncf %48 : vector<8x512xf32> to vector<8x512xbf16>
    %c4 = arith.constant 4 : index
    %c0_35 = arith.constant 0 : index
    %c0_36 = arith.constant 0 : index
    %50 = vector.load %arg4[%c4, %c0_35, %c0_36] : memref<6x512x512xbf16, #tpu.memory_space<vmem>>, vector<1x512x512xbf16>
    %51 = vector.shape_cast %50 : vector<1x512x512xbf16> to vector<512x512xbf16>
    %cst_37 = arith.constant dense<0.000000e+00> : vector<8x512xf32>
    %52 = tpu.matmul %49, %51, %cst_37 {dimension_numbers = #tpu.dot_dimension_numbers<[1], [0], [0], [1], [0, 0, 1, 1], [], []>} : vector<8x512xbf16>, vector<512x512xbf16>, vector<8x512xf32> -> vector<8x512xf32>
    %c4_38 = arith.constant 4 : index
    %c0_39 = arith.constant 0 : index
    %c0_40 = arith.constant 0 : index
    %53 = vector.load %arg5[%c4_38, %c0_39, %c0_40] : memref<6x1x512xf32, #tpu.memory_space<vmem>>, vector<1x1x512xf32>
    %54 = vector.shape_cast %53 : vector<1x1x512xf32> to vector<1x512xf32>
    %55 = vector.broadcast %54 : vector<1x512xf32> to vector<8x512xf32>
    %56 = arith.addf %52, %55 : vector<8x512xf32>
    %cst_41 = arith.constant 0.000000e+00 : f32
    %57 = vector.broadcast %cst_41 : f32 to vector<8x512xf32>
    %58 = arith.maximumf %56, %57 : vector<8x512xf32>
    %59 = arith.truncf %58 : vector<8x512xf32> to vector<8x512xbf16>
    %c5 = arith.constant 5 : index
    %c0_42 = arith.constant 0 : index
    %c0_43 = arith.constant 0 : index
    %60 = vector.load %arg4[%c5, %c0_42, %c0_43] : memref<6x512x512xbf16, #tpu.memory_space<vmem>>, vector<1x512x512xbf16>
    %61 = vector.shape_cast %60 : vector<1x512x512xbf16> to vector<512x512xbf16>
    %cst_44 = arith.constant dense<0.000000e+00> : vector<8x512xf32>
    %62 = tpu.matmul %59, %61, %cst_44 {dimension_numbers = #tpu.dot_dimension_numbers<[1], [0], [0], [1], [0, 0, 1, 1], [], []>} : vector<8x512xbf16>, vector<512x512xbf16>, vector<8x512xf32> -> vector<8x512xf32>
    %c5_45 = arith.constant 5 : index
    %c0_46 = arith.constant 0 : index
    %c0_47 = arith.constant 0 : index
    %63 = vector.load %arg5[%c5_45, %c0_46, %c0_47] : memref<6x1x512xf32, #tpu.memory_space<vmem>>, vector<1x1x512xf32>
    %64 = vector.shape_cast %63 : vector<1x1x512xf32> to vector<1x512xf32>
    %65 = vector.broadcast %64 : vector<1x512xf32> to vector<8x512xf32>
    %66 = arith.addf %62, %65 : vector<8x512xf32>
    %cst_48 = arith.constant 0.000000e+00 : f32
    %67 = vector.broadcast %cst_48 : f32 to vector<8x512xf32>
    %68 = arith.maximumf %66, %67 : vector<8x512xf32>
    %69 = arith.truncf %68 : vector<8x512xf32> to vector<8x512xbf16>
    %c0_49 = arith.constant 0 : index
    %c0_50 = arith.constant 0 : index
    %70 = vector.load %arg6[%c0_49, %c0_50] : memref<512x128xbf16, #tpu.memory_space<vmem>>, vector<512x128xbf16>
    %cst_51 = arith.constant dense<0.000000e+00> : vector<8x128xf32>
    %71 = tpu.matmul %69, %70, %cst_51 {dimension_numbers = #tpu.dot_dimension_numbers<[1], [0], [0], [1], [0, 0, 1, 1], [], []>} : vector<8x512xbf16>, vector<512x128xbf16>, vector<8x128xf32> -> vector<8x128xf32>
    %c0_52 = arith.constant 0 : index
    %c0_53 = arith.constant 0 : index
    %72 = vector.load %arg7[%c0_52, %c0_53] : memref<1x128xf32, #tpu.memory_space<vmem>>, vector<1x128xf32>
    %73 = vector.broadcast %72 : vector<1x128xf32> to vector<8x128xf32>
    %74 = arith.addf %71, %73 : vector<8x128xf32>
    %c0_54 = arith.constant 0 : index
    %c0_55 = arith.constant 0 : index
    %75 = vector.load %arg8[%c0_54, %c0_55] : memref<8x128xf32, #tpu.memory_space<vmem>>, vector<8x128xf32>
    tpu.vector_store %arg8[%c0_54, %c0_55], %74 {strides = array<i32>} : memref<8x128xf32, #tpu.memory_space<vmem>>, vector<8x128xf32>,
    return
  }
  func.func @transform_0(%arg0: i32) -> (i32, i32) {
    %c0_i32 = arith.constant 0 : i32
    %c0_i32_0 = arith.constant 0 : i32
    return %arg0, %c0_i32 : i32, i32
  }
  func.func @transform_1(%arg0: i32) -> (i32, i32) {
    %c0_i32 = arith.constant 0 : i32
    %c0_i32_0 = arith.constant 0 : i32
    %c0_i32_1 = arith.constant 0 : i32
    return %c0_i32, %c0_i32_0 : i32, i32
  }
  func.func @transform_2(%arg0: i32) -> (i32, i32) {
    %c0_i32 = arith.constant 0 : i32
    %c0_i32_0 = arith.constant 0 : i32
    %c0_i32_1 = arith.constant 0 : i32
    return %c0_i32, %c0_i32_0 : i32, i32
  }
  func.func @transform_3(%arg0: i32) -> (i32, i32, i32) {
    %c0_i32 = arith.constant 0 : i32
    %c0_i32_0 = arith.constant 0 : i32
    %c0_i32_1 = arith.constant 0 : i32
    %c0_i32_2 = arith.constant 0 : i32
    return %c0_i32, %c0_i32_0, %c0_i32_1 : i32, i32, i32
  }
  func.func @transform_4(%arg0: i32) -> (i32, i32, i32) {
    %c0_i32 = arith.constant 0 : i32
    %c0_i32_0 = arith.constant 0 : i32
    %c0_i32_1 = arith.constant 0 : i32
    %c0_i32_2 = arith.constant 0 : i32
    return %c0_i32, %c0_i32_0, %c0_i32_1 : i32, i32, i32
  }
  func.func @transform_5(%arg0: i32) -> (i32, i32) {
    %c0_i32 = arith.constant 0 : i32
    %c0_i32_0 = arith.constant 0 : i32
    %c0_i32_1 = arith.constant 0 : i32
    return %c0_i32, %c0_i32_0 : i32, i32
  }
  func.func @transform_6(%arg0: i32) -> (i32, i32) {
    %c0_i32 = arith.constant 0 : i32
    %c0_i32_0 = arith.constant 0 : i32
    %c0_i32_1 = arith.constant 0 : i32
    return %c0_i32, %c0_i32_0 : i32, i32
  }
  func.func @transform_7(%arg0: i32) -> (i32, i32) {
    %c0_i32 = arith.constant 0 : i32
    %c0_i32_0 = arith.constant 0 : i32
    return %arg0, %c0_i32 : i32, i32
  }
}

</mosaic_0001>

<bundles_post_ra>
// kernel: tpu_custom_call.1
= control target key start
LH: loop header
LB: loop body
LE: loop exit
PB: predicated region body
PF: predicated region fallthrough
CT: control target
= control target key end

     0   :  { %12 = vsyncpa [#allocation3], 0  ;;  %s9205_s0 = inlined_call_operand.hbm [shape: f32[8,128], index: 0, kind: input, shape index: {}]   ;;  %s9206_s1 = inlined_call_operand.hbm [shape: bf16[128,512], index: 1, kind: input, shape index: {}]   ;;  %s9207_s2 = inlined_call_operand.hbm [shape: f32[1,512], index: 2, kind: input, shape index: {}]   ;;  %s9208_s3 = inlined_call_operand.hbm [shape: bf16[6,512,512], index: 3, kind: input, shape index: {}]   ;;  %s9209_s4 = inlined_call_operand.hbm [shape: f32[6,1,512], index: 4, kind: input, shape index: {}]   ;;  %s9210_s5 = inlined_call_operand.hbm [shape: bf16[512,128], index: 5, kind: input, shape index: {}]   ;;  %s9211_s6 = inlined_call_operand.hbm [shape: f32[1,128], index: 6, kind: input, shape index: {}]   ;;  %s9212_s7 = inlined_call_operand.hbm [shape: f32[8,128], index: 7, kind: output, shape index: {}]  }
   0x1   :  { %13 = vsyncpa [#allocation6], 0 }
   0x2   :  { %14 = vsyncpa [#allocation9], 0 }
   0x3   :  { %15 = vsyncpa [#allocation12], 0 }
   0x4   :  { %16 = vsyncpa [#allocation4], 0  ;;  %s8947_s24 = smov [#allocation5]   ;;  %s8761_s28 = scalar_lea.hbm %s9206_s1, 4096 }
   0x5   :  { %s32_s25 = sshll.u32 %s8947_s24, 4  ;;  %p8762_p0 = scmp.ne.s32.totalorder %s9206_s1, %s8761_s28  ;;  %s33_s25 = int_to_ptr.vmem [resolvable:$true] %s32_s25 }
   0x6   :  { %p8765_p1 = scmp.lt.u32.totalorder %s8761_s28, %s9206_s1 }
   0x8   :  { %p8767_p2 = pnand %p8765_p1, %p8762_p0 }
   0xa   :  { %8770 = shalt.err (!%p8767_p2)
}
   0xb   :  { %s8771_s10 = scalar_lea.vmem %s33_s25, 4096  ;;  %p8776_p4 = scmp.lt.s32.totalorder %s33_s25, %s33_s25 }
   0xc   :  { %p8772_p3 = scmp.ne.s32.totalorder %s33_s25, %s8771_s10  ;;  %p8777_p5 = scmp.lt.s32.totalorder %s8771_s10, %s8771_s10 }
   0xe   :  { %p8778_p6 = por %p8777_p5, %p8776_p4 }
  0x10   :  { %p8779_p7 = pnand %p8778_p6, %p8772_p3 }
  0x12   :  { %8782 = shalt.err (!%p8779_p7)
}
  0x13   :  { %s8948_s11 = smov 256   ;;  %s8949_s12 = smov 16  }
  0x14   :  { %38 = dma.hbm_to_vmem [thread:$0]  %s9206_s1, 4096, %s33_s25, [#allocation6], %s8948_s11, %s8948_s11, %s8949_s12  }
  0x15   :  { %s8950_s15 = smov [#allocation8]   ;;  %s8783_s19 = scalar_lea.hbm %s9208_s3, 98304 }
  0x16   :  { %s54_s16 = sshll.u32 %s8950_s15, 4  ;;  %p8784_p8 = scmp.ne.s32.totalorder %s9208_s3, %s8783_s19  ;;  %s55_s16 = int_to_ptr.vmem [resolvable:$true] %s54_s16 }
  0x17   :  { %p8787_p9 = scmp.lt.u32.totalorder %s8783_s19, %s9208_s3 }
  0x19   :  { %p8789_p10 = pnand %p8787_p9, %p8784_p8 }
  0x1b   :  { %8792 = shalt.err (!%p8789_p10)
}
  0x1c   :  { %s8793_s24 = scalar_lea.vmem %s55_s16, 98304  ;;  %p8798_p12 = scmp.lt.s32.totalorder %s55_s16, %s55_s16 }
  0x1d   :  { %p8794_p11 = scmp.ne.s32.totalorder %s55_s16, %s8793_s24  ;;  %p8799_p13 = scmp.lt.s32.totalorder %s8793_s24, %s8793_s24 }
  0x1f   :  { %p8800_p0 = por %p8799_p13, %p8798_p12 }
  0x21   :  { %p8801_p1 = pnand %p8800_p0, %p8794_p11 }
  0x23   :  { %8804 = shalt.err (!%p8801_p1)
}
  0x24   :  { %60 = dma.hbm_to_vmem [thread:$0]  %s9208_s3, 98304, %s55_s16, [#allocation9], %s8948_s11, %s8948_s11, %s8949_s12  }
  0x25   :  { %s8951_s26 = smov [#allocation11]   ;;  %s8952_s28 = smov [#allocation2]  }
  0x26   :  { %s78_s27 = sshll.u32 %s8951_s26, 4  ;;  %s23_s29 = sshll.u32 %s8952_s28, 4  ;;  %s79_s27 = int_to_ptr.vmem [resolvable:$true] %s78_s27  ;;  %s24_s29 = int_to_ptr.vmem [resolvable:$true] %s23_s29 }
  0x27   :  { %s8805_s9 = scalar_lea.hbm %s9210_s5, 4096 }
  0x28   :  { %p8806_p2 = scmp.ne.s32.totalorder %s9210_s5, %s8805_s9  ;;  %p8809_p3 = scmp.lt.u32.totalorder %s8805_s9, %s9210_s5 }
  0x2a   :  { %p8811_p4 = pnand %p8809_p3, %p8806_p2 }
  0x2c   :  { %8814 = shalt.err (!%p8811_p4)
}
  0x2d   :  { %s8815_s3 = scalar_lea.vmem %s79_s27, 4096  ;;  %p8820_p6 = scmp.lt.s32.totalorder %s79_s27, %s79_s27 }
  0x2e   :  { %p8816_p5 = scmp.ne.s32.totalorder %s79_s27, %s8815_s3  ;;  %p8821_p7 = scmp.lt.s32.totalorder %s8815_s3, %s8815_s3 }
  0x30   :  { %p8822_p8 = por %p8821_p7, %p8820_p6 }
  0x32   :  { %p8823_p9 = pnand %p8822_p8, %p8816_p5 }
  0x34   :  { %8826 = shalt.err (!%p8823_p9)
}
  0x35   :  { %s8953_s11 = smov 64   ;;  %s8954_s12 = smov 4  }
  0x36   :  { %84 = dma.hbm_to_vmem [thread:$0]  %s9210_s5, 4096, %s79_s27, [#allocation12], %s8953_s11, %s8953_s11, %s8954_s12  }
  0x37   :  { %s8827_s20 = scalar_lea.hbm %s9205_s0, 128 }
  0x38   :  { %p8828_p10 = scmp.ne.s32.totalorder %s9205_s0, %s8827_s20  ;;  %p8831_p11 = scmp.lt.u32.totalorder %s8827_s20, %s9205_s0 }
  0x3a   :  { %p8833_p12 = pnand %p8831_p11, %p8828_p10 }
  0x3c   :  { %8836 = shalt.err (!%p8833_p12)
}
  0x3d   :  { %s8837_s1 = scalar_lea.vmem %s24_s29, 128  ;;  %p8842_p0 = scmp.lt.s32.totalorder %s24_s29, %s24_s29 }
  0x3e   :  { %p8838_p13 = scmp.ne.s32.totalorder %s24_s29, %s8837_s1  ;;  %p8843_p1 = scmp.lt.s32.totalorder %s8837_s1, %s8837_s1 }
  0x40   :  { %p8844_p2 = por %p8843_p1, %p8842_p0 }
  0x42   :  { %p8845_p3 = pnand %p8844_p2, %p8838_p13 }
  0x44   :  { %8848 = shalt.err (!%p8845_p3)
}
  0x45   :  { %26 = dma.hbm_to_vmem [thread:$0]  %s9205_s0, 128, %s24_s29, [#allocation3]  }
  0x46   :  { %s8955_s26 = smov [#allocation7]   ;;  %s8956_s28 = smov [#allocation10]  }
  0x47   :  { %s45_s27 = sshll.u32 %s8955_s26, 4  ;;  %s66_s30 = sshll.u32 %s8956_s28, 4  ;;  %s46_s27 = int_to_ptr.vmem [resolvable:$true] %s45_s27  ;;  %s9051_s30 = int_to_ptr.vmem [resolvable:$true] %s66_s30 }
  0x48   :  { %s8849_s10 = scalar_lea.hbm %s9207_s2, 64 }
  0x49   :  { %p8850_p4 = scmp.ne.s32.totalorder %s9207_s2, %s8849_s10  ;;  %p8853_p5 = scmp.lt.u32.totalorder %s8849_s10, %s9207_s2 }
  0x4b   :  { %p8855_p6 = pnand %p8853_p5, %p8850_p4 }
  0x4d   :  { %8858 = shalt.err (!%p8855_p6)
}
  0x4e   :  { %s8859_s0 = scalar_lea.vmem %s46_s27, 64  ;;  %p8864_p8 = scmp.lt.s32.totalorder %s46_s27, %s46_s27 }
  0x4f   :  { %p8860_p7 = scmp.ne.s32.totalorder %s46_s27, %s8859_s0  ;;  %p8865_p9 = scmp.lt.s32.totalorder %s8859_s0, %s8859_s0 }
  0x51   :  { %p8866_p10 = por %p8865_p9, %p8864_p8 }
  0x53   :  { %p8867_p11 = pnand %p8866_p10, %p8860_p7 }
  0x55   :  { %8870 = shalt.err (!%p8867_p11)
}
  0x56   :  { %48 = dma.hbm_to_vmem [thread:$0]  %s9207_s2, 64, %s46_s27, [#allocation6]  }
  0x57   :  { %s8871_s19 = scalar_lea.hbm %s9209_s4, 384 }
  0x58   :  { %p8872_p12 = scmp.ne.s32.totalorder %s9209_s4, %s8871_s19  ;;  %p8875_p13 = scmp.lt.u32.totalorder %s8871_s19, %s9209_s4 }
  0x5a   :  { %p8877_p0 = pnand %p8875_p13, %p8872_p12 }
  0x5c   :  { %8880 = shalt.err (!%p8877_p0)
}
  0x5d   :  { %s8881_s24 = scalar_lea.vmem %s9051_s30, 384  ;;  %p8886_p2 = scmp.lt.s32.totalorder %s9051_s30, %s9051_s30 }
  0x5e   :  { %p8882_p1 = scmp.ne.s32.totalorder %s9051_s30, %s8881_s24  ;;  %p8887_p3 = scmp.lt.s32.totalorder %s8881_s24, %s8881_s24 }
  0x60   :  { %p8888_p4 = por %p8887_p3, %p8886_p2 }
  0x62   :  { %p8889_p5 = pnand %p8888_p4, %p8882_p1 }
  0x64   :  { %8892 = shalt.err (!%p8889_p5)
}
  0x65   :  { %72 = dma.hbm_to_vmem [thread:$0]  %s9209_s4, 384, %s9051_s30, [#allocation9], %s8953_s11, %s8953_s11, %s8954_s12  }
  0x66   :  { %s8957_s5 = smov [#allocation13]   ;;  %s8893_s28 = scalar_lea.hbm %s9211_s6, 16 }
  0x67   :  { %s91_s25 = sshll.u32 %s8957_s5, 4  ;;  %p8894_p6 = scmp.ne.s32.totalorder %s9211_s6, %s8893_s28  ;;  %s92_s25 = int_to_ptr.vmem [resolvable:$true] %s91_s25 }
  0x68   :  { %p8897_p7 = scmp.lt.u32.totalorder %s8893_s28, %s9211_s6 }
  0x6a   :  { %p8899_p8 = pnand %p8897_p7, %p8894_p6 }
  0x6c   :  { %8902 = shalt.err (!%p8899_p8)
}
  0x6d   :  { %s8903_s14 = scalar_lea.vmem %s92_s25, 16  ;;  %s8907_s4 = scalar_lea.vmem %s92_s25, 32 }
  0x6e   :  { %p8904_p9 = scmp.ne.s32.totalorder %s92_s25, %s8903_s14  ;;  %p8908_p10 = scmp.lt.s32.totalorder %s92_s25, %s92_s25 }
  0x6f   :  { %p8909_p11 = scmp.lt.s32.totalorder %s8907_s4, %s8903_s14 }
  0x71   :  { %p8910_p12 = por %p8909_p11, %p8908_p10 }
  0x73   :  { %p8911_p13 = pnand %p8910_p12, %p8904_p9 }
  0x75   :  { %8914 = shalt.err (!%p8911_p13)
}
  0x76   :  { %94 = dma.hbm_to_vmem [thread:$0]  %s9211_s6, 16, %s92_s25, [#allocation12]  }
  0x77   :  { %8937 = dma.done.wait [#allocation3], 128  }
  0x78   :  { %8938 = vsyncadd [#allocation3], 4294967168 }
  0x79   :  { %8939 = dma.done.wait [#allocation6], 4160  }
  0x7a   :  { %8940 = vsyncadd [#allocation6], 4294963136 }
  0x7b   :  { %8941 = dma.done.wait [#allocation9], 98688  }
  0x7c   :  { %8942 = vsyncadd [#allocation9], 4294868608 }
  0x7d   :  { %8943 = dma.done.wait [#allocation12], 4112  }
  0x7e   :  { %8944 = vsyncadd [#allocation12], 4294963184  ;;  %v8958_v0 = vmov 0   ;;  %v7529_v1 = vld [vmem:[#allocation5 + $0x4] ss:$16 sps:$4 sm:$0xff]   ;;  %v117_v26 = vld [vmem:[#allocation2] sm:$0xff] }
  0x7f   :  { %365 = vmatprep.mubr.bf16.mxu0 %v8958_v0  ;;  %406 = vmatprep.mubr.bf16.mxu1 %v8958_v0  ;;  %v7531_v2 = vld [vmem:[#allocation5] ss:$16 sps:$4 sm:$0xff]   ;;  %v7532_v3 = vld [vmem:[#allocation5 + $0x24] ss:$16 sps:$4 sm:$0xff]   ;;  %v7553_v10 = vld [vmem:[#allocation5 + $0xc] ss:$16 sps:$4 sm:$0xff]   ;;  %v118_v30 = vpack.c.bf16 %v117_v26, %v117_v26 }
  0x80   :  { %333 = vmatprep.subr.bf16.mxu0 %v7529_v1  ;;  %v7534_v4 = vld [vmem:[#allocation5 + $0x20] ss:$16 sps:$4 sm:$0xff]   ;;  %v7535_v5 = vld [vmem:[#allocation5 + $0x44] ss:$16 sps:$4 sm:$0xff]   ;;  %v7555_v11 = vld [vmem:[#allocation5 + $0x8] ss:$16 sps:$4 sm:$0xff]   ;;  %374 = vmatprep.subr.bf16.mxu1 %v7553_v10 }
  0x81   :  { %334 = vmatpush1.bf16.msra.mxu0 %v7531_v2  ;;  %v7537_v6 = vld [vmem:[#allocation5 + $0x40] ss:$16 sps:$4 sm:$0xff]   ;;  %v7538_v7 = vld [vmem:[#allocation5 + $0x64] ss:$16 sps:$4 sm:$0xff]   ;;  %v7556_v12 = vld [vmem:[#allocation5 + $0x2c] ss:$16 sps:$4 sm:$0xff]   ;;  %375 = vmatpush1.bf16.msra.mxu1 %v7555_v11 }
  0x82   :  { %335 = vmatprep.subr.bf16.mxu0 %v7532_v3  ;;  %v7540_v8 = vld [vmem:[#allocation5 + $0x60] ss:$16 sps:$4 sm:$0xff]   ;;  %v7541_v9 = vld [vmem:[#allocation5 + $0x84] ss:$16 sps:$4 sm:$0xff]   ;;  %v7558_v14 = vld [vmem:[#allocation5 + $0x28] ss:$16 sps:$4 sm:$0xff]   ;;  %376 = vmatprep.subr.bf16.mxu1 %v7556_v12 }
  0x83   :  { %v7543_v13 = vld [vmem:[#allocation5 + $0x80] ss:$16 sps:$4 sm:$0xff]   ;;  %v7559_v15 = vld [vmem:[#allocation5 + $0x4c] ss:$16 sps:$4 sm:$0xff]   ;;  %v7544_v16 = vld [vmem:[#allocation5 + $0xa4] ss:$16 sps:$4 sm:$0xff]  }
  0x84   :  { %v7546_v17 = vld [vmem:[#allocation5 + $0xa0] ss:$16 sps:$4 sm:$0xff]   ;;  %v7561_v18 = vld [vmem:[#allocation5 + $0x48] ss:$16 sps:$4 sm:$0xff]   ;;  %v7562_v19 = vld [vmem:[#allocation5 + $0x6c] ss:$16 sps:$4 sm:$0xff]  }
  0x85   :  { %336 = vmatpush1.bf16.msra.mxu0 %v7534_v4  ;;  %377 = vmatpush1.bf16.msra.mxu1 %v7558_v14  ;;  %v7547_v20 = vld [vmem:[#allocation5 + $0xc4] ss:$16 sps:$4 sm:$0xff]   ;;  %v7549_v21 = vld [vmem:[#allocation5 + $0xc0] ss:$16 sps:$4 sm:$0xff]   ;;  %v7564_v22 = vld [vmem:[#allocation5 + $0x68] ss:$16 sps:$4 sm:$0xff]  }
  0x86   :  { %337 = vmatprep.subr.bf16.mxu0 %v7535_v5  ;;  %378 = vmatprep.subr.bf16.mxu1 %v7559_v15  ;;  %v7565_v23 = vld [vmem:[#allocation5 + $0x8c] ss:$16 sps:$4 sm:$0xff]   ;;  %v7550_v24 = vld [vmem:[#allocation5 + $0xe4] ss:$16 sps:$4 sm:$0xff]   ;;  %v7552_v25 = vld [vmem:[#allocation5 + $0xe0] ss:$16 sps:$4 sm:$0xff]  }
  0x87   :  { %v7567_v27 = vld [vmem:[#allocation5 + $0x88] ss:$16 sps:$4 sm:$0xff]   ;;  %v7568_v28 = vld [vmem:[#allocation5 + $0xac] ss:$16 sps:$4 sm:$0xff]   ;;  %v7577_v33 = vld [vmem:[#allocation8] ss:$16 sps:$4 sm:$0xff]  }
  0x88   :  { %v7579_v29 = vld [vmem:[#allocation8 + $0x4] ss:$16 sps:$4 sm:$0xff]   ;;  %v7571_v32 = vld [vmem:[#allocation5 + $0xcc] ss:$16 sps:$4 sm:$0xff]   ;;  %v7583_v37 = vld [vmem:[#allocation8 + $0x20] ss:$16 sps:$4 sm:$0xff]  }
  0x89   :  { %338 = vmatpush1.bf16.msra.mxu0 %v7537_v6  ;;  %379 = vmatpush1.bf16.msra.mxu1 %v7561_v18  ;;  %v7570_v31 = vld [vmem:[#allocation5 + $0xa8] ss:$16 sps:$4 sm:$0xff]   ;;  %v7574_v36 = vld [vmem:[#allocation5 + $0xec] ss:$16 sps:$4 sm:$0xff]   ;;  %v7582_v40 = vld [vmem:[#allocation8 + $0xc] ss:$16 sps:$4 sm:$0xff]  }
  0x8a   :  { %339 = vmatprep.subr.bf16.mxu0 %v7538_v7  ;;  %380 = vmatprep.subr.bf16.mxu1 %v7562_v19  ;;  %v7585_v34 = vld [vmem:[#allocation8 + $0x24] ss:$16 sps:$4 sm:$0xff]   ;;  %v7589_v41 = vld [vmem:[#allocation8 + $0x40] ss:$16 sps:$4 sm:$0xff]   ;;  %v7580_v43 = vld [vmem:[#allocation8 + $0x8] ss:$16 sps:$4 sm:$0xff]  }
  0x8b   :  { %v7573_v35 = vld [vmem:[#allocation5 + $0xc8] ss:$16 sps:$4 sm:$0xff]   ;;  %v7588_v44 = vld [vmem:[#allocation8 + $0x2c] ss:$16 sps:$4 sm:$0xff]   ;;  %v7595_v45 = vld [vmem:[#allocation8 + $0x60] ss:$16 sps:$4 sm:$0xff]  }
  0x8c   :  { %v7591_v38 = vld [vmem:[#allocation8 + $0x44] ss:$16 sps:$4 sm:$0xff]   ;;  %v7586_v47 = vld [vmem:[#allocation8 + $0x28] ss:$16 sps:$4 sm:$0xff]   ;;  %v7594_v48 = vld [vmem:[#allocation8 + $0x4c] ss:$16 sps:$4 sm:$0xff]  }
  0x8d   :  { %340 = vmatpush1.bf16.msra.mxu0 %v7540_v8  ;;  %381 = vmatpush1.bf16.msra.mxu1 %v7564_v22  ;;  %v7576_v39 = vld [vmem:[#allocation5 + $0xe8] ss:$16 sps:$4 sm:$0xff]   ;;  %v7601_v49 = vld [vmem:[#allocation8 + $0x80] ss:$16 sps:$4 sm:$0xff]   ;;  %v7592_v51 = vld [vmem:[#allocation8 + $0x48] ss:$16 sps:$4 sm:$0xff]  }
  0x8e   :  { %341 = vmatprep.subr.bf16.mxu0 %v7541_v9  ;;  %382 = vmatprep.subr.bf16.mxu1 %v7565_v23  ;;  %v7597_v42 = vld [vmem:[#allocation8 + $0x64] ss:$16 sps:$4 sm:$0xff]   ;;  %v7600_v52 = vld [vmem:[#allocation8 + $0x6c] ss:$16 sps:$4 sm:$0xff]   ;;  %v7607_v53 = vld [vmem:[#allocation8 + $0xa0] ss:$16 sps:$4 sm:$0xff]  }
  0x8f   :  { %v7603_v46 = vld [vmem:[#allocation8 + $0x84] ss:$16 sps:$4 sm:$0xff]   ;;  %v7598_v55 = vld [vmem:[#allocation8 + $0x68] ss:$16 sps:$4 sm:$0xff]   ;;  %v7606_v56 = vld [vmem:[#allocation8 + $0x8c] ss:$16 sps:$4 sm:$0xff]  }
  0x90   :  { %v7609_v50 = vld [vmem:[#allocation8 + $0xa4] ss:$16 sps:$4 sm:$0xff]   ;;  %v7613_v57 = vld [vmem:[#allocation8 + $0xc0] ss:$16 sps:$4 sm:$0xff]   ;;  %v7604_v59 = vld [vmem:[#allocation8 + $0x88] ss:$16 sps:$4 sm:$0xff]  }
  0x91   :  { %342 = vmatpush1.bf16.msra.mxu0 %v7543_v13  ;;  %383 = vmatpush1.bf16.msra.mxu1 %v7567_v27  ;;  %v7615_v54 = vld [vmem:[#allocation8 + $0xc4] ss:$16 sps:$4 sm:$0xff]   ;;  %v7612_v60 = vld [vmem:[#allocation8 + $0xac] ss:$16 sps:$4 sm:$0xff]   ;;  %v7619_v61 = vld [vmem:[#allocation8 + $0xe0] ss:$16 sps:$4 sm:$0xff]  }
  0x92   :  { %343 = vmatprep.subr.bf16.mxu0 %v7544_v16  ;;  %384 = vmatprep.subr.bf16.mxu1 %v7568_v28  ;;  %v7621_v58 = vld [vmem:[#allocation8 + $0xe4] ss:$16 sps:$4 sm:$0xff]   ;;  %v7610_v63 = vld [vmem:[#allocation8 + $0xa8] ss:$16 sps:$4 sm:$0xff]   ;;  %v7618_v0 = vld [vmem:[#allocation8 + $0xcc] ss:$16 sps:$4 sm:$0xff]  }
  0x93   :  { %v7627_v62 = vld [vmem:[#allocation8 + $0x104] ss:$16 sps:$4 sm:$0xff]   ;;  %v7625_v1 = vld [vmem:[#allocation8 + $0x100] ss:$16 sps:$4 sm:$0xff]   ;;  %v7616_v3 = vld [vmem:[#allocation8 + $0xc8] ss:$16 sps:$4 sm:$0xff]  }
  0x94   :  { %v7633_v2 = vld [vmem:[#allocation8 + $0x124] ss:$16 sps:$4 sm:$0xff]   ;;  %v7624_v4 = vld [vmem:[#allocation8 + $0xec] ss:$16 sps:$4 sm:$0xff]   ;;  %v7631_v5 = vld [vmem:[#allocation8 + $0x120] ss:$16 sps:$4 sm:$0xff]  }
  0x95   :  { %344 = vmatpush1.bf16.msra.mxu0 %v7546_v17  ;;  %385 = vmatpush1.bf16.msra.mxu1 %v7570_v31  ;;  %v7639_v6 = vld [vmem:[#allocation8 + $0x144] ss:$16 sps:$4 sm:$0xff]   ;;  %v7622_v7 = vld [vmem:[#allocation8 + $0xe8] ss:$16 sps:$4 sm:$0xff]   ;;  %v7630_v8 = vld [vmem:[#allocation8 + $0x10c] ss:$16 sps:$4 sm:$0xff]  }
  0x96   :  { %345 = vmatprep.subr.bf16.mxu0 %v7547_v20  ;;  %386 = vmatprep.subr.bf16.mxu1 %v7571_v32  ;;  %v7637_v9 = vld [vmem:[#allocation8 + $0x140] ss:$16 sps:$4 sm:$0xff]   ;;  %v7645_v10 = vld [vmem:[#allocation8 + $0x164] ss:$16 sps:$4 sm:$0xff]   ;;  %v7628_v11 = vld [vmem:[#allocation8 + $0x108] ss:$16 sps:$4 sm:$0xff]  }
  0x97   :  { %v7636_v12 = vld [vmem:[#allocation8 + $0x12c] ss:$16 sps:$4 sm:$0xff]   ;;  %v7643_v13 = vld [vmem:[#allocation8 + $0x160] ss:$16 sps:$4 sm:$0xff]   ;;  %v7651_v14 = vld [vmem:[#allocation8 + $0x184] ss:$16 sps:$4 sm:$0xff]  }
  0x98   :  { %v7634_v15 = vld [vmem:[#allocation8 + $0x128] ss:$16 sps:$4 sm:$0xff]   ;;  %v7642_v16 = vld [vmem:[#allocation8 + $0x14c] ss:$16 sps:$4 sm:$0xff]   ;;  %v7649_v17 = vld [vmem:[#allocation8 + $0x180] ss:$16 sps:$4 sm:$0xff]  }
  0x99   :  { %346 = vmatpush1.bf16.msra.mxu0 %v7549_v21  ;;  %387 = vmatpush1.bf16.msra.mxu1 %v7573_v35  ;;  %v7657_v18 = vld [vmem:[#allocation8 + $0x1a4] ss:$16 sps:$4 sm:$0xff]   ;;  %v7640_v19 = vld [vmem:[#allocation8 + $0x148] ss:$16 sps:$4 sm:$0xff]   ;;  %v7648_v20 = vld [vmem:[#allocation8 + $0x16c] ss:$16 sps:$4 sm:$0xff]  }
  0x9a   :  { %347 = vmatprep.subr.bf16.mxu0 %v7550_v24  ;;  %388 = vmatprep.subr.bf16.mxu1 %v7574_v36  ;;  %v7655_v21 = vld [vmem:[#allocation8 + $0x1a0] ss:$16 sps:$4 sm:$0xff]   ;;  %v7646_v22 = vld [vmem:[#allocation8 + $0x168] ss:$16 sps:$4 sm:$0xff]   ;;  %v7654_v23 = vld [vmem:[#allocation8 + $0x18c] ss:$16 sps:$4 sm:$0xff]  }
  0x9b   :  { %v7652_v24 = vld [vmem:[#allocation8 + $0x188] ss:$16 sps:$4 sm:$0xff]   ;;  %v7663_v27 = vld [vmem:[#allocation8 + $0x1c4] ss:$16 sps:$4 sm:$0xff]   ;;  %v7666_v28 = vld [vmem:[#allocation8 + $0x1cc] ss:$16 sps:$4 sm:$0xff]  }
  0x9c   :  { %v7658_v26 = vld [vmem:[#allocation8 + $0x1a8] ss:$16 sps:$4 sm:$0xff]   ;;  %v7669_v31 = vld [vmem:[#allocation8 + $0x1e4] ss:$16 sps:$4 sm:$0xff]   ;;  %v7672_v32 = vld [vmem:[#allocation8 + $0x1ec] ss:$16 sps:$4 sm:$0xff]  }
  0x9d   :  { %348 = vmatpush1.bf16.msra.mxu0 %v7552_v25  ;;  %389 = vmatpush1.bf16.msra.mxu1 %v7576_v39  ;;  %v7660_v25 = vld [vmem:[#allocation8 + $0x1ac] ss:$16 sps:$4 sm:$0xff]   ;;  %v7675_v35 = vld [vmem:[#allocation8 + $0x204] ss:$16 sps:$4 sm:$0xff]   ;;  %s8959_s6 = smov [#allocation14]  }
  0x9e   :  { %1213 = vmatprep.subr.bf16.mxu0 %v7579_v29  ;;  %1295 = vmatprep.subr.bf16.mxu1 %v7582_v40  ;;  %v7661_v29 = vld [vmem:[#allocation8 + $0x1c0] ss:$16 sps:$4 sm:$0xff]   ;;  %v7678_v36 = vld [vmem:[#allocation8 + $0x20c] ss:$16 sps:$4 sm:$0xff]   ;;  %s6555_s30 = sshll.u32 %s8959_s6, 4  ;;  %s6556_s30 = int_to_ptr.vmem [resolvable:$true] %s6555_s30 }
  0x9f   :  { %v9102_v40 = vld [vmem:[#allocation7] sm:$0xf]  ;;  %s8915_s15 = scalar_lea.vmem %s6556_s30, 128  ;;  %p8920_p1 = scmp.lt.s32.totalorder %s6556_s30, %s6556_s30 }
  0xa0   :  { %366 = vmatmul.mubr.bf16.vlgmr.msra.gmra.mrb[0].mxu0 %v118_v30  ;;  %407 = vmatmul.mubr.bf16.vlgmr.msra.gmra.mrb[0].mxu1 %v118_v30  ;;  %v7664_v30 = vld [vmem:[#allocation8 + $0x1c8] ss:$16 sps:$4 sm:$0xff]   ;;  %p8916_p0 = scmp.ne.s32.totalorder %s6556_s30, %s8915_s15  ;;  %p8921_p2 = scmp.lt.s32.totalorder %s8915_s15, %s8915_s15 }
  0xa1   :  { %1214 = vmatpush1.bf16.msra.mxu0 %v7577_v33  ;;  %1296 = vmatpush1.bf16.msra.mxu1 %v7580_v43  ;;  %v7667_v33 = vld [vmem:[#allocation8 + $0x1e0] ss:$16 sps:$4 sm:$0xff]  }
  0xa2   :  { %1215 = vmatprep.subr.bf16.mxu0 %v7585_v34  ;;  %1297 = vmatprep.subr.bf16.mxu1 %v7588_v44  ;;  %v7670_v34 = vld [vmem:[#allocation8 + $0x1e8] ss:$16 sps:$4 sm:$0xff]   ;;  %p8922_p3 = por %p8921_p2, %p8920_p1 }
  0xa4   :  { %p8923_p4 = pnand %p8922_p3, %p8916_p0 }
  0xa5   :  { %1216 = vmatpush1.bf16.msra.mxu0 %v7583_v37  ;;  %1298 = vmatpush1.bf16.msra.mxu1 %v7586_v47  ;;  %v153_v37 = vlaneseq }
  0xa6   :  { %1217 = vmatprep.subr.bf16.mxu0 %v7591_v38  ;;  %1299 = vmatprep.subr.bf16.mxu1 %v7594_v48 }
  0xa7   :  { %v9097_v38 = vshrl.u32 %v153_v37, 7  ;;  %v7735_v37 = vld [vmem:[#allocation8 + $0x344] ss:$16 sps:$4 sm:$0xff]  }
  0xa9   :  { %1218 = vmatpush1.bf16.msra.mxu0 %v7589_v41  ;;  %1300 = vmatpush1.bf16.msra.mxu1 %v7592_v51  ;;  %v9100_v39 = vsub.s32 0, %v9097_v38  ;;  %v9105_v41 = vsub.s32 1, %v9097_v38 }
  0xaa   :  { %1219 = vmatprep.subr.bf16.mxu0 %v7597_v42  ;;  %1301 = vmatprep.subr.bf16.mxu1 %v7600_v52  ;;  %v7673_v52 = vld [vmem:[#allocation8 + $0x200] ss:$16 sps:$4 sm:$0xff]  }
  0xab   :  { %v156_v42 = vrot.slane %v9102_v40, %v9100_v39  ;;  %v160_v43 = vrot.slane %v9102_v40, %v9105_v41 }
  0xad   :  { %1220 = vmatpush1.bf16.msra.mxu0 %v7595_v45  ;;  %1302 = vmatpush1.bf16.msra.mxu1 %v7598_v55  ;;  %v7684_v55 = vld [vmem:[#allocation8 + $0x22c] ss:$16 sps:$4 sm:$0xff]  }
  0xae   :  { %1221 = vmatprep.subr.bf16.mxu0 %v7603_v46  ;;  %1303 = vmatprep.subr.bf16.mxu1 %v7606_v56  ;;  %v9112_v56 = vsub.s32 3, %v9097_v38 }
  0xb1   :  { %1222 = vmatpush1.bf16.msra.mxu0 %v7601_v49  ;;  %1304 = vmatpush1.bf16.msra.mxu1 %v7604_v59  ;;  %v7679_v59 = vld [vmem:[#allocation8 + $0x220] ss:$16 sps:$4 sm:$0xff]  }
  0xb2   :  { %1223 = vmatprep.subr.bf16.mxu0 %v7609_v50  ;;  %1305 = vmatprep.subr.bf16.mxu1 %v7612_v60  ;;  %v7682_v60 = vld [vmem:[#allocation8 + $0x228] ss:$16 sps:$4 sm:$0xff]  }
  0xb5   :  { %1224 = vmatpush1.bf16.msra.mxu0 %v7607_v53  ;;  %1306 = vmatpush1.bf16.msra.mxu1 %v7610_v63  ;;  %v7676_v53 = vld [vmem:[#allocation8 + $0x208] ss:$16 sps:$4 sm:$0xff]   ;;  %v168_v63 = vrot.slane %v9102_v40, %v9112_v56 }
  0xb6   :  { %1225 = vmatprep.subr.bf16.mxu0 %v7615_v54  ;;  %1307 = vmatprep.subr.bf16.mxu1 %v7618_v0  ;;  %v7681_v54 = vld [vmem:[#allocation8 + $0x224] ss:$16 sps:$4 sm:$0xff]  }
  0xb9   :  { %1226 = vmatpush1.bf16.msra.mxu0 %v7613_v57  ;;  %1308 = vmatpush1.bf16.msra.mxu1 %v7616_v3 }
  0xba   :  { %1227 = vmatprep.subr.bf16.mxu0 %v7621_v58  ;;  %1309 = vmatprep.subr.bf16.mxu1 %v7624_v4  ;;  %v7693_v4 = vld [vmem:[#allocation8 + $0x264] ss:$16 sps:$4 sm:$0xff]  }
  0xbd   :  { %1228 = vmatpush1.bf16.msra.mxu0 %v7619_v61  ;;  %1310 = vmatpush1.bf16.msra.mxu1 %v7622_v7  ;;  %v7687_v61 = vld [vmem:[#allocation8 + $0x244] ss:$16 sps:$4 sm:$0xff]  }
  0xbe   :  { %1229 = vmatprep.subr.bf16.mxu0 %v7627_v62  ;;  %1311 = vmatprep.subr.bf16.mxu1 %v7630_v8  ;;  %v7690_v62 = vld [vmem:[#allocation8 + $0x24c] ss:$16 sps:$4 sm:$0xff]  }
  0xc1   :  { %1230 = vmatpush1.bf16.msra.mxu0 %v7625_v1  ;;  %1312 = vmatpush1.bf16.msra.mxu1 %v7628_v11  ;;  %v7685_v1 = vld [vmem:[#allocation8 + $0x240] ss:$16 sps:$4 sm:$0xff]   ;;  %v7694_v11 = vld [vmem:[#allocation8 + $0x268] ss:$16 sps:$4 sm:$0xff]  }
  0xc2   :  { %1231 = vmatprep.subr.bf16.mxu0 %v7633_v2  ;;  %1313 = vmatprep.subr.bf16.mxu1 %v7636_v12  ;;  %v7688_v2 = vld [vmem:[#allocation8 + $0x248] ss:$16 sps:$4 sm:$0xff]   ;;  %v7699_v12 = vld [vmem:[#allocation8 + $0x284] ss:$16 sps:$4 sm:$0xff]  }
  0xc5   :  { %1232 = vmatpush1.bf16.msra.mxu0 %v7631_v5  ;;  %1314 = vmatpush1.bf16.msra.mxu1 %v7634_v15  ;;  %v7696_v5 = vld [vmem:[#allocation8 + $0x26c] ss:$16 sps:$4 sm:$0xff]   ;;  %v7697_v15 = vld [vmem:[#allocation8 + $0x280] ss:$16 sps:$4 sm:$0xff]  }
  0xc6   :  { %1233 = vmatprep.subr.bf16.mxu0 %v7639_v6  ;;  %1315 = vmatprep.subr.bf16.mxu1 %v7642_v16  ;;  %v7700_v16 = vld [vmem:[#allocation8 + $0x288] ss:$16 sps:$4 sm:$0xff]  }
  0xc9   :  { %1234 = vmatpush1.bf16.msra.mxu0 %v7637_v9  ;;  %1316 = vmatpush1.bf16.msra.mxu1 %v7640_v19  ;;  %v7703_v19 = vld [vmem:[#allocation8 + $0x2a0] ss:$16 sps:$4 sm:$0xff]  }
  0xca   :  { %1235 = vmatprep.subr.bf16.mxu0 %v7645_v10  ;;  %1317 = vmatprep.subr.bf16.mxu1 %v7648_v20  ;;  %v7691_v10 = vld [vmem:[#allocation8 + $0x260] ss:$16 sps:$4 sm:$0xff]   ;;  %v7706_v20 = vld [vmem:[#allocation8 + $0x2a8] ss:$16 sps:$4 sm:$0xff]  }
  0xcd   :  { %1236 = vmatpush1.bf16.msra.mxu0 %v7643_v13  ;;  %1318 = vmatpush1.bf16.msra.mxu1 %v7646_v22  ;;  %v7702_v13 = vld [vmem:[#allocation8 + $0x28c] ss:$16 sps:$4 sm:$0xff]  }
  0xce   :  { %1237 = vmatprep.subr.bf16.mxu0 %v7651_v14  ;;  %1319 = vmatprep.subr.bf16.mxu1 %v7654_v23  ;;  %v7714_v22 = vld [vmem:[#allocation8 + $0x2cc] ss:$16 sps:$4 sm:$0xff]   ;;  %v7709_v23 = vld [vmem:[#allocation8 + $0x2c0] ss:$16 sps:$4 sm:$0xff]  }
  0xd1   :  { %1238 = vmatpush1.bf16.msra.mxu0 %v7649_v17  ;;  %1320 = vmatpush1.bf16.msra.mxu1 %v7652_v24  ;;  %v7705_v17 = vld [vmem:[#allocation8 + $0x2a4] ss:$16 sps:$4 sm:$0xff]   ;;  %v7712_v24 = vld [vmem:[#allocation8 + $0x2c8] ss:$16 sps:$4 sm:$0xff]  }
  0xd2   :  { %1239 = vmatprep.subr.bf16.mxu0 %v7657_v18  ;;  %1321 = vmatprep.subr.bf16.mxu1 %v7660_v25  ;;  %v7708_v18 = vld [vmem:[#allocation8 + $0x2ac] ss:$16 sps:$4 sm:$0xff]   ;;  %v7717_v25 = vld [vmem:[#allocation8 + $0x2e4] ss:$16 sps:$4 sm:$0xff]  }
  0xd5   :  { %1240 = vmatpush1.bf16.msra.mxu0 %v7655_v21  ;;  %1322 = vmatpush1.bf16.msra.mxu1 %v7658_v26  ;;  %v7711_v21 = vld [vmem:[#allocation8 + $0x2c4] ss:$16 sps:$4 sm:$0xff]   ;;  %v7720_v26 = vld [vmem:[#allocation8 + $0x2ec] ss:$16 sps:$4 sm:$0xff]  }
  0xd6   :  { %1241 = vmatprep.subr.bf16.mxu0 %v7663_v27  ;;  %1323 = vmatprep.subr.bf16.mxu1 %v7666_v28  ;;  %v7715_v27 = vld [vmem:[#allocation8 + $0x2e0] ss:$16 sps:$4 sm:$0xff]   ;;  %v7718_v28 = vld [vmem:[#allocation8 + $0x2e8] ss:$16 sps:$4 sm:$0xff]  }
  0xd9   :  { %1242 = vmatpush1.bf16.msra.mxu0 %v7661_v29  ;;  %1324 = vmatpush1.bf16.msra.mxu1 %v7664_v30  ;;  %v7723_v29 = vld [vmem:[#allocation8 + $0x304] ss:$16 sps:$4 sm:$0xff]   ;;  %v7726_v30 = vld [vmem:[#allocation8 + $0x30c] ss:$16 sps:$4 sm:$0xff]  }
  0xda   :  { %1243 = vmatprep.subr.bf16.mxu0 %v7669_v31  ;;  %1325 = vmatprep.subr.bf16.mxu1 %v7672_v32  ;;  %v7721_v31 = vld [vmem:[#allocation8 + $0x300] ss:$16 sps:$4 sm:$0xff]   ;;  %v7724_v32 = vld [vmem:[#allocation8 + $0x308] ss:$16 sps:$4 sm:$0xff]  }
  0xdd   :  { %1244 = vmatpush1.bf16.msra.mxu0 %v7667_v33  ;;  %1326 = vmatpush1.bf16.msra.mxu1 %v7670_v34  ;;  %v7729_v33 = vld [vmem:[#allocation8 + $0x324] ss:$16 sps:$4 sm:$0xff]   ;;  %v7732_v34 = vld [vmem:[#allocation8 + $0x32c] ss:$16 sps:$4 sm:$0xff]  }
  0xde   :  { %1254 = vmatprep.subr.bf16.mxu0 %v7675_v35  ;;  %1336 = vmatprep.subr.bf16.mxu1 %v7678_v36  ;;  %v7727_v35 = vld [vmem:[#allocation8 + $0x320] ss:$16 sps:$4 sm:$0xff]   ;;  %v7730_v36 = vld [vmem:[#allocation8 + $0x328] ss:$16 sps:$4 sm:$0xff]  }
 0x173   :  { %v367_v44 = vpop.f32.mrb[0].mxu0  ;;  %v9116_v0 = vpop.f32.mrb[0].mxu1 }
 0x174   :  { %v368_v45 = vadd.f32 %v367_v44, %v156_v42  ;;  %v369_v46 = vpop.f32.mrb[1].mxu0  ;;  %v410_v3 = vpop.f32.mrb[1].mxu1  ;;  %v7738_v42 = vld [vmem:[#allocation8 + $0x34c] ss:$16 sps:$4 sm:$0xff]   ;;  %v7736_v44 = vld [vmem:[#allocation8 + $0x348] ss:$16 sps:$4 sm:$0xff]  }
 0x175   :  { %v370_v47 = vadd.f32 %v369_v46, %v160_v43  ;;  %v371_v48 = vpop.f32.mrb[2].mxu0  ;;  %v411_v6 = vadd.f32 %v410_v3, %v168_v63  ;;  %v412_v7 = vpop.f32.mrb[2].mxu1  ;;  %v7733_v43 = vld [vmem:[#allocation8 + $0x340] ss:$16 sps:$4 sm:$0xff]   ;;  %v7744_v46 = vld [vmem:[#allocation8 + $0x36c] ss:$16 sps:$4 sm:$0xff]  }
 0x176   :  { %v415_v49 = vmax.f32 %v368_v45, 0.0  ;;  %v372_v50 = vpop.f32.mrb[3].mxu0  ;;  %v413_v8 = vpop.f32.mrb[3].mxu1  ;;  %v7741_v45 = vld [vmem:[#allocation8 + $0x364] ss:$16 sps:$4 sm:$0xff]  }
 0x177   :  { %v416_v51 = vmax.f32 %v370_v47, 0.0  ;;  %v418_v9 = vmax.f32 %v411_v6, 0.0  ;;  %v7739_v47 = vld [vmem:[#allocation8 + $0x360] ss:$16 sps:$4 sm:$0xff]   ;;  %v7742_v48 = vld [vmem:[#allocation8 + $0x368] ss:$16 sps:$4 sm:$0xff]  }
 0x178   :  { %v419_v58 = vpack.c.bf16 %v415_v49, %v415_v49  ;;  %v7747_v49 = vld [vmem:[#allocation8 + $0x384] ss:$16 sps:$4 sm:$0xff]   ;;  %v7750_v50 = vld [vmem:[#allocation8 + $0x38c] ss:$16 sps:$4 sm:$0xff]   ;;  %v7760_v63 = vld [vmem:[#allocation8 + $0x3c8] ss:$16 sps:$4 sm:$0xff]  }
 0x179   :  { %v420_v57 = vpack.c.bf16 %v416_v51, %v416_v51  ;;  %v422_v14 = vpack.c.bf16 %v418_v9, %v418_v9  ;;  %v7745_v51 = vld [vmem:[#allocation8 + $0x380] ss:$16 sps:$4 sm:$0xff]   ;;  %v7774_v6 = vld [vmem:[#allocation8 + $0x40c] ss:$16 sps:$4 sm:$0xff]   ;;  %v7772_v8 = vld [vmem:[#allocation8 + $0x408] ss:$16 sps:$4 sm:$0xff]  }
 0x17a   :  { %v7763_v3 = vld [vmem:[#allocation8 + $0x3e0] ss:$16 sps:$4 sm:$0xff]   ;;  %v7777_v9 = vld [vmem:[#allocation8 + $0x424] ss:$16 sps:$4 sm:$0xff]  }
 0x17b   :  { %1245 = vmatprep.mubr.bf16.mxu0 %v420_v57  ;;  %1327 = vmatprep.mubr.bf16.mxu1 %v420_v57  ;;  %v7751_v57 = vld [vmem:[#allocation8 + $0x3a0] ss:$16 sps:$4 sm:$0xff]  }
 0x17c   :  { %1246 = vmatmul.mubr.bf16.vlgmr.msra.gmra.mrb[4].mxu0 %v419_v58  ;;  %1328 = vmatmul.mubr.bf16.vlgmr.msra.gmra.mrb[4].mxu1 %v419_v58  ;;  %v7754_v58 = vld [vmem:[#allocation8 + $0x3a8] ss:$16 sps:$4 sm:$0xff]  }
 0x17d   :  { %1255 = vmatpush1.bf16.msra.mxu0 %v7673_v52  ;;  %1337 = vmatpush1.bf16.msra.mxu1 %v7676_v53  ;;  %v7748_v52 = vld [vmem:[#allocation8 + $0x388] ss:$16 sps:$4 sm:$0xff]   ;;  %v7753_v53 = vld [vmem:[#allocation8 + $0x3a4] ss:$16 sps:$4 sm:$0xff]  }
 0x17e   :  { %1256 = vmatprep.subr.bf16.mxu0 %v7681_v54  ;;  %1338 = vmatprep.subr.bf16.mxu1 %v7684_v55  ;;  %v7756_v54 = vld [vmem:[#allocation8 + $0x3ac] ss:$16 sps:$4 sm:$0xff]   ;;  %v9119_v55 = vsub.s32 2, %v9097_v38 }
 0x17f   :  { %1286 = vmatprep.mubr.bf16.mxu0 %v422_v14  ;;  %1368 = vmatprep.mubr.bf16.mxu1 %v422_v14  ;;  %v7786_v14 = vld [vmem:[#allocation8 + $0x44c] ss:$16 sps:$4 sm:$0xff]  }
 0x181   :  { %1257 = vmatpush1.bf16.msra.mxu0 %v7679_v59  ;;  %1339 = vmatpush1.bf16.msra.mxu1 %v7682_v60  ;;  %v7759_v59 = vld [vmem:[#allocation8 + $0x3c4] ss:$16 sps:$4 sm:$0xff]   ;;  %v7762_v60 = vld [vmem:[#allocation8 + $0x3cc] ss:$16 sps:$4 sm:$0xff]  }
 0x182   :  { %1258 = vmatprep.subr.bf16.mxu0 %v7687_v61  ;;  %1340 = vmatprep.subr.bf16.mxu1 %v7690_v62  ;;  %v164_v61 = vrot.slane %v9102_v40, %v9119_v55  ;;  %v7757_v62 = vld [vmem:[#allocation8 + $0x3c0] ss:$16 sps:$4 sm:$0xff]  }
 0x183   :  { %v7769_v40 = vld [vmem:[#allocation8 + $0x400] ss:$16 sps:$4 sm:$0xff]  }
 0x184   :  { %v409_v38 = vadd.f32 %v9116_v0, %v164_v61  ;;  %v7775_v0 = vld [vmem:[#allocation8 + $0x420] ss:$16 sps:$4 sm:$0xff]  }
 0x185   :  { %1259 = vmatpush1.bf16.msra.mxu0 %v7685_v1  ;;  %1341 = vmatpush1.bf16.msra.mxu1 %v7688_v2  ;;  %v7765_v1 = vld [vmem:[#allocation8 + $0x3e4] ss:$16 sps:$4 sm:$0xff]   ;;  %v7768_v2 = vld [vmem:[#allocation8 + $0x3ec] ss:$16 sps:$4 sm:$0xff]   ;;  %v7841_v61 = vld [vmem:[#allocation8 + $0x580] ss:$16 sps:$4 sm:$0xff]  }
 0x186   :  { %1260 = vmatprep.subr.bf16.mxu0 %v7693_v4  ;;  %1342 = vmatprep.subr.bf16.mxu1 %v7696_v5  ;;  %v7766_v4 = vld [vmem:[#allocation8 + $0x3e8] ss:$16 sps:$4 sm:$0xff]   ;;  %v7771_v5 = vld [vmem:[#allocation8 + $0x404] ss:$16 sps:$4 sm:$0xff]   ;;  %v417_v7 = vmax.f32 %v409_v38, 0.0 }
 0x187   :  { %v7850_v38 = vld [vmem:[#allocation8 + $0x5a8] ss:$16 sps:$4 sm:$0xff]  }
 0x189   :  { %1261 = vmatpush1.bf16.msra.mxu0 %v7691_v10  ;;  %1343 = vmatpush1.bf16.msra.mxu1 %v7694_v11  ;;  %v7780_v10 = vld [vmem:[#allocation8 + $0x42c] ss:$16 sps:$4 sm:$0xff]   ;;  %v421_v11 = vpack.c.bf16 %v417_v7, %v417_v7  ;;  %v7861_v7 = vld [vmem:[#allocation8 + $0x5e4] ss:$16 sps:$4 sm:$0xff]  }
 0x18a   :  { %1262 = vmatprep.subr.bf16.mxu0 %v7699_v12  ;;  %1344 = vmatprep.subr.bf16.mxu1 %v7702_v13  ;;  %v7778_v12 = vld [vmem:[#allocation8 + $0x428] ss:$16 sps:$4 sm:$0xff]   ;;  %v7783_v13 = vld [vmem:[#allocation8 + $0x444] ss:$16 sps:$4 sm:$0xff]  }
 0x18d   :  { %1263 = vmatpush1.bf16.msra.mxu0 %v7697_v15  ;;  %1345 = vmatpush1.bf16.msra.mxu1 %v7700_v16  ;;  %v7781_v15 = vld [vmem:[#allocation8 + $0x440] ss:$16 sps:$4 sm:$0xff]   ;;  %v7784_v16 = vld [vmem:[#allocation8 + $0x448] ss:$16 sps:$4 sm:$0xff]  }
 0x18e   :  { %1264 = vmatprep.subr.bf16.mxu0 %v7705_v17  ;;  %1346 = vmatprep.subr.bf16.mxu1 %v7708_v18  ;;  %v7789_v17 = vld [vmem:[#allocation8 + $0x464] ss:$16 sps:$4 sm:$0xff]   ;;  %v7792_v18 = vld [vmem:[#allocation8 + $0x46c] ss:$16 sps:$4 sm:$0xff]  }
 0x191   :  { %1265 = vmatpush1.bf16.msra.mxu0 %v7703_v19  ;;  %1347 = vmatpush1.bf16.msra.mxu1 %v7706_v20  ;;  %v7787_v19 = vld [vmem:[#allocation8 + $0x460] ss:$16 sps:$4 sm:$0xff]   ;;  %v7790_v20 = vld [vmem:[#allocation8 + $0x468] ss:$16 sps:$4 sm:$0xff]  }
 0x192   :  { %1266 = vmatprep.subr.bf16.mxu0 %v7711_v21  ;;  %1348 = vmatprep.subr.bf16.mxu1 %v7714_v22  ;;  %v7795_v21 = vld [vmem:[#allocation8 + $0x484] ss:$16 sps:$4 sm:$0xff]   ;;  %v7798_v22 = vld [vmem:[#allocation8 + $0x48c] ss:$16 sps:$4 sm:$0xff]  }
 0x195   :  { %1267 = vmatpush1.bf16.msra.mxu0 %v7709_v23  ;;  %1349 = vmatpush1.bf16.msra.mxu1 %v7712_v24  ;;  %v7793_v23 = vld [vmem:[#allocation8 + $0x480] ss:$16 sps:$4 sm:$0xff]   ;;  %v7796_v24 = vld [vmem:[#allocation8 + $0x488] ss:$16 sps:$4 sm:$0xff]  }
 0x196   :  { %1268 = vmatprep.subr.bf16.mxu0 %v7717_v25  ;;  %1350 = vmatprep.subr.bf16.mxu1 %v7720_v26  ;;  %v7801_v25 = vld [vmem:[#allocation8 + $0x4a4] ss:$16 sps:$4 sm:$0xff]   ;;  %v7804_v26 = vld [vmem:[#allocation8 + $0x4ac] ss:$16 sps:$4 sm:$0xff]  }
 0x199   :  { %1269 = vmatpush1.bf16.msra.mxu0 %v7715_v27  ;;  %1351 = vmatpush1.bf16.msra.mxu1 %v7718_v28  ;;  %v7799_v27 = vld [vmem:[#allocation8 + $0x4a0] ss:$16 sps:$4 sm:$0xff]   ;;  %v7802_v28 = vld [vmem:[#allocation8 + $0x4a8] ss:$16 sps:$4 sm:$0xff]  }
 0x19a   :  { %1270 = vmatprep.subr.bf16.mxu0 %v7723_v29  ;;  %1352 = vmatprep.subr.bf16.mxu1 %v7726_v30  ;;  %v7807_v29 = vld [vmem:[#allocation8 + $0x4c4] ss:$16 sps:$4 sm:$0xff]   ;;  %v7810_v30 = vld [vmem:[#allocation8 + $0x4cc] ss:$16 sps:$4 sm:$0xff]  }
 0x19d   :  { %1271 = vmatpush1.bf16.msra.mxu0 %v7721_v31  ;;  %1353 = vmatpush1.bf16.msra.mxu1 %v7724_v32  ;;  %v7805_v31 = vld [vmem:[#allocation8 + $0x4c0] ss:$16 sps:$4 sm:$0xff]   ;;  %v7808_v32 = vld [vmem:[#allocation8 + $0x4c8] ss:$16 sps:$4 sm:$0xff]  }
 0x19e   :  { %1272 = vmatprep.subr.bf16.mxu0 %v7729_v33  ;;  %1354 = vmatprep.subr.bf16.mxu1 %v7732_v34  ;;  %v7813_v33 = vld [vmem:[#allocation8 + $0x4e4] ss:$16 sps:$4 sm:$0xff]   ;;  %v7816_v34 = vld [vmem:[#allocation8 + $0x4ec] ss:$16 sps:$4 sm:$0xff]  }
 0x1a1   :  { %1273 = vmatpush1.bf16.msra.mxu0 %v7727_v35  ;;  %1355 = vmatpush1.bf16.msra.mxu1 %v7730_v36  ;;  %v7811_v35 = vld [vmem:[#allocation8 + $0x4e0] ss:$16 sps:$4 sm:$0xff]   ;;  %v7814_v36 = vld [vmem:[#allocation8 + $0x4e8] ss:$16 sps:$4 sm:$0xff]  }
 0x1a2   :  { %1274 = vmatprep.subr.bf16.mxu0 %v7735_v37  ;;  %1356 = vmatprep.subr.bf16.mxu1 %v7738_v42  ;;  %v7819_v37 = vld [vmem:[#allocation8 + $0x504] ss:$16 sps:$4 sm:$0xff]   ;;  %v7822_v42 = vld [vmem:[#allocation8 + $0x50c] ss:$16 sps:$4 sm:$0xff]  }
 0x1a5   :  { %1275 = vmatpush1.bf16.msra.mxu0 %v7733_v43  ;;  %1357 = vmatpush1.bf16.msra.mxu1 %v7736_v44  ;;  %v7817_v43 = vld [vmem:[#allocation8 + $0x500] ss:$16 sps:$4 sm:$0xff]   ;;  %v7820_v44 = vld [vmem:[#allocation8 + $0x508] ss:$16 sps:$4 sm:$0xff]  }
 0x1a6   :  { %1276 = vmatprep.subr.bf16.mxu0 %v7741_v45  ;;  %1358 = vmatprep.subr.bf16.mxu1 %v7744_v46  ;;  %v7825_v45 = vld [vmem:[#allocation8 + $0x524] ss:$16 sps:$4 sm:$0xff]   ;;  %v7828_v46 = vld [vmem:[#allocation8 + $0x52c] ss:$16 sps:$4 sm:$0xff]  }
 0x1a9   :  { %1277 = vmatpush1.bf16.msra.mxu0 %v7739_v47  ;;  %1359 = vmatpush1.bf16.msra.mxu1 %v7742_v48  ;;  %v7823_v47 = vld [vmem:[#allocation8 + $0x520] ss:$16 sps:$4 sm:$0xff]   ;;  %v7826_v48 = vld [vmem:[#allocation8 + $0x528] ss:$16 sps:$4 sm:$0xff]  }
 0x1aa   :  { %1278 = vmatprep.subr.bf16.mxu0 %v7747_v49  ;;  %1360 = vmatprep.subr.bf16.mxu1 %v7750_v50  ;;  %v7831_v49 = vld [vmem:[#allocation8 + $0x544] ss:$16 sps:$4 sm:$0xff]   ;;  %v7834_v50 = vld [vmem:[#allocation8 + $0x54c] ss:$16 sps:$4 sm:$0xff]  }
 0x1ad   :  { %1279 = vmatpush1.bf16.msra.mxu0 %v7745_v51  ;;  %1361 = vmatpush1.bf16.msra.mxu1 %v7748_v52  ;;  %v7829_v51 = vld [vmem:[#allocation8 + $0x540] ss:$16 sps:$4 sm:$0xff]   ;;  %v7832_v52 = vld [vmem:[#allocation8 + $0x548] ss:$16 sps:$4 sm:$0xff]  }
 0x1ae   :  { %1280 = vmatprep.subr.bf16.mxu0 %v7753_v53  ;;  %1362 = vmatprep.subr.bf16.mxu1 %v7756_v54  ;;  %v7837_v53 = vld [vmem:[#allocation8 + $0x564] ss:$16 sps:$4 sm:$0xff]   ;;  %v7840_v54 = vld [vmem:[#allocation8 + $0x56c] ss:$16 sps:$4 sm:$0xff]  }
 0x1b1   :  { %1281 = vmatpush1.bf16.msra.mxu0 %v7751_v57  ;;  %1363 = vmatpush1.bf16.msra.mxu1 %v7754_v58  ;;  %v7835_v57 = vld [vmem:[#allocation8 + $0x560] ss:$16 sps:$4 sm:$0xff]   ;;  %v7838_v58 = vld [vmem:[#allocation8 + $0x568] ss:$16 sps:$4 sm:$0xff]  }
 0x1b2   :  { %1282 = vmatprep.subr.bf16.mxu0 %v7759_v59  ;;  %1364 = vmatprep.subr.bf16.mxu1 %v7762_v60  ;;  %v7843_v59 = vld [vmem:[#allocation8 + $0x584] ss:$16 sps:$4 sm:$0xff]   ;;  %v7846_v60 = vld [vmem:[#allocation8 + $0x58c] ss:$16 sps:$4 sm:$0xff]  }
 0x1b5   :  { %1283 = vmatpush1.bf16.msra.mxu0 %v7757_v62  ;;  %1365 = vmatpush1.bf16.msra.mxu1 %v7760_v63  ;;  %v7844_v62 = vld [vmem:[#allocation8 + $0x588] ss:$16 sps:$4 sm:$0xff]   ;;  %v7849_v63 = vld [vmem:[#allocation8 + $0x5a4] ss:$16 sps:$4 sm:$0xff]  }
 0x1b6   :  { %1284 = vmatprep.subr.bf16.mxu0 %v7765_v1  ;;  %1366 = vmatprep.subr.bf16.mxu1 %v7768_v2  ;;  %v7852_v1 = vld [vmem:[#allocation8 + $0x5ac] ss:$16 sps:$4 sm:$0xff]   ;;  %v7847_v2 = vld [vmem:[#allocation8 + $0x5a0] ss:$16 sps:$4 sm:$0xff]  }
 0x1b9   :  { %1285 = vmatpush1.bf16.msra.mxu0 %v7763_v3  ;;  %1367 = vmatpush1.bf16.msra.mxu1 %v7766_v4  ;;  %v7855_v3 = vld [vmem:[#allocation8 + $0x5c4] ss:$16 sps:$4 sm:$0xff]   ;;  %v7858_v4 = vld [vmem:[#allocation8 + $0x5cc] ss:$16 sps:$4 sm:$0xff]  }
 0x1ba   :  { %2177 = vmatprep.subr.bf16.mxu0 %v7771_v5  ;;  %2259 = vmatprep.subr.bf16.mxu1 %v7774_v6  ;;  %v7853_v5 = vld [vmem:[#allocation8 + $0x5c0] ss:$16 sps:$4 sm:$0xff]   ;;  %v7856_v6 = vld [vmem:[#allocation8 + $0x5c8] ss:$16 sps:$4 sm:$0xff]  }
 0x1bc   :  { %1287 = vmatmul.mubr.bf16.vlgmr.msra.gmra.mrb[4].mxu0 %v421_v11  ;;  %1369 = vmatmul.mubr.bf16.vlgmr.msra.gmra.mrb[4].mxu1 %v421_v11  ;;  %v7870_v11 = vld [vmem:[#allocation8 + $0x60c] ss:$16 sps:$4 sm:$0xff]  }
 0x1bd   :  { %2178 = vmatpush1.bf16.msra.mxu0 %v7769_v40  ;;  %2260 = vmatpush1.bf16.msra.mxu1 %v7772_v8  ;;  %v7864_v40 = vld [vmem:[#allocation8 + $0x5ec] ss:$16 sps:$4 sm:$0xff]   ;;  %v7859_v8 = vld [vmem:[#allocation8 + $0x5e0] ss:$16 sps:$4 sm:$0xff]  }
 0x1be   :  { %2179 = vmatprep.subr.bf16.mxu0 %v7777_v9  ;;  %2261 = vmatprep.subr.bf16.mxu1 %v7780_v10  ;;  %v7862_v9 = vld [vmem:[#allocation8 + $0x5e8] ss:$16 sps:$4 sm:$0xff]   ;;  %v7867_v10 = vld [vmem:[#allocation8 + $0x604] ss:$16 sps:$4 sm:$0xff]  }
 0x1c1   :  { %2180 = vmatpush1.bf16.msra.mxu0 %v7775_v0  ;;  %2262 = vmatpush1.bf16.msra.mxu1 %v7778_v12  ;;  %v9124_v0 = vld [vmem:[#allocation10] sm:$0xf] }
 0x1c2   :  { %2181 = vmatprep.subr.bf16.mxu0 %v7783_v13  ;;  %2263 = vmatprep.subr.bf16.mxu1 %v7786_v14  ;;  %v556_v12 = vrot.slane %v9124_v0, %v9100_v39  ;;  %v560_v13 = vrot.slane %v9124_v0, %v9105_v41  ;;  %v568_v14 = vrot.slane %v9124_v0, %v9112_v56 }
 0x1c5   :  { %2182 = vmatpush1.bf16.msra.mxu0 %v7781_v15  ;;  %2264 = vmatpush1.bf16.msra.mxu1 %v7784_v16 }
 0x1c6   :  { %2183 = vmatprep.subr.bf16.mxu0 %v7789_v17  ;;  %2265 = vmatprep.subr.bf16.mxu1 %v7792_v18 }
 0x1c9   :  { %2184 = vmatpush1.bf16.msra.mxu0 %v7787_v19  ;;  %2266 = vmatpush1.bf16.msra.mxu1 %v7790_v20 }
 0x1ca   :  { %2185 = vmatprep.subr.bf16.mxu0 %v7795_v21  ;;  %2267 = vmatprep.subr.bf16.mxu1 %v7798_v22 }
 0x1cd   :  { %2186 = vmatpush1.bf16.msra.mxu0 %v7793_v23  ;;  %2268 = vmatpush1.bf16.msra.mxu1 %v7796_v24 }
 0x1ce   :  { %2187 = vmatprep.subr.bf16.mxu0 %v7801_v25  ;;  %2269 = vmatprep.subr.bf16.mxu1 %v7804_v26 }
 0x1d1   :  { %2188 = vmatpush1.bf16.msra.mxu0 %v7799_v27  ;;  %2270 = vmatpush1.bf16.msra.mxu1 %v7802_v28 }
 0x1d2   :  { %2189 = vmatprep.subr.bf16.mxu0 %v7807_v29  ;;  %2271 = vmatprep.subr.bf16.mxu1 %v7810_v30  ;;  %v7865_v30 = vld [vmem:[#allocation8 + $0x600] ss:$16 sps:$4 sm:$0xff]  }
 0x1d5   :  { %2190 = vmatpush1.bf16.msra.mxu0 %v7805_v31  ;;  %2272 = vmatpush1.bf16.msra.mxu1 %v7808_v32  ;;  %v7868_v31 = vld [vmem:[#allocation8 + $0x608] ss:$16 sps:$4 sm:$0xff]  }
 0x1d6   :  { %2191 = vmatprep.subr.bf16.mxu0 %v7813_v33  ;;  %2273 = vmatprep.subr.bf16.mxu1 %v7816_v34  ;;  %v7873_v33 = vld [vmem:[#allocation8 + $0x624] ss:$16 sps:$4 sm:$0xff]   ;;  %v7876_v34 = vld [vmem:[#allocation8 + $0x62c] ss:$16 sps:$4 sm:$0xff]  }
 0x1d9   :  { %2192 = vmatpush1.bf16.msra.mxu0 %v7811_v35  ;;  %2274 = vmatpush1.bf16.msra.mxu1 %v7814_v36  ;;  %v7871_v36 = vld [vmem:[#allocation8 + $0x620] ss:$16 sps:$4 sm:$0xff]  }
 0x1da   :  { %2193 = vmatprep.subr.bf16.mxu0 %v7819_v37  ;;  %2275 = vmatprep.subr.bf16.mxu1 %v7822_v42  ;;  %v7874_v37 = vld [vmem:[#allocation8 + $0x628] ss:$16 sps:$4 sm:$0xff]   ;;  %v7879_v42 = vld [vmem:[#allocation8 + $0x644] ss:$16 sps:$4 sm:$0xff]  }
 0x1dd   :  { %2194 = vmatpush1.bf16.msra.mxu0 %v7817_v43  ;;  %2276 = vmatpush1.bf16.msra.mxu1 %v7820_v44  ;;  %v7882_v43 = vld [vmem:[#allocation8 + $0x64c] ss:$16 sps:$4 sm:$0xff]   ;;  %v7877_v44 = vld [vmem:[#allocation8 + $0x640] ss:$16 sps:$4 sm:$0xff]  }
 0x1de   :  { %2195 = vmatprep.subr.bf16.mxu0 %v7825_v45  ;;  %2277 = vmatprep.subr.bf16.mxu1 %v7828_v46  ;;  %v7880_v45 = vld [vmem:[#allocation8 + $0x648] ss:$16 sps:$4 sm:$0xff]   ;;  %v7885_v46 = vld [vmem:[#allocation8 + $0x664] ss:$16 sps:$4 sm:$0xff]  }
 0x1e1   :  { %2196 = vmatpush1.bf16.msra.mxu0 %v7823_v47  ;;  %2278 = vmatpush1.bf16.msra.mxu1 %v7826_v48  ;;  %v7888_v47 = vld [vmem:[#allocation8 + $0x66c] ss:$16 sps:$4 sm:$0xff]   ;;  %v7883_v48 = vld [vmem:[#allocation8 + $0x660] ss:$16 sps:$4 sm:$0xff]  }
 0x1e2   :  { %2197 = vmatprep.subr.bf16.mxu0 %v7831_v49  ;;  %2279 = vmatprep.subr.bf16.mxu1 %v7834_v50  ;;  %v7886_v49 = vld [vmem:[#allocation8 + $0x668] ss:$16 sps:$4 sm:$0xff]   ;;  %v7891_v50 = vld [vmem:[#allocation8 + $0x684] ss:$16 sps:$4 sm:$0xff]  }
 0x1e5   :  { %2198 = vmatpush1.bf16.msra.mxu0 %v7829_v51  ;;  %2280 = vmatpush1.bf16.msra.mxu1 %v7832_v52  ;;  %v7894_v51 = vld [vmem:[#allocation8 + $0x68c] ss:$16 sps:$4 sm:$0xff]   ;;  %v7889_v52 = vld [vmem:[#allocation8 + $0x680] ss:$16 sps:$4 sm:$0xff]  }
 0x1e6   :  { %2199 = vmatprep.subr.bf16.mxu0 %v7837_v53  ;;  %2281 = vmatprep.subr.bf16.mxu1 %v7840_v54  ;;  %v7892_v53 = vld [vmem:[#allocation8 + $0x688] ss:$16 sps:$4 sm:$0xff]   ;;  %v7897_v54 = vld [vmem:[#allocation8 + $0x6a4] ss:$16 sps:$4 sm:$0xff]  }
 0x1e9   :  { %2200 = vmatpush1.bf16.msra.mxu0 %v7835_v57  ;;  %2282 = vmatpush1.bf16.msra.mxu1 %v7838_v58  ;;  %v7900_v57 = vld [vmem:[#allocation8 + $0x6ac] ss:$16 sps:$4 sm:$0xff]   ;;  %v7895_v58 = vld [vmem:[#allocation8 + $0x6a0] ss:$16 sps:$4 sm:$0xff]  }
 0x1ea   :  { %2201 = vmatprep.subr.bf16.mxu0 %v7843_v59  ;;  %2283 = vmatprep.subr.bf16.mxu1 %v7846_v60  ;;  %v7898_v59 = vld [vmem:[#allocation8 + $0x6a8] ss:$16 sps:$4 sm:$0xff]   ;;  %v7903_v60 = vld [vmem:[#allocation8 + $0x6c4] ss:$16 sps:$4 sm:$0xff]  }
 0x1ed   :  { %2202 = vmatpush1.bf16.msra.mxu0 %v7841_v61  ;;  %2284 = vmatpush1.bf16.msra.mxu1 %v7844_v62  ;;  %v7906_v61 = vld [vmem:[#allocation8 + $0x6cc] ss:$16 sps:$4 sm:$0xff]   ;;  %v7901_v62 = vld [vmem:[#allocation8 + $0x6c0] ss:$16 sps:$4 sm:$0xff]  }
 0x1ee   :  { %2203 = vmatprep.subr.bf16.mxu0 %v7849_v63  ;;  %2285 = vmatprep.subr.bf16.mxu1 %v7852_v1  ;;  %v7904_v63 = vld [vmem:[#allocation8 + $0x6c8] ss:$16 sps:$4 sm:$0xff]   ;;  %v7909_v1 = vld [vmem:[#allocation8 + $0x6e4] ss:$16 sps:$4 sm:$0xff]  }
 0x1f1   :  { %2204 = vmatpush1.bf16.msra.mxu0 %v7847_v2  ;;  %2286 = vmatpush1.bf16.msra.mxu1 %v7850_v38  ;;  %v7912_v2 = vld [vmem:[#allocation8 + $0x6ec] ss:$16 sps:$4 sm:$0xff]   ;;  %v7907_v38 = vld [vmem:[#allocation8 + $0x6e0] ss:$16 sps:$4 sm:$0xff]  }
 0x1f2   :  { %2205 = vmatprep.subr.bf16.mxu0 %v7855_v3  ;;  %2287 = vmatprep.subr.bf16.mxu1 %v7858_v4  ;;  %v7910_v3 = vld [vmem:[#allocation8 + $0x6e8] ss:$16 sps:$4 sm:$0xff]   ;;  %v7915_v4 = vld [vmem:[#allocation8 + $0x704] ss:$16 sps:$4 sm:$0xff]  }
 0x1f5   :  { %2206 = vmatpush1.bf16.msra.mxu0 %v7853_v5  ;;  %2288 = vmatpush1.bf16.msra.mxu1 %v7856_v6  ;;  %v7918_v5 = vld [vmem:[#allocation8 + $0x70c] ss:$16 sps:$4 sm:$0xff]   ;;  %v7913_v6 = vld [vmem:[#allocation8 + $0x700] ss:$16 sps:$4 sm:$0xff]  }
 0x1f6   :  { %2207 = vmatprep.subr.bf16.mxu0 %v7861_v7  ;;  %2289 = vmatprep.subr.bf16.mxu1 %v7864_v40  ;;  %v7916_v7 = vld [vmem:[#allocation8 + $0x708] ss:$16 sps:$4 sm:$0xff]   ;;  %v7921_v40 = vld [vmem:[#allocation8 + $0x724] ss:$16 sps:$4 sm:$0xff]  }
 0x1f9   :  { %2208 = vmatpush1.bf16.msra.mxu0 %v7859_v8  ;;  %2290 = vmatpush1.bf16.msra.mxu1 %v7862_v9  ;;  %v7924_v8 = vld [vmem:[#allocation8 + $0x72c] ss:$16 sps:$4 sm:$0xff]   ;;  %v7919_v9 = vld [vmem:[#allocation8 + $0x720] ss:$16 sps:$4 sm:$0xff]  }
 0x1fa   :  { %2218 = vmatprep.subr.bf16.mxu0 %v7867_v10  ;;  %2300 = vmatprep.subr.bf16.mxu1 %v7870_v11  ;;  %v7922_v10 = vld [vmem:[#allocation8 + $0x728] ss:$16 sps:$4 sm:$0xff]   ;;  %v7927_v11 = vld [vmem:[#allocation8 + $0x744] ss:$16 sps:$4 sm:$0xff]  }
 0x28f   :  { %v1288_v15 = vpop.f32.mrb[4].mxu0  ;;  %v9132_v16 = vpop.f32.mrb[4].mxu1 }
 0x290   :  { %v7444_v17 = vadd.f32 %v1288_v15, %v556_v12  ;;  %v1290_v18 = vpop.f32.mrb[5].mxu0  ;;  %v1372_v19 = vpop.f32.mrb[5].mxu1  ;;  %v7930_v12 = vld [vmem:[#allocation8 + $0x74c] ss:$16 sps:$4 sm:$0xff]   ;;  %v7933_v15 = vld [vmem:[#allocation8 + $0x764] ss:$16 sps:$4 sm:$0xff]  }
 0x291   :  { %v7445_v20 = vadd.f32 %v1290_v18, %v560_v13  ;;  %v7447_v21 = vadd.f32 %v1372_v19, %v568_v14  ;;  %v1292_v22 = vpop.f32.mrb[6].mxu0  ;;  %v1374_v23 = vpop.f32.mrb[6].mxu1  ;;  %v7925_v13 = vld [vmem:[#allocation8 + $0x740] ss:$16 sps:$4 sm:$0xff]   ;;  %v7928_v14 = vld [vmem:[#allocation8 + $0x748] ss:$16 sps:$4 sm:$0xff]  }
 0x292   :  { %v1377_v24 = vmax.f32 %v7444_v17, 0.0  ;;  %v1293_v25 = vpop.f32.mrb[7].mxu0  ;;  %v1375_v26 = vpop.f32.mrb[7].mxu1  ;;  %v7936_v17 = vld [vmem:[#allocation8 + $0x76c] ss:$16 sps:$4 sm:$0xff]  }
 0x293   :  { %v1378_v27 = vmax.f32 %v7445_v20, 0.0  ;;  %v1380_v28 = vmax.f32 %v7447_v21, 0.0  ;;  %v7931_v18 = vld [vmem:[#allocation8 + $0x760] ss:$16 sps:$4 sm:$0xff]   ;;  %v7934_v19 = vld [vmem:[#allocation8 + $0x768] ss:$16 sps:$4 sm:$0xff]  }
 0x294   :  { %v1381_v32 = vpack.c.bf16 %v1377_v24, %v1377_v24  ;;  %v7939_v20 = vld [vmem:[#allocation8 + $0x784] ss:$16 sps:$4 sm:$0xff]   ;;  %v7942_v21 = vld [vmem:[#allocation8 + $0x78c] ss:$16 sps:$4 sm:$0xff]   ;;  %v7937_v22 = vld [vmem:[#allocation8 + $0x780] ss:$16 sps:$4 sm:$0xff]  }
 0x295   :  { %v1382_v29 = vpack.c.bf16 %v1378_v27, %v1378_v27  ;;  %v1384_v35 = vpack.c.bf16 %v1380_v28, %v1380_v28  ;;  %v7940_v23 = vld [vmem:[#allocation8 + $0x788] ss:$16 sps:$4 sm:$0xff]   ;;  %v7945_v24 = vld [vmem:[#allocation8 + $0x7a4] ss:$16 sps:$4 sm:$0xff]   ;;  %v7948_v25 = vld [vmem:[#allocation8 + $0x7ac] ss:$16 sps:$4 sm:$0xff]   ;;  %v564_v28 = vrot.slane %v9124_v0, %v9119_v55 }
 0x296   :  { %v7943_v26 = vld [vmem:[#allocation8 + $0x7a0] ss:$16 sps:$4 sm:$0xff]   ;;  %v7946_v27 = vld [vmem:[#allocation8 + $0x7a8] ss:$16 sps:$4 sm:$0xff]   ;;  %v7963_v0 = vld [vmem:[#allocation8 + $0x804] ss:$16 sps:$4 sm:$0xff]  }
 0x297   :  { %2209 = vmatprep.mubr.bf16.mxu0 %v1382_v29  ;;  %2291 = vmatprep.mubr.bf16.mxu1 %v1382_v29  ;;  %v7951_v29 = vld [vmem:[#allocation8 + $0x7c4] ss:$16 sps:$4 sm:$0xff]  }
 0x298   :  { %2210 = vmatmul.mubr.bf16.vlgmr.msra.gmra.mrb[8].mxu0 %v1381_v32  ;;  %2292 = vmatmul.mubr.bf16.vlgmr.msra.gmra.mrb[8].mxu1 %v1381_v32  ;;  %v7952_v32 = vld [vmem:[#allocation8 + $0x7c8] ss:$16 sps:$4 sm:$0xff]  }
 0x299   :  { %2219 = vmatpush1.bf16.msra.mxu0 %v7865_v30  ;;  %2301 = vmatpush1.bf16.msra.mxu1 %v7868_v31  ;;  %v7954_v30 = vld [vmem:[#allocation8 + $0x7cc] ss:$16 sps:$4 sm:$0xff]   ;;  %v7949_v31 = vld [vmem:[#allocation8 + $0x7c0] ss:$16 sps:$4 sm:$0xff]  }
 0x29a   :  { %2250 = vmatprep.mubr.bf16.mxu0 %v1384_v35  ;;  %2332 = vmatprep.mubr.bf16.mxu1 %v1384_v35  ;;  %v7960_v35 = vld [vmem:[#allocation8 + $0x7ec] ss:$16 sps:$4 sm:$0xff]  }
 0x29b   :  { %2220 = vmatprep.subr.bf16.mxu0 %v7873_v33  ;;  %2302 = vmatprep.subr.bf16.mxu1 %v7876_v34  ;;  %v7446_v33 = vadd.f32 %v9132_v16, %v564_v28  ;;  %v7957_v34 = vld [vmem:[#allocation8 + $0x7e4] ss:$16 sps:$4 sm:$0xff]  }
 0x29c   :  { %v7969_v16 = vld [vmem:[#allocation8 + $0x824] ss:$16 sps:$4 sm:$0xff]  }
 0x29d   :  { %2221 = vmatpush1.bf16.msra.mxu0 %v7871_v36  ;;  %2303 = vmatpush1.bf16.msra.mxu1 %v7874_v37  ;;  %v7955_v36 = vld [vmem:[#allocation8 + $0x7e0] ss:$16 sps:$4 sm:$0xff]   ;;  %v7958_v37 = vld [vmem:[#allocation8 + $0x7e8] ss:$16 sps:$4 sm:$0xff]   ;;  %v8035_v28 = vld [vmem:[#allocation8 + $0x984] ss:$16 sps:$4 sm:$0xff]  }
 0x29e   :  { %2222 = vmatprep.subr.bf16.mxu0 %v7879_v42  ;;  %2304 = vmatprep.subr.bf16.mxu1 %v7882_v43  ;;  %v1379_v42 = vmax.f32 %v7446_v33, 0.0  ;;  %v7966_v43 = vld [vmem:[#allocation8 + $0x80c] ss:$16 sps:$4 sm:$0xff]  }
 0x29f   :  { %v8044_v33 = vld [vmem:[#allocation8 + $0x9ac] ss:$16 sps:$4 sm:$0xff]  }
 0x2a1   :  { %2223 = vmatpush1.bf16.msra.mxu0 %v7877_v44  ;;  %2305 = vmatpush1.bf16.msra.mxu1 %v7880_v45  ;;  %v7961_v44 = vld [vmem:[#allocation8 + $0x800] ss:$16 sps:$4 sm:$0xff]   ;;  %v7964_v45 = vld [vmem:[#allocation8 + $0x808] ss:$16 sps:$4 sm:$0xff]  }
 0x2a2   :  { %2224 = vmatprep.subr.bf16.mxu0 %v7885_v46  ;;  %2306 = vmatprep.subr.bf16.mxu1 %v7888_v47  ;;  %v1383_v46 = vpack.c.bf16 %v1379_v42, %v1379_v42  ;;  %v7972_v47 = vld [vmem:[#allocation8 + $0x82c] ss:$16 sps:$4 sm:$0xff]   ;;  %v8045_v42 = vld [vmem:[#allocation8 + $0x9c0] ss:$16 sps:$4 sm:$0xff]  }
 0x2a5   :  { %2225 = vmatpush1.bf16.msra.mxu0 %v7883_v48  ;;  %2307 = vmatpush1.bf16.msra.mxu1 %v7886_v49  ;;  %v7967_v48 = vld [vmem:[#allocation8 + $0x820] ss:$16 sps:$4 sm:$0xff]   ;;  %v7970_v49 = vld [vmem:[#allocation8 + $0x828] ss:$16 sps:$4 sm:$0xff]  }
 0x2a6   :  { %2226 = vmatprep.subr.bf16.mxu0 %v7891_v50  ;;  %2308 = vmatprep.subr.bf16.mxu1 %v7894_v51  ;;  %v7975_v50 = vld [vmem:[#allocation8 + $0x844] ss:$16 sps:$4 sm:$0xff]   ;;  %v7978_v51 = vld [vmem:[#allocation8 + $0x84c] ss:$16 sps:$4 sm:$0xff]  }
 0x2a9   :  { %2227 = vmatpush1.bf16.msra.mxu0 %v7889_v52  ;;  %2309 = vmatpush1.bf16.msra.mxu1 %v7892_v53  ;;  %v7973_v52 = vld [vmem:[#allocation8 + $0x840] ss:$16 sps:$4 sm:$0xff]   ;;  %v7976_v53 = vld [vmem:[#allocation8 + $0x848] ss:$16 sps:$4 sm:$0xff]  }
 0x2aa   :  { %2228 = vmatprep.subr.bf16.mxu0 %v7897_v54  ;;  %2310 = vmatprep.subr.bf16.mxu1 %v7900_v57  ;;  %v7981_v54 = vld [vmem:[#allocation8 + $0x864] ss:$16 sps:$4 sm:$0xff]   ;;  %v7984_v57 = vld [vmem:[#allocation8 + $0x86c] ss:$16 sps:$4 sm:$0xff]  }
 0x2ad   :  { %2229 = vmatpush1.bf16.msra.mxu0 %v7895_v58  ;;  %2311 = vmatpush1.bf16.msra.mxu1 %v7898_v59  ;;  %v7979_v58 = vld [vmem:[#allocation8 + $0x860] ss:$16 sps:$4 sm:$0xff]   ;;  %v7982_v59 = vld [vmem:[#allocation8 + $0x868] ss:$16 sps:$4 sm:$0xff]  }
 0x2ae   :  { %2230 = vmatprep.subr.bf16.mxu0 %v7903_v60  ;;  %2312 = vmatprep.subr.bf16.mxu1 %v7906_v61  ;;  %v7987_v60 = vld [vmem:[#allocation8 + $0x884] ss:$16 sps:$4 sm:$0xff]   ;;  %v7990_v61 = vld [vmem:[#allocation8 + $0x88c] ss:$16 sps:$4 sm:$0xff]  }
 0x2b1   :  { %2231 = vmatpush1.bf16.msra.mxu0 %v7901_v62  ;;  %2313 = vmatpush1.bf16.msra.mxu1 %v7904_v63  ;;  %v7985_v62 = vld [vmem:[#allocation8 + $0x880] ss:$16 sps:$4 sm:$0xff]   ;;  %v7988_v63 = vld [vmem:[#allocation8 + $0x888] ss:$16 sps:$4 sm:$0xff]  }
 0x2b2   :  { %2232 = vmatprep.subr.bf16.mxu0 %v7909_v1  ;;  %2314 = vmatprep.subr.bf16.mxu1 %v7912_v2  ;;  %v7993_v1 = vld [vmem:[#allocation8 + $0x8a4] ss:$16 sps:$4 sm:$0xff]   ;;  %v7996_v2 = vld [vmem:[#allocation8 + $0x8ac] ss:$16 sps:$4 sm:$0xff]  }
 0x2b5   :  { %2233 = vmatpush1.bf16.msra.mxu0 %v7907_v38  ;;  %2315 = vmatpush1.bf16.msra.mxu1 %v7910_v3  ;;  %v7991_v38 = vld [vmem:[#allocation8 + $0x8a0] ss:$16 sps:$4 sm:$0xff]   ;;  %v7994_v3 = vld [vmem:[#allocation8 + $0x8a8] ss:$16 sps:$4 sm:$0xff]  }
 0x2b6   :  { %2234 = vmatprep.subr.bf16.mxu0 %v7915_v4  ;;  %2316 = vmatprep.subr.bf16.mxu1 %v7918_v5  ;;  %v7999_v4 = vld [vmem:[#allocation8 + $0x8c4] ss:$16 sps:$4 sm:$0xff]   ;;  %v8002_v5 = vld [vmem:[#allocation8 + $0x8cc] ss:$16 sps:$4 sm:$0xff]  }
 0x2b9   :  { %2235 = vmatpush1.bf16.msra.mxu0 %v7913_v6  ;;  %2317 = vmatpush1.bf16.msra.mxu1 %v7916_v7  ;;  %v7997_v6 = vld [vmem:[#allocation8 + $0x8c0] ss:$16 sps:$4 sm:$0xff]   ;;  %v8000_v7 = vld [vmem:[#allocation8 + $0x8c8] ss:$16 sps:$4 sm:$0xff]  }
 0x2ba   :  { %2236 = vmatprep.subr.bf16.mxu0 %v7921_v40  ;;  %2318 = vmatprep.subr.bf16.mxu1 %v7924_v8  ;;  %v8005_v40 = vld [vmem:[#allocation8 + $0x8e4] ss:$16 sps:$4 sm:$0xff]   ;;  %v8008_v8 = vld [vmem:[#allocation8 + $0x8ec] ss:$16 sps:$4 sm:$0xff]  }
 0x2bd   :  { %2237 = vmatpush1.bf16.msra.mxu0 %v7919_v9  ;;  %2319 = vmatpush1.bf16.msra.mxu1 %v7922_v10  ;;  %v8003_v9 = vld [vmem:[#allocation8 + $0x8e0] ss:$16 sps:$4 sm:$0xff]   ;;  %v8006_v10 = vld [vmem:[#allocation8 + $0x8e8] ss:$16 sps:$4 sm:$0xff]  }
 0x2be   :  { %2238 = vmatprep.subr.bf16.mxu0 %v7927_v11  ;;  %2320 = vmatprep.subr.bf16.mxu1 %v7930_v12  ;;  %v8011_v11 = vld [vmem:[#allocation8 + $0x904] ss:$16 sps:$4 sm:$0xff]   ;;  %v8014_v12 = vld [vmem:[#allocation8 + $0x90c] ss:$16 sps:$4 sm:$0xff]  }
 0x2c1   :  { %2239 = vmatpush1.bf16.msra.mxu0 %v7925_v13  ;;  %2321 = vmatpush1.bf16.msra.mxu1 %v7928_v14  ;;  %v8009_v13 = vld [vmem:[#allocation8 + $0x900] ss:$16 sps:$4 sm:$0xff]   ;;  %v8012_v14 = vld [vmem:[#allocation8 + $0x908] ss:$16 sps:$4 sm:$0xff]  }
 0x2c2   :  { %2240 = vmatprep.subr.bf16.mxu0 %v7933_v15  ;;  %2322 = vmatprep.subr.bf16.mxu1 %v7936_v17  ;;  %v8017_v15 = vld [vmem:[#allocation8 + $0x924] ss:$16 sps:$4 sm:$0xff]   ;;  %v8020_v17 = vld [vmem:[#allocation8 + $0x92c] ss:$16 sps:$4 sm:$0xff]  }
 0x2c5   :  { %2241 = vmatpush1.bf16.msra.mxu0 %v7931_v18  ;;  %2323 = vmatpush1.bf16.msra.mxu1 %v7934_v19  ;;  %v8015_v18 = vld [vmem:[#allocation8 + $0x920] ss:$16 sps:$4 sm:$0xff]   ;;  %v8018_v19 = vld [vmem:[#allocation8 + $0x928] ss:$16 sps:$4 sm:$0xff]  }
 0x2c6   :  { %2242 = vmatprep.subr.bf16.mxu0 %v7939_v20  ;;  %2324 = vmatprep.subr.bf16.mxu1 %v7942_v21  ;;  %v8023_v20 = vld [vmem:[#allocation8 + $0x944] ss:$16 sps:$4 sm:$0xff]   ;;  %v8026_v21 = vld [vmem:[#allocation8 + $0x94c] ss:$16 sps:$4 sm:$0xff]  }
 0x2c9   :  { %2243 = vmatpush1.bf16.msra.mxu0 %v7937_v22  ;;  %2325 = vmatpush1.bf16.msra.mxu1 %v7940_v23  ;;  %v8021_v22 = vld [vmem:[#allocation8 + $0x940] ss:$16 sps:$4 sm:$0xff]   ;;  %v8024_v23 = vld [vmem:[#allocation8 + $0x948] ss:$16 sps:$4 sm:$0xff]  }
 0x2ca   :  { %2244 = vmatprep.subr.bf16.mxu0 %v7945_v24  ;;  %2326 = vmatprep.subr.bf16.mxu1 %v7948_v25  ;;  %v8029_v24 = vld [vmem:[#allocation8 + $0x964] ss:$16 sps:$4 sm:$0xff]   ;;  %v8032_v25 = vld [vmem:[#allocation8 + $0x96c] ss:$16 sps:$4 sm:$0xff]  }
 0x2cd   :  { %2245 = vmatpush1.bf16.msra.mxu0 %v7943_v26  ;;  %2327 = vmatpush1.bf16.msra.mxu1 %v7946_v27  ;;  %v8027_v26 = vld [vmem:[#allocation8 + $0x960] ss:$16 sps:$4 sm:$0xff]   ;;  %v8030_v27 = vld [vmem:[#allocation8 + $0x968] ss:$16 sps:$4 sm:$0xff]  }
 0x2ce   :  { %2246 = vmatprep.subr.bf16.mxu0 %v7951_v29  ;;  %2328 = vmatprep.subr.bf16.mxu1 %v7954_v30  ;;  %v8038_v29 = vld [vmem:[#allocation8 + $0x98c] ss:$16 sps:$4 sm:$0xff]   ;;  %v8033_v30 = vld [vmem:[#allocation8 + $0x980] ss:$16 sps:$4 sm:$0xff]  }
 0x2d1   :  { %2247 = vmatpush1.bf16.msra.mxu0 %v7949_v31  ;;  %2329 = vmatpush1.bf16.msra.mxu1 %v7952_v32  ;;  %v8036_v31 = vld [vmem:[#allocation8 + $0x988] ss:$16 sps:$4 sm:$0xff]   ;;  %v8041_v32 = vld [vmem:[#allocation8 + $0x9a4] ss:$16 sps:$4 sm:$0xff]  }
 0x2d2   :  { %2248 = vmatprep.subr.bf16.mxu0 %v7957_v34  ;;  %2330 = vmatprep.subr.bf16.mxu1 %v7960_v35  ;;  %v8039_v34 = vld [vmem:[#allocation8 + $0x9a0] ss:$16 sps:$4 sm:$0xff]   ;;  %v8042_v35 = vld [vmem:[#allocation8 + $0x9a8] ss:$16 sps:$4 sm:$0xff]  }
 0x2d5   :  { %2249 = vmatpush1.bf16.msra.mxu0 %v7955_v36  ;;  %2331 = vmatpush1.bf16.msra.mxu1 %v7958_v37  ;;  %v8047_v36 = vld [vmem:[#allocation8 + $0x9c4] ss:$16 sps:$4 sm:$0xff]   ;;  %v8050_v37 = vld [vmem:[#allocation8 + $0x9cc] ss:$16 sps:$4 sm:$0xff]  }
 0x2d6   :  { %3141 = vmatprep.subr.bf16.mxu0 %v7963_v0  ;;  %3223 = vmatprep.subr.bf16.mxu1 %v7966_v43  ;;  %v8048_v0 = vld [vmem:[#allocation8 + $0x9c8] ss:$16 sps:$4 sm:$0xff]   ;;  %v8053_v43 = vld [vmem:[#allocation8 + $0x9e4] ss:$16 sps:$4 sm:$0xff]  }
 0x2d8   :  { %2251 = vmatmul.mubr.bf16.vlgmr.msra.gmra.mrb[8].mxu0 %v1383_v46  ;;  %2333 = vmatmul.mubr.bf16.vlgmr.msra.gmra.mrb[8].mxu1 %v1383_v46  ;;  %v8054_v46 = vld [vmem:[#allocation8 + $0x9e8] ss:$16 sps:$4 sm:$0xff]  }
 0x2d9   :  { %3142 = vmatpush1.bf16.msra.mxu0 %v7961_v44  ;;  %3224 = vmatpush1.bf16.msra.mxu1 %v7964_v45  ;;  %v8056_v44 = vld [vmem:[#allocation8 + $0x9ec] ss:$16 sps:$4 sm:$0xff]   ;;  %v8051_v45 = vld [vmem:[#allocation8 + $0x9e0] ss:$16 sps:$4 sm:$0xff]  }
 0x2da   :  { %3143 = vmatprep.subr.bf16.mxu0 %v7969_v16  ;;  %3225 = vmatprep.subr.bf16.mxu1 %v7972_v47  ;;  %v8059_v16 = vld [vmem:[#allocation8 + $0xa04] ss:$16 sps:$4 sm:$0xff]   ;;  %v8062_v47 = vld [vmem:[#allocation8 + $0xa0c] ss:$16 sps:$4 sm:$0xff]  }
 0x2dd   :  { %3144 = vmatpush1.bf16.msra.mxu0 %v7967_v48  ;;  %3226 = vmatpush1.bf16.msra.mxu1 %v7970_v49  ;;  %v9137_v48 = vld [vmem:[#allocation10 + $0x4] sm:$0xf] }
 0x2de   :  { %3145 = vmatprep.subr.bf16.mxu0 %v7975_v50  ;;  %3227 = vmatprep.subr.bf16.mxu1 %v7978_v51  ;;  %v1520_v49 = vrot.slane %v9137_v48, %v9100_v39  ;;  %v1524_v50 = vrot.slane %v9137_v48, %v9105_v41  ;;  %v1532_v51 = vrot.slane %v9137_v48, %v9112_v56 }
 0x2e1   :  { %3146 = vmatpush1.bf16.msra.mxu0 %v7973_v52  ;;  %3228 = vmatpush1.bf16.msra.mxu1 %v7976_v53 }
 0x2e2   :  { %3147 = vmatprep.subr.bf16.mxu0 %v7981_v54  ;;  %3229 = vmatprep.subr.bf16.mxu1 %v7984_v57 }
 0x2e5   :  { %3148 = vmatpush1.bf16.msra.mxu0 %v7979_v58  ;;  %3230 = vmatpush1.bf16.msra.mxu1 %v7982_v59 }
 0x2e6   :  { %3149 = vmatprep.subr.bf16.mxu0 %v7987_v60  ;;  %3231 = vmatprep.subr.bf16.mxu1 %v7990_v61 }
 0x2e9   :  { %3150 = vmatpush1.bf16.msra.mxu0 %v7985_v62  ;;  %3232 = vmatpush1.bf16.msra.mxu1 %v7988_v63 }
 0x2ea   :  { %3151 = vmatprep.subr.bf16.mxu0 %v7993_v1  ;;  %3233 = vmatprep.subr.bf16.mxu1 %v7996_v2 }
 0x2ed   :  { %3152 = vmatpush1.bf16.msra.mxu0 %v7991_v38  ;;  %3234 = vmatpush1.bf16.msra.mxu1 %v7994_v3 }
 0x2ee   :  { %3153 = vmatprep.subr.bf16.mxu0 %v7999_v4  ;;  %3235 = vmatprep.subr.bf16.mxu1 %v8002_v5  ;;  %v8057_v5 = vld [vmem:[#allocation8 + $0xa00] ss:$16 sps:$4 sm:$0xff]  }
 0x2f1   :  { %3154 = vmatpush1.bf16.msra.mxu0 %v7997_v6  ;;  %3236 = vmatpush1.bf16.msra.mxu1 %v8000_v7  ;;  %v8060_v6 = vld [vmem:[#allocation8 + $0xa08] ss:$16 sps:$4 sm:$0xff]  }
 0x2f2   :  { %3155 = vmatprep.subr.bf16.mxu0 %v8005_v40  ;;  %3237 = vmatprep.subr.bf16.mxu1 %v8008_v8  ;;  %v8065_v40 = vld [vmem:[#allocation8 + $0xa24] ss:$16 sps:$4 sm:$0xff]   ;;  %v8068_v8 = vld [vmem:[#allocation8 + $0xa2c] ss:$16 sps:$4 sm:$0xff]  }
 0x2f5   :  { %3156 = vmatpush1.bf16.msra.mxu0 %v8003_v9  ;;  %3238 = vmatpush1.bf16.msra.mxu1 %v8006_v10  ;;  %v8063_v10 = vld [vmem:[#allocation8 + $0xa20] ss:$16 sps:$4 sm:$0xff]  }
 0x2f6   :  { %3157 = vmatprep.subr.bf16.mxu0 %v8011_v11  ;;  %3239 = vmatprep.subr.bf16.mxu1 %v8014_v12  ;;  %v8066_v11 = vld [vmem:[#allocation8 + $0xa28] ss:$16 sps:$4 sm:$0xff]   ;;  %v8071_v12 = vld [vmem:[#allocation8 + $0xa44] ss:$16 sps:$4 sm:$0xff]  }
 0x2f9   :  { %3158 = vmatpush1.bf16.msra.mxu0 %v8009_v13  ;;  %3240 = vmatpush1.bf16.msra.mxu1 %v8012_v14  ;;  %v8074_v13 = vld [vmem:[#allocation8 + $0xa4c] ss:$16 sps:$4 sm:$0xff]   ;;  %v8069_v14 = vld [vmem:[#allocation8 + $0xa40] ss:$16 sps:$4 sm:$0xff]  }
 0x2fa   :  { %3159 = vmatprep.subr.bf16.mxu0 %v8017_v15  ;;  %3241 = vmatprep.subr.bf16.mxu1 %v8020_v17  ;;  %v8072_v15 = vld [vmem:[#allocation8 + $0xa48] ss:$16 sps:$4 sm:$0xff]   ;;  %v8077_v17 = vld [vmem:[#allocation8 + $0xa64] ss:$16 sps:$4 sm:$0xff]  }
 0x2fd   :  { %3160 = vmatpush1.bf16.msra.mxu0 %v8015_v18  ;;  %3242 = vmatpush1.bf16.msra.mxu1 %v8018_v19  ;;  %v8080_v18 = vld [vmem:[#allocation8 + $0xa6c] ss:$16 sps:$4 sm:$0xff]   ;;  %v8075_v19 = vld [vmem:[#allocation8 + $0xa60] ss:$16 sps:$4 sm:$0xff]  }
 0x2fe   :  { %3161 = vmatprep.subr.bf16.mxu0 %v8023_v20  ;;  %3243 = vmatprep.subr.bf16.mxu1 %v8026_v21  ;;  %v8078_v20 = vld [vmem:[#allocation8 + $0xa68] ss:$16 sps:$4 sm:$0xff]   ;;  %v8083_v21 = vld [vmem:[#allocation8 + $0xa84] ss:$16 sps:$4 sm:$0xff]  }
 0x301   :  { %3162 = vmatpush1.bf16.msra.mxu0 %v8021_v22  ;;  %3244 = vmatpush1.bf16.msra.mxu1 %v8024_v23  ;;  %v8086_v22 = vld [vmem:[#allocation8 + $0xa8c] ss:$16 sps:$4 sm:$0xff]   ;;  %v8081_v23 = vld [vmem:[#allocation8 + $0xa80] ss:$16 sps:$4 sm:$0xff]  }
 0x302   :  { %3163 = vmatprep.subr.bf16.mxu0 %v8029_v24  ;;  %3245 = vmatprep.subr.bf16.mxu1 %v8032_v25  ;;  %v8084_v24 = vld [vmem:[#allocation8 + $0xa88] ss:$16 sps:$4 sm:$0xff]   ;;  %v8089_v25 = vld [vmem:[#allocation8 + $0xaa4] ss:$16 sps:$4 sm:$0xff]  }
 0x305   :  { %3164 = vmatpush1.bf16.msra.mxu0 %v8027_v26  ;;  %3246 = vmatpush1.bf16.msra.mxu1 %v8030_v27  ;;  %v8092_v26 = vld [vmem:[#allocation8 + $0xaac] ss:$16 sps:$4 sm:$0xff]   ;;  %v8087_v27 = vld [vmem:[#allocation8 + $0xaa0] ss:$16 sps:$4 sm:$0xff]  }
 0x306   :  { %3165 = vmatprep.subr.bf16.mxu0 %v8035_v28  ;;  %3247 = vmatprep.subr.bf16.mxu1 %v8038_v29  ;;  %v8090_v28 = vld [vmem:[#allocation8 + $0xaa8] ss:$16 sps:$4 sm:$0xff]   ;;  %v8095_v29 = vld [vmem:[#allocation8 + $0xac4] ss:$16 sps:$4 sm:$0xff]  }
 0x309   :  { %3166 = vmatpush1.bf16.msra.mxu0 %v8033_v30  ;;  %3248 = vmatpush1.bf16.msra.mxu1 %v8036_v31  ;;  %v8098_v30 = vld [vmem:[#allocation8 + $0xacc] ss:$16 sps:$4 sm:$0xff]   ;;  %v8093_v31 = vld [vmem:[#allocation8 + $0xac0] ss:$16 sps:$4 sm:$0xff]  }
 0x30a   :  { %3167 = vmatprep.subr.bf16.mxu0 %v8041_v32  ;;  %3249 = vmatprep.subr.bf16.mxu1 %v8044_v33  ;;  %v8096_v32 = vld [vmem:[#allocation8 + $0xac8] ss:$16 sps:$4 sm:$0xff]   ;;  %v8101_v33 = vld [vmem:[#allocation8 + $0xae4] ss:$16 sps:$4 sm:$0xff]  }
 0x30d   :  { %3168 = vmatpush1.bf16.msra.mxu0 %v8039_v34  ;;  %3250 = vmatpush1.bf16.msra.mxu1 %v8042_v35  ;;  %v8104_v34 = vld [vmem:[#allocation8 + $0xaec] ss:$16 sps:$4 sm:$0xff]   ;;  %v8099_v35 = vld [vmem:[#allocation8 + $0xae0] ss:$16 sps:$4 sm:$0xff]  }
 0x30e   :  { %3169 = vmatprep.subr.bf16.mxu0 %v8047_v36  ;;  %3251 = vmatprep.subr.bf16.mxu1 %v8050_v37  ;;  %v8102_v36 = vld [vmem:[#allocation8 + $0xae8] ss:$16 sps:$4 sm:$0xff]   ;;  %v8107_v37 = vld [vmem:[#allocation8 + $0xb04] ss:$16 sps:$4 sm:$0xff]  }
 0x311   :  { %3170 = vmatpush1.bf16.msra.mxu0 %v8045_v42  ;;  %3252 = vmatpush1.bf16.msra.mxu1 %v8048_v0  ;;  %v8110_v42 = vld [vmem:[#allocation8 + $0xb0c] ss:$16 sps:$4 sm:$0xff]   ;;  %v8105_v0 = vld [vmem:[#allocation8 + $0xb00] ss:$16 sps:$4 sm:$0xff]  }
 0x312   :  { %3171 = vmatprep.subr.bf16.mxu0 %v8053_v43  ;;  %3253 = vmatprep.subr.bf16.mxu1 %v8056_v44  ;;  %v8108_v43 = vld [vmem:[#allocation8 + $0xb08] ss:$16 sps:$4 sm:$0xff]   ;;  %v8113_v44 = vld [vmem:[#allocation8 + $0xb24] ss:$16 sps:$4 sm:$0xff]  }
 0x315   :  { %3172 = vmatpush1.bf16.msra.mxu0 %v8051_v45  ;;  %3254 = vmatpush1.bf16.msra.mxu1 %v8054_v46  ;;  %v8116_v45 = vld [vmem:[#allocation8 + $0xb2c] ss:$16 sps:$4 sm:$0xff]   ;;  %v8111_v46 = vld [vmem:[#allocation8 + $0xb20] ss:$16 sps:$4 sm:$0xff]  }
 0x316   :  { %3182 = vmatprep.subr.bf16.mxu0 %v8059_v16  ;;  %3264 = vmatprep.subr.bf16.mxu1 %v8062_v47  ;;  %v8114_v16 = vld [vmem:[#allocation8 + $0xb28] ss:$16 sps:$4 sm:$0xff]   ;;  %v8119_v47 = vld [vmem:[#allocation8 + $0xb44] ss:$16 sps:$4 sm:$0xff]  }
 0x3ab   :  { %v2252_v52 = vpop.f32.mrb[8].mxu0  ;;  %v9145_v53 = vpop.f32.mrb[8].mxu1 }
 0x3ac   :  { %v7448_v54 = vadd.f32 %v2252_v52, %v1520_v49  ;;  %v2254_v57 = vpop.f32.mrb[9].mxu0  ;;  %v2336_v58 = vpop.f32.mrb[9].mxu1  ;;  %v8122_v49 = vld [vmem:[#allocation8 + $0xb4c] ss:$16 sps:$4 sm:$0xff]   ;;  %v8125_v52 = vld [vmem:[#allocation8 + $0xb64] ss:$16 sps:$4 sm:$0xff]  }
 0x3ad   :  { %v7449_v59 = vadd.f32 %v2254_v57, %v1524_v50  ;;  %v7451_v60 = vadd.f32 %v2336_v58, %v1532_v51  ;;  %v2256_v61 = vpop.f32.mrb[10].mxu0  ;;  %v2338_v62 = vpop.f32.mrb[10].mxu1  ;;  %v8117_v50 = vld [vmem:[#allocation8 + $0xb40] ss:$16 sps:$4 sm:$0xff]   ;;  %v8120_v51 = vld [vmem:[#allocation8 + $0xb48] ss:$16 sps:$4 sm:$0xff]  }
 0x3ae   :  { %v2341_v63 = vmax.f32 %v7448_v54, 0.0  ;;  %v2257_v1 = vpop.f32.mrb[11].mxu0  ;;  %v2339_v2 = vpop.f32.mrb[11].mxu1  ;;  %v8128_v54 = vld [vmem:[#allocation8 + $0xb6c] ss:$16 sps:$4 sm:$0xff]  }
 0x3af   :  { %v2342_v38 = vmax.f32 %v7449_v59, 0.0  ;;  %v2344_v3 = vmax.f32 %v7451_v60, 0.0  ;;  %v8123_v57 = vld [vmem:[#allocation8 + $0xb60] ss:$16 sps:$4 sm:$0xff]   ;;  %v8126_v58 = vld [vmem:[#allocation8 + $0xb68] ss:$16 sps:$4 sm:$0xff]  }
 0x3b0   :  { %v2345_v7 = vpack.c.bf16 %v2341_v63, %v2341_v63  ;;  %v8131_v59 = vld [vmem:[#allocation8 + $0xb84] ss:$16 sps:$4 sm:$0xff]   ;;  %v8134_v60 = vld [vmem:[#allocation8 + $0xb8c] ss:$16 sps:$4 sm:$0xff]   ;;  %v8129_v61 = vld [vmem:[#allocation8 + $0xb80] ss:$16 sps:$4 sm:$0xff]  }
 0x3b1   :  { %v2346_v4 = vpack.c.bf16 %v2342_v38, %v2342_v38  ;;  %v2348_v9 = vpack.c.bf16 %v2344_v3, %v2344_v3  ;;  %v8132_v62 = vld [vmem:[#allocation8 + $0xb88] ss:$16 sps:$4 sm:$0xff]   ;;  %v8137_v63 = vld [vmem:[#allocation8 + $0xba4] ss:$16 sps:$4 sm:$0xff]   ;;  %v8140_v1 = vld [vmem:[#allocation8 + $0xbac] ss:$16 sps:$4 sm:$0xff]   ;;  %v1528_v3 = vrot.slane %v9137_v48, %v9119_v55 }
 0x3b2   :  { %v8135_v2 = vld [vmem:[#allocation8 + $0xba0] ss:$16 sps:$4 sm:$0xff]   ;;  %v8138_v38 = vld [vmem:[#allocation8 + $0xba8] ss:$16 sps:$4 sm:$0xff]   ;;  %v8155_v48 = vld [vmem:[#allocation8 + $0xc04] ss:$16 sps:$4 sm:$0xff]  }
 0x3b3   :  { %3173 = vmatprep.mubr.bf16.mxu0 %v2346_v4  ;;  %3255 = vmatprep.mubr.bf16.mxu1 %v2346_v4  ;;  %v8143_v4 = vld [vmem:[#allocation8 + $0xbc4] ss:$16 sps:$4 sm:$0xff]  }
 0x3b4   :  { %3174 = vmatmul.mubr.bf16.vlgmr.msra.gmra.mrb[12].mxu0 %v2345_v7  ;;  %3256 = vmatmul.mubr.bf16.vlgmr.msra.gmra.mrb[12].mxu1 %v2345_v7  ;;  %v8144_v7 = vld [vmem:[#allocation8 + $0xbc8] ss:$16 sps:$4 sm:$0xff]  }
 0x3b5   :  { %3183 = vmatpush1.bf16.msra.mxu0 %v8057_v5  ;;  %3265 = vmatpush1.bf16.msra.mxu1 %v8060_v6  ;;  %v8146_v5 = vld [vmem:[#allocation8 + $0xbcc] ss:$16 sps:$4 sm:$0xff]   ;;  %v8141_v6 = vld [vmem:[#allocation8 + $0xbc0] ss:$16 sps:$4 sm:$0xff]  }
 0x3b6   :  { %3214 = vmatprep.mubr.bf16.mxu0 %v2348_v9  ;;  %3296 = vmatprep.mubr.bf16.mxu1 %v2348_v9  ;;  %v8152_v9 = vld [vmem:[#allocation8 + $0xbec] ss:$16 sps:$4 sm:$0xff]  }
 0x3b7   :  { %3184 = vmatprep.subr.bf16.mxu0 %v8065_v40  ;;  %3266 = vmatprep.subr.bf16.mxu1 %v8068_v8  ;;  %v7450_v40 = vadd.f32 %v9145_v53, %v1528_v3  ;;  %v8149_v8 = vld [vmem:[#allocation8 + $0xbe4] ss:$16 sps:$4 sm:$0xff]  }
 0x3b8   :  { %v8161_v53 = vld [vmem:[#allocation8 + $0xc24] ss:$16 sps:$4 sm:$0xff]  }
 0x3b9   :  { %3185 = vmatpush1.bf16.msra.mxu0 %v8063_v10  ;;  %3267 = vmatpush1.bf16.msra.mxu1 %v8066_v11  ;;  %v8147_v10 = vld [vmem:[#allocation8 + $0xbe0] ss:$16 sps:$4 sm:$0xff]   ;;  %v8150_v11 = vld [vmem:[#allocation8 + $0xbe8] ss:$16 sps:$4 sm:$0xff]   ;;  %v8227_v3 = vld [vmem:[#allocation8 + $0xd84] ss:$16 sps:$4 sm:$0xff]  }
 0x3ba   :  { %3186 = vmatprep.subr.bf16.mxu0 %v8071_v12  ;;  %3268 = vmatprep.subr.bf16.mxu1 %v8074_v13  ;;  %v2343_v12 = vmax.f32 %v7450_v40, 0.0  ;;  %v8158_v13 = vld [vmem:[#allocation8 + $0xc0c] ss:$16 sps:$4 sm:$0xff]  }
 0x3bb   :  { %v8236_v40 = vld [vmem:[#allocation8 + $0xdac] ss:$16 sps:$4 sm:$0xff]  }
 0x3bd   :  { %3187 = vmatpush1.bf16.msra.mxu0 %v8069_v14  ;;  %3269 = vmatpush1.bf16.msra.mxu1 %v8072_v15  ;;  %v8153_v14 = vld [vmem:[#allocation8 + $0xc00] ss:$16 sps:$4 sm:$0xff]   ;;  %v8156_v15 = vld [vmem:[#allocation8 + $0xc08] ss:$16 sps:$4 sm:$0xff]  }
 0x3be   :  { %3188 = vmatprep.subr.bf16.mxu0 %v8077_v17  ;;  %3270 = vmatprep.subr.bf16.mxu1 %v8080_v18  ;;  %v2347_v17 = vpack.c.bf16 %v2343_v12, %v2343_v12  ;;  %v8164_v18 = vld [vmem:[#allocation8 + $0xc2c] ss:$16 sps:$4 sm:$0xff]   ;;  %v8237_v12 = vld [vmem:[#allocation8 + $0xdc0] ss:$16 sps:$4 sm:$0xff]  }
 0x3c1   :  { %3189 = vmatpush1.bf16.msra.mxu0 %v8075_v19  ;;  %3271 = vmatpush1.bf16.msra.mxu1 %v8078_v20  ;;  %v8159_v19 = vld [vmem:[#allocation8 + $0xc20] ss:$16 sps:$4 sm:$0xff]   ;;  %v8162_v20 = vld [vmem:[#allocation8 + $0xc28] ss:$16 sps:$4 sm:$0xff]  }
 0x3c2   :  { %3190 = vmatprep.subr.bf16.mxu0 %v8083_v21  ;;  %3272 = vmatprep.subr.bf16.mxu1 %v8086_v22  ;;  %v8167_v21 = vld [vmem:[#allocation8 + $0xc44] ss:$16 sps:$4 sm:$0xff]   ;;  %v8170_v22 = vld [vmem:[#allocation8 + $0xc4c] ss:$16 sps:$4 sm:$0xff]  }
 0x3c5   :  { %3191 = vmatpush1.bf16.msra.mxu0 %v8081_v23  ;;  %3273 = vmatpush1.bf16.msra.mxu1 %v8084_v24  ;;  %v8165_v23 = vld [vmem:[#allocation8 + $0xc40] ss:$16 sps:$4 sm:$0xff]   ;;  %v8168_v24 = vld [vmem:[#allocation8 + $0xc48] ss:$16 sps:$4 sm:$0xff]  }
 0x3c6   :  { %3192 = vmatprep.subr.bf16.mxu0 %v8089_v25  ;;  %3274 = vmatprep.subr.bf16.mxu1 %v8092_v26  ;;  %v8173_v25 = vld [vmem:[#allocation8 + $0xc64] ss:$16 sps:$4 sm:$0xff]   ;;  %v8176_v26 = vld [vmem:[#allocation8 + $0xc6c] ss:$16 sps:$4 sm:$0xff]  }
 0x3c9   :  { %3193 = vmatpush1.bf16.msra.mxu0 %v8087_v27  ;;  %3275 = vmatpush1.bf16.msra.mxu1 %v8090_v28  ;;  %v8171_v27 = vld [vmem:[#allocation8 + $0xc60] ss:$16 sps:$4 sm:$0xff]   ;;  %v8174_v28 = vld [vmem:[#allocation8 + $0xc68] ss:$16 sps:$4 sm:$0xff]  }
 0x3ca   :  { %3194 = vmatprep.subr.bf16.mxu0 %v8095_v29  ;;  %3276 = vmatprep.subr.bf16.mxu1 %v8098_v30  ;;  %v8179_v29 = vld [vmem:[#allocation8 + $0xc84] ss:$16 sps:$4 sm:$0xff]   ;;  %v8182_v30 = vld [vmem:[#allocation8 + $0xc8c] ss:$16 sps:$4 sm:$0xff]  }
 0x3cd   :  { %3195 = vmatpush1.bf16.msra.mxu0 %v8093_v31  ;;  %3277 = vmatpush1.bf16.msra.mxu1 %v8096_v32  ;;  %v8177_v31 = vld [vmem:[#allocation8 + $0xc80] ss:$16 sps:$4 sm:$0xff]   ;;  %v8180_v32 = vld [vmem:[#allocation8 + $0xc88] ss:$16 sps:$4 sm:$0xff]  }
 0x3ce   :  { %3196 = vmatprep.subr.bf16.mxu0 %v8101_v33  ;;  %3278 = vmatprep.subr.bf16.mxu1 %v8104_v34  ;;  %v8185_v33 = vld [vmem:[#allocation8 + $0xca4] ss:$16 sps:$4 sm:$0xff]   ;;  %v8188_v34 = vld [vmem:[#allocation8 + $0xcac] ss:$16 sps:$4 sm:$0xff]  }
 0x3d1   :  { %3197 = vmatpush1.bf16.msra.mxu0 %v8099_v35  ;;  %3279 = vmatpush1.bf16.msra.mxu1 %v8102_v36  ;;  %v8183_v35 = vld [vmem:[#allocation8 + $0xca0] ss:$16 sps:$4 sm:$0xff]   ;;  %v8186_v36 = vld [vmem:[#allocation8 + $0xca8] ss:$16 sps:$4 sm:$0xff]  }
 0x3d2   :  { %3198 = vmatprep.subr.bf16.mxu0 %v8107_v37  ;;  %3280 = vmatprep.subr.bf16.mxu1 %v8110_v42  ;;  %v8191_v37 = vld [vmem:[#allocation8 + $0xcc4] ss:$16 sps:$4 sm:$0xff]   ;;  %v8194_v42 = vld [vmem:[#allocation8 + $0xccc] ss:$16 sps:$4 sm:$0xff]  }
 0x3d5   :  { %3199 = vmatpush1.bf16.msra.mxu0 %v8105_v0  ;;  %3281 = vmatpush1.bf16.msra.mxu1 %v8108_v43  ;;  %v8189_v0 = vld [vmem:[#allocation8 + $0xcc0] ss:$16 sps:$4 sm:$0xff]   ;;  %v8192_v43 = vld [vmem:[#allocation8 + $0xcc8] ss:$16 sps:$4 sm:$0xff]  }
 0x3d6   :  { %3200 = vmatprep.subr.bf16.mxu0 %v8113_v44  ;;  %3282 = vmatprep.subr.bf16.mxu1 %v8116_v45  ;;  %v8197_v44 = vld [vmem:[#allocation8 + $0xce4] ss:$16 sps:$4 sm:$0xff]   ;;  %v8200_v45 = vld [vmem:[#allocation8 + $0xcec] ss:$16 sps:$4 sm:$0xff]  }
 0x3d9   :  { %3201 = vmatpush1.bf16.msra.mxu0 %v8111_v46  ;;  %3283 = vmatpush1.bf16.msra.mxu1 %v8114_v16  ;;  %v8195_v46 = vld [vmem:[#allocation8 + $0xce0] ss:$16 sps:$4 sm:$0xff]   ;;  %v8198_v16 = vld [vmem:[#allocation8 + $0xce8] ss:$16 sps:$4 sm:$0xff]  }
 0x3da   :  { %3202 = vmatprep.subr.bf16.mxu0 %v8119_v47  ;;  %3284 = vmatprep.subr.bf16.mxu1 %v8122_v49  ;;  %v8203_v47 = vld [vmem:[#allocation8 + $0xd04] ss:$16 sps:$4 sm:$0xff]   ;;  %v8206_v49 = vld [vmem:[#allocation8 + $0xd0c] ss:$16 sps:$4 sm:$0xff]  }
 0x3dd   :  { %3203 = vmatpush1.bf16.msra.mxu0 %v8117_v50  ;;  %3285 = vmatpush1.bf16.msra.mxu1 %v8120_v51  ;;  %v8201_v50 = vld [vmem:[#allocation8 + $0xd00] ss:$16 sps:$4 sm:$0xff]   ;;  %v8204_v51 = vld [vmem:[#allocation8 + $0xd08] ss:$16 sps:$4 sm:$0xff]  }
 0x3de   :  { %3204 = vmatprep.subr.bf16.mxu0 %v8125_v52  ;;  %3286 = vmatprep.subr.bf16.mxu1 %v8128_v54  ;;  %v8209_v52 = vld [vmem:[#allocation8 + $0xd24] ss:$16 sps:$4 sm:$0xff]   ;;  %v8212_v54 = vld [vmem:[#allocation8 + $0xd2c] ss:$16 sps:$4 sm:$0xff]  }
 0x3e1   :  { %3205 = vmatpush1.bf16.msra.mxu0 %v8123_v57  ;;  %3287 = vmatpush1.bf16.msra.mxu1 %v8126_v58  ;;  %v8207_v57 = vld [vmem:[#allocation8 + $0xd20] ss:$16 sps:$4 sm:$0xff]   ;;  %v8210_v58 = vld [vmem:[#allocation8 + $0xd28] ss:$16 sps:$4 sm:$0xff]  }
 0x3e2   :  { %3206 = vmatprep.subr.bf16.mxu0 %v8131_v59  ;;  %3288 = vmatprep.subr.bf16.mxu1 %v8134_v60  ;;  %v8215_v59 = vld [vmem:[#allocation8 + $0xd44] ss:$16 sps:$4 sm:$0xff]   ;;  %v8218_v60 = vld [vmem:[#allocation8 + $0xd4c] ss:$16 sps:$4 sm:$0xff]  }
 0x3e5   :  { %3207 = vmatpush1.bf16.msra.mxu0 %v8129_v61  ;;  %3289 = vmatpush1.bf16.msra.mxu1 %v8132_v62  ;;  %v8213_v61 = vld [vmem:[#allocation8 + $0xd40] ss:$16 sps:$4 sm:$0xff]   ;;  %v8216_v62 = vld [vmem:[#allocation8 + $0xd48] ss:$16 sps:$4 sm:$0xff]  }
 0x3e6   :  { %3208 = vmatprep.subr.bf16.mxu0 %v8137_v63  ;;  %3290 = vmatprep.subr.bf16.mxu1 %v8140_v1  ;;  %v8221_v63 = vld [vmem:[#allocation8 + $0xd64] ss:$16 sps:$4 sm:$0xff]   ;;  %v8224_v1 = vld [vmem:[#allocation8 + $0xd6c] ss:$16 sps:$4 sm:$0xff]  }
 0x3e9   :  { %3209 = vmatpush1.bf16.msra.mxu0 %v8135_v2  ;;  %3291 = vmatpush1.bf16.msra.mxu1 %v8138_v38  ;;  %v8219_v2 = vld [vmem:[#allocation8 + $0xd60] ss:$16 sps:$4 sm:$0xff]   ;;  %v8222_v38 = vld [vmem:[#allocation8 + $0xd68] ss:$16 sps:$4 sm:$0xff]  }
 0x3ea   :  { %3210 = vmatprep.subr.bf16.mxu0 %v8143_v4  ;;  %3292 = vmatprep.subr.bf16.mxu1 %v8146_v5  ;;  %v8230_v4 = vld [vmem:[#allocation8 + $0xd8c] ss:$16 sps:$4 sm:$0xff]   ;;  %v8225_v5 = vld [vmem:[#allocation8 + $0xd80] ss:$16 sps:$4 sm:$0xff]  }
 0x3ed   :  { %3211 = vmatpush1.bf16.msra.mxu0 %v8141_v6  ;;  %3293 = vmatpush1.bf16.msra.mxu1 %v8144_v7  ;;  %v8228_v6 = vld [vmem:[#allocation8 + $0xd88] ss:$16 sps:$4 sm:$0xff]   ;;  %v8233_v7 = vld [vmem:[#allocation8 + $0xda4] ss:$16 sps:$4 sm:$0xff]  }
 0x3ee   :  { %3212 = vmatprep.subr.bf16.mxu0 %v8149_v8  ;;  %3294 = vmatprep.subr.bf16.mxu1 %v8152_v9  ;;  %v8231_v8 = vld [vmem:[#allocation8 + $0xda0] ss:$16 sps:$4 sm:$0xff]   ;;  %v8234_v9 = vld [vmem:[#allocation8 + $0xda8] ss:$16 sps:$4 sm:$0xff]  }
 0x3f1   :  { %3213 = vmatpush1.bf16.msra.mxu0 %v8147_v10  ;;  %3295 = vmatpush1.bf16.msra.mxu1 %v8150_v11  ;;  %v8239_v10 = vld [vmem:[#allocation8 + $0xdc4] ss:$16 sps:$4 sm:$0xff]   ;;  %v8242_v11 = vld [vmem:[#allocation8 + $0xdcc] ss:$16 sps:$4 sm:$0xff]  }
 0x3f2   :  { %4105 = vmatprep.subr.bf16.mxu0 %v8155_v48  ;;  %4187 = vmatprep.subr.bf16.mxu1 %v8158_v13  ;;  %v8240_v48 = vld [vmem:[#allocation8 + $0xdc8] ss:$16 sps:$4 sm:$0xff]   ;;  %v8245_v13 = vld [vmem:[#allocation8 + $0xde4] ss:$16 sps:$4 sm:$0xff]  }
 0x3f4   :  { %3215 = vmatmul.mubr.bf16.vlgmr.msra.gmra.mrb[12].mxu0 %v2347_v17  ;;  %3297 = vmatmul.mubr.bf16.vlgmr.msra.gmra.mrb[12].mxu1 %v2347_v17  ;;  %v8246_v17 = vld [vmem:[#allocation8 + $0xde8] ss:$16 sps:$4 sm:$0xff]  }
 0x3f5   :  { %4106 = vmatpush1.bf16.msra.mxu0 %v8153_v14  ;;  %4188 = vmatpush1.bf16.msra.mxu1 %v8156_v15  ;;  %v8248_v14 = vld [vmem:[#allocation8 + $0xdec] ss:$16 sps:$4 sm:$0xff]   ;;  %v8243_v15 = vld [vmem:[#allocation8 + $0xde0] ss:$16 sps:$4 sm:$0xff]  }
 0x3f6   :  { %4107 = vmatprep.subr.bf16.mxu0 %v8161_v53  ;;  %4189 = vmatprep.subr.bf16.mxu1 %v8164_v18  ;;  %v8251_v53 = vld [vmem:[#allocation8 + $0xe04] ss:$16 sps:$4 sm:$0xff]   ;;  %v8254_v18 = vld [vmem:[#allocation8 + $0xe0c] ss:$16 sps:$4 sm:$0xff]  }
 0x3f9   :  { %4108 = vmatpush1.bf16.msra.mxu0 %v8159_v19  ;;  %4190 = vmatpush1.bf16.msra.mxu1 %v8162_v20  ;;  %v9150_v19 = vld [vmem:[#allocation10 + $0x8] sm:$0xf] }
 0x3fa   :  { %4109 = vmatprep.subr.bf16.mxu0 %v8167_v21  ;;  %4191 = vmatprep.subr.bf16.mxu1 %v8170_v22  ;;  %v2484_v20 = vrot.slane %v9150_v19, %v9100_v39  ;;  %v2488_v21 = vrot.slane %v9150_v19, %v9105_v41  ;;  %v2496_v22 = vrot.slane %v9150_v19, %v9112_v56 }
 0x3fd   :  { %4110 = vmatpush1.bf16.msra.mxu0 %v8165_v23  ;;  %4192 = vmatpush1.bf16.msra.mxu1 %v8168_v24 }
 0x3fe   :  { %4111 = vmatprep.subr.bf16.mxu0 %v8173_v25  ;;  %4193 = vmatprep.subr.bf16.mxu1 %v8176_v26 }
 0x401   :  { %4112 = vmatpush1.bf16.msra.mxu0 %v8171_v27  ;;  %4194 = vmatpush1.bf16.msra.mxu1 %v8174_v28 }
 0x402   :  { %4113 = vmatprep.subr.bf16.mxu0 %v8179_v29  ;;  %4195 = vmatprep.subr.bf16.mxu1 %v8182_v30 }
 0x405   :  { %4114 = vmatpush1.bf16.msra.mxu0 %v8177_v31  ;;  %4196 = vmatpush1.bf16.msra.mxu1 %v8180_v32 }
 0x406   :  { %4115 = vmatprep.subr.bf16.mxu0 %v8185_v33  ;;  %4197 = vmatprep.subr.bf16.mxu1 %v8188_v34 }
 0x409   :  { %4116 = vmatpush1.bf16.msra.mxu0 %v8183_v35  ;;  %4198 = vmatpush1.bf16.msra.mxu1 %v8186_v36 }
 0x40a   :  { %4117 = vmatprep.subr.bf16.mxu0 %v8191_v37  ;;  %4199 = vmatprep.subr.bf16.mxu1 %v8194_v42  ;;  %v8249_v42 = vld [vmem:[#allocation8 + $0xe00] ss:$16 sps:$4 sm:$0xff]  }
 0x40d   :  { %4118 = vmatpush1.bf16.msra.mxu0 %v8189_v0  ;;  %4200 = vmatpush1.bf16.msra.mxu1 %v8192_v43  ;;  %v8252_v0 = vld [vmem:[#allocation8 + $0xe08] ss:$16 sps:$4 sm:$0xff]  }
 0x40e   :  { %4119 = vmatprep.subr.bf16.mxu0 %v8197_v44  ;;  %4201 = vmatprep.subr.bf16.mxu1 %v8200_v45  ;;  %v8257_v44 = vld [vmem:[#allocation8 + $0xe24] ss:$16 sps:$4 sm:$0xff]   ;;  %v8260_v45 = vld [vmem:[#allocation8 + $0xe2c] ss:$16 sps:$4 sm:$0xff]  }
 0x411   :  { %4120 = vmatpush1.bf16.msra.mxu0 %v8195_v46  ;;  %4202 = vmatpush1.bf16.msra.mxu1 %v8198_v16  ;;  %v8255_v16 = vld [vmem:[#allocation8 + $0xe20] ss:$16 sps:$4 sm:$0xff]  }
 0x412   :  { %4121 = vmatprep.subr.bf16.mxu0 %v8203_v47  ;;  %4203 = vmatprep.subr.bf16.mxu1 %v8206_v49  ;;  %v8258_v47 = vld [vmem:[#allocation8 + $0xe28] ss:$16 sps:$4 sm:$0xff]   ;;  %v8263_v49 = vld [vmem:[#allocation8 + $0xe44] ss:$16 sps:$4 sm:$0xff]  }
 0x415   :  { %4122 = vmatpush1.bf16.msra.mxu0 %v8201_v50  ;;  %4204 = vmatpush1.bf16.msra.mxu1 %v8204_v51  ;;  %v8266_v50 = vld [vmem:[#allocation8 + $0xe4c] ss:$16 sps:$4 sm:$0xff]   ;;  %v8261_v51 = vld [vmem:[#allocation8 + $0xe40] ss:$16 sps:$4 sm:$0xff]  }
 0x416   :  { %4123 = vmatprep.subr.bf16.mxu0 %v8209_v52  ;;  %4205 = vmatprep.subr.bf16.mxu1 %v8212_v54  ;;  %v8264_v52 = vld [vmem:[#allocation8 + $0xe48] ss:$16 sps:$4 sm:$0xff]   ;;  %v8269_v54 = vld [vmem:[#allocation8 + $0xe64] ss:$16 sps:$4 sm:$0xff]  }
 0x419   :  { %4124 = vmatpush1.bf16.msra.mxu0 %v8207_v57  ;;  %4206 = vmatpush1.bf16.msra.mxu1 %v8210_v58  ;;  %v8272_v57 = vld [vmem:[#allocation8 + $0xe6c] ss:$16 sps:$4 sm:$0xff]   ;;  %v8267_v58 = vld [vmem:[#allocation8 + $0xe60] ss:$16 sps:$4 sm:$0xff]  }
 0x41a   :  { %4125 = vmatprep.subr.bf16.mxu0 %v8215_v59  ;;  %4207 = vmatprep.subr.bf16.mxu1 %v8218_v60  ;;  %v8270_v59 = vld [vmem:[#allocation8 + $0xe68] ss:$16 sps:$4 sm:$0xff]   ;;  %v8275_v60 = vld [vmem:[#allocation8 + $0xe84] ss:$16 sps:$4 sm:$0xff]  }
 0x41d   :  { %4126 = vmatpush1.bf16.msra.mxu0 %v8213_v61  ;;  %4208 = vmatpush1.bf16.msra.mxu1 %v8216_v62  ;;  %v8278_v61 = vld [vmem:[#allocation8 + $0xe8c] ss:$16 sps:$4 sm:$0xff]   ;;  %v8273_v62 = vld [vmem:[#allocation8 + $0xe80] ss:$16 sps:$4 sm:$0xff]  }
 0x41e   :  { %4127 = vmatprep.subr.bf16.mxu0 %v8221_v63  ;;  %4209 = vmatprep.subr.bf16.mxu1 %v8224_v1  ;;  %v8276_v63 = vld [vmem:[#allocation8 + $0xe88] ss:$16 sps:$4 sm:$0xff]   ;;  %v8281_v1 = vld [vmem:[#allocation8 + $0xea4] ss:$16 sps:$4 sm:$0xff]  }
 0x421   :  { %4128 = vmatpush1.bf16.msra.mxu0 %v8219_v2  ;;  %4210 = vmatpush1.bf16.msra.mxu1 %v8222_v38  ;;  %v8284_v2 = vld [vmem:[#allocation8 + $0xeac] ss:$16 sps:$4 sm:$0xff]   ;;  %v8279_v38 = vld [vmem:[#allocation8 + $0xea0] ss:$16 sps:$4 sm:$0xff]  }
 0x422   :  { %4129 = vmatprep.subr.bf16.mxu0 %v8227_v3  ;;  %4211 = vmatprep.subr.bf16.mxu1 %v8230_v4  ;;  %v8282_v3 = vld [vmem:[#allocation8 + $0xea8] ss:$16 sps:$4 sm:$0xff]   ;;  %v8287_v4 = vld [vmem:[#allocation8 + $0xec4] ss:$16 sps:$4 sm:$0xff]  }
 0x425   :  { %4130 = vmatpush1.bf16.msra.mxu0 %v8225_v5  ;;  %4212 = vmatpush1.bf16.msra.mxu1 %v8228_v6  ;;  %v8290_v5 = vld [vmem:[#allocation8 + $0xecc] ss:$16 sps:$4 sm:$0xff]   ;;  %v8285_v6 = vld [vmem:[#allocation8 + $0xec0] ss:$16 sps:$4 sm:$0xff]  }
 0x426   :  { %4131 = vmatprep.subr.bf16.mxu0 %v8233_v7  ;;  %4213 = vmatprep.subr.bf16.mxu1 %v8236_v40  ;;  %v8288_v7 = vld [vmem:[#allocation8 + $0xec8] ss:$16 sps:$4 sm:$0xff]   ;;  %v8293_v40 = vld [vmem:[#allocation8 + $0xee4] ss:$16 sps:$4 sm:$0xff]  }
 0x429   :  { %4132 = vmatpush1.bf16.msra.mxu0 %v8231_v8  ;;  %4214 = vmatpush1.bf16.msra.mxu1 %v8234_v9  ;;  %v8296_v8 = vld [vmem:[#allocation8 + $0xeec] ss:$16 sps:$4 sm:$0xff]   ;;  %v8291_v9 = vld [vmem:[#allocation8 + $0xee0] ss:$16 sps:$4 sm:$0xff]  }
 0x42a   :  { %4133 = vmatprep.subr.bf16.mxu0 %v8239_v10  ;;  %4215 = vmatprep.subr.bf16.mxu1 %v8242_v11  ;;  %v8294_v10 = vld [vmem:[#allocation8 + $0xee8] ss:$16 sps:$4 sm:$0xff]   ;;  %v8299_v11 = vld [vmem:[#allocation8 + $0xf04] ss:$16 sps:$4 sm:$0xff]  }
 0x42d   :  { %4134 = vmatpush1.bf16.msra.mxu0 %v8237_v12  ;;  %4216 = vmatpush1.bf16.msra.mxu1 %v8240_v48  ;;  %v8302_v12 = vld [vmem:[#allocation8 + $0xf0c] ss:$16 sps:$4 sm:$0xff]   ;;  %v8297_v48 = vld [vmem:[#allocation8 + $0xf00] ss:$16 sps:$4 sm:$0xff]  }
 0x42e   :  { %4135 = vmatprep.subr.bf16.mxu0 %v8245_v13  ;;  %4217 = vmatprep.subr.bf16.mxu1 %v8248_v14  ;;  %v8300_v13 = vld [vmem:[#allocation8 + $0xf08] ss:$16 sps:$4 sm:$0xff]   ;;  %v8305_v14 = vld [vmem:[#allocation8 + $0xf24] ss:$16 sps:$4 sm:$0xff]  }
 0x431   :  { %4136 = vmatpush1.bf16.msra.mxu0 %v8243_v15  ;;  %4218 = vmatpush1.bf16.msra.mxu1 %v8246_v17  ;;  %v8308_v15 = vld [vmem:[#allocation8 + $0xf2c] ss:$16 sps:$4 sm:$0xff]   ;;  %v8303_v17 = vld [vmem:[#allocation8 + $0xf20] ss:$16 sps:$4 sm:$0xff]  }
 0x432   :  { %4146 = vmatprep.subr.bf16.mxu0 %v8251_v53  ;;  %4228 = vmatprep.subr.bf16.mxu1 %v8254_v18  ;;  %v8306_v53 = vld [vmem:[#allocation8 + $0xf28] ss:$16 sps:$4 sm:$0xff]   ;;  %v8311_v18 = vld [vmem:[#allocation8 + $0xf44] ss:$16 sps:$4 sm:$0xff]  }
 0x4c7   :  { %v3216_v23 = vpop.f32.mrb[12].mxu0  ;;  %v9158_v24 = vpop.f32.mrb[12].mxu1 }
 0x4c8   :  { %v7452_v25 = vadd.f32 %v3216_v23, %v2484_v20  ;;  %v3218_v26 = vpop.f32.mrb[13].mxu0  ;;  %v3300_v27 = vpop.f32.mrb[13].mxu1  ;;  %v8314_v20 = vld [vmem:[#allocation8 + $0xf4c] ss:$16 sps:$4 sm:$0xff]   ;;  %v8317_v23 = vld [vmem:[#allocation8 + $0xf64] ss:$16 sps:$4 sm:$0xff]  }
 0x4c9   :  { %v7453_v28 = vadd.f32 %v3218_v26, %v2488_v21  ;;  %v7455_v29 = vadd.f32 %v3300_v27, %v2496_v22  ;;  %v3220_v30 = vpop.f32.mrb[14].mxu0  ;;  %v3302_v31 = vpop.f32.mrb[14].mxu1  ;;  %v8309_v21 = vld [vmem:[#allocation8 + $0xf40] ss:$16 sps:$4 sm:$0xff]   ;;  %v8312_v22 = vld [vmem:[#allocation8 + $0xf48] ss:$16 sps:$4 sm:$0xff]  }
 0x4ca   :  { %v3305_v32 = vmax.f32 %v7452_v25, 0.0  ;;  %v3221_v33 = vpop.f32.mrb[15].mxu0  ;;  %v3303_v34 = vpop.f32.mrb[15].mxu1  ;;  %v8320_v25 = vld [vmem:[#allocation8 + $0xf6c] ss:$16 sps:$4 sm:$0xff]  }
 0x4cb   :  { %v3306_v35 = vmax.f32 %v7453_v28, 0.0  ;;  %v3308_v36 = vmax.f32 %v7455_v29, 0.0  ;;  %v8315_v26 = vld [vmem:[#allocation8 + $0xf60] ss:$16 sps:$4 sm:$0xff]   ;;  %v8318_v27 = vld [vmem:[#allocation8 + $0xf68] ss:$16 sps:$4 sm:$0xff]  }
 0x4cc   :  { %v3309_v43 = vpack.c.bf16 %v3305_v32, %v3305_v32  ;;  %v8323_v28 = vld [vmem:[#allocation8 + $0xf84] ss:$16 sps:$4 sm:$0xff]   ;;  %v8326_v29 = vld [vmem:[#allocation8 + $0xf8c] ss:$16 sps:$4 sm:$0xff]   ;;  %v8321_v30 = vld [vmem:[#allocation8 + $0xf80] ss:$16 sps:$4 sm:$0xff]  }
 0x4cd   :  { %v3310_v37 = vpack.c.bf16 %v3306_v35, %v3306_v35  ;;  %v3312_v46 = vpack.c.bf16 %v3308_v36, %v3308_v36  ;;  %v8324_v31 = vld [vmem:[#allocation8 + $0xf88] ss:$16 sps:$4 sm:$0xff]   ;;  %v8329_v32 = vld [vmem:[#allocation8 + $0xfa4] ss:$16 sps:$4 sm:$0xff]   ;;  %v8332_v33 = vld [vmem:[#allocation8 + $0xfac] ss:$16 sps:$4 sm:$0xff]   ;;  %v2492_v36 = vrot.slane %v9150_v19, %v9119_v55 }
 0x4ce   :  { %v8327_v34 = vld [vmem:[#allocation8 + $0xfa0] ss:$16 sps:$4 sm:$0xff]   ;;  %v8330_v35 = vld [vmem:[#allocation8 + $0xfa8] ss:$16 sps:$4 sm:$0xff]   ;;  %v8347_v19 = vld [vmem:[#allocation8 + $0x1004] ss:$16 sps:$4 sm:$0xff]  }
 0x4cf   :  { %4137 = vmatprep.mubr.bf16.mxu0 %v3310_v37  ;;  %4219 = vmatprep.mubr.bf16.mxu1 %v3310_v37  ;;  %v8335_v37 = vld [vmem:[#allocation8 + $0xfc4] ss:$16 sps:$4 sm:$0xff]  }
 0x4d0   :  { %4138 = vmatmul.mubr.bf16.vlgmr.msra.gmra.mrb[16].mxu0 %v3309_v43  ;;  %4220 = vmatmul.mubr.bf16.vlgmr.msra.gmra.mrb[16].mxu1 %v3309_v43  ;;  %v8336_v43 = vld [vmem:[#allocation8 + $0xfc8] ss:$16 sps:$4 sm:$0xff]  }
 0x4d1   :  { %4147 = vmatpush1.bf16.msra.mxu0 %v8249_v42  ;;  %4229 = vmatpush1.bf16.msra.mxu1 %v8252_v0  ;;  %v8338_v42 = vld [vmem:[#allocation8 + $0xfcc] ss:$16 sps:$4 sm:$0xff]   ;;  %v8333_v0 = vld [vmem:[#allocation8 + $0xfc0] ss:$16 sps:$4 sm:$0xff]  }
 0x4d2   :  { %4178 = vmatprep.mubr.bf16.mxu0 %v3312_v46  ;;  %4260 = vmatprep.mubr.bf16.mxu1 %v3312_v46  ;;  %v8344_v46 = vld [vmem:[#allocation8 + $0xfec] ss:$16 sps:$4 sm:$0xff]  }
 0x4d3   :  { %4148 = vmatprep.subr.bf16.mxu0 %v8257_v44  ;;  %4230 = vmatprep.subr.bf16.mxu1 %v8260_v45  ;;  %v7454_v44 = vadd.f32 %v9158_v24, %v2492_v36  ;;  %v8341_v45 = vld [vmem:[#allocation8 + $0xfe4] ss:$16 sps:$4 sm:$0xff]  }
 0x4d4   :  { %v8353_v24 = vld [vmem:[#allocation8 + $0x1024] ss:$16 sps:$4 sm:$0xff]  }
 0x4d5   :  { %4149 = vmatpush1.bf16.msra.mxu0 %v8255_v16  ;;  %4231 = vmatpush1.bf16.msra.mxu1 %v8258_v47  ;;  %v8339_v16 = vld [vmem:[#allocation8 + $0xfe0] ss:$16 sps:$4 sm:$0xff]   ;;  %v8342_v47 = vld [vmem:[#allocation8 + $0xfe8] ss:$16 sps:$4 sm:$0xff]   ;;  %v8419_v36 = vld [vmem:[#allocation8 + $0x1184] ss:$16 sps:$4 sm:$0xff]  }
 0x4d6   :  { %4150 = vmatprep.subr.bf16.mxu0 %v8263_v49  ;;  %4232 = vmatprep.subr.bf16.mxu1 %v8266_v50  ;;  %v3307_v49 = vmax.f32 %v7454_v44, 0.0  ;;  %v8350_v50 = vld [vmem:[#allocation8 + $0x100c] ss:$16 sps:$4 sm:$0xff]  }
 0x4d7   :  { %v8428_v44 = vld [vmem:[#allocation8 + $0x11ac] ss:$16 sps:$4 sm:$0xff]  }
 0x4d9   :  { %4151 = vmatpush1.bf16.msra.mxu0 %v8261_v51  ;;  %4233 = vmatpush1.bf16.msra.mxu1 %v8264_v52  ;;  %v8345_v51 = vld [vmem:[#allocation8 + $0x1000] ss:$16 sps:$4 sm:$0xff]   ;;  %v8348_v52 = vld [vmem:[#allocation8 + $0x1008] ss:$16 sps:$4 sm:$0xff]  }
 0x4da   :  { %4152 = vmatprep.subr.bf16.mxu0 %v8269_v54  ;;  %4234 = vmatprep.subr.bf16.mxu1 %v8272_v57  ;;  %v3311_v54 = vpack.c.bf16 %v3307_v49, %v3307_v49  ;;  %v8356_v57 = vld [vmem:[#allocation8 + $0x102c] ss:$16 sps:$4 sm:$0xff]   ;;  %v8429_v49 = vld [vmem:[#allocation8 + $0x11c0] ss:$16 sps:$4 sm:$0xff]  }
 0x4dd   :  { %4153 = vmatpush1.bf16.msra.mxu0 %v8267_v58  ;;  %4235 = vmatpush1.bf16.msra.mxu1 %v8270_v59  ;;  %v8351_v58 = vld [vmem:[#allocation8 + $0x1020] ss:$16 sps:$4 sm:$0xff]   ;;  %v8354_v59 = vld [vmem:[#allocation8 + $0x1028] ss:$16 sps:$4 sm:$0xff]  }
 0x4de   :  { %4154 = vmatprep.subr.bf16.mxu0 %v8275_v60  ;;  %4236 = vmatprep.subr.bf16.mxu1 %v8278_v61  ;;  %v8359_v60 = vld [vmem:[#allocation8 + $0x1044] ss:$16 sps:$4 sm:$0xff]   ;;  %v8362_v61 = vld [vmem:[#allocation8 + $0x104c] ss:$16 sps:$4 sm:$0xff]  }
 0x4e1   :  { %4155 = vmatpush1.bf16.msra.mxu0 %v8273_v62  ;;  %4237 = vmatpush1.bf16.msra.mxu1 %v8276_v63  ;;  %v8357_v62 = vld [vmem:[#allocation8 + $0x1040] ss:$16 sps:$4 sm:$0xff]   ;;  %v8360_v63 = vld [vmem:[#allocation8 + $0x1048] ss:$16 sps:$4 sm:$0xff]  }
 0x4e2   :  { %4156 = vmatprep.subr.bf16.mxu0 %v8281_v1  ;;  %4238 = vmatprep.subr.bf16.mxu1 %v8284_v2  ;;  %v8365_v1 = vld [vmem:[#allocation8 + $0x1064] ss:$16 sps:$4 sm:$0xff]   ;;  %v8368_v2 = vld [vmem:[#allocation8 + $0x106c] ss:$16 sps:$4 sm:$0xff]  }
 0x4e5   :  { %4157 = vmatpush1.bf16.msra.mxu0 %v8279_v38  ;;  %4239 = vmatpush1.bf16.msra.mxu1 %v8282_v3  ;;  %v8363_v38 = vld [vmem:[#allocation8 + $0x1060] ss:$16 sps:$4 sm:$0xff]   ;;  %v8366_v3 = vld [vmem:[#allocation8 + $0x1068] ss:$16 sps:$4 sm:$0xff]  }
 0x4e6   :  { %4158 = vmatprep.subr.bf16.mxu0 %v8287_v4  ;;  %4240 = vmatprep.subr.bf16.mxu1 %v8290_v5  ;;  %v8371_v4 = vld [vmem:[#allocation8 + $0x1084] ss:$16 sps:$4 sm:$0xff]   ;;  %v8374_v5 = vld [vmem:[#allocation8 + $0x108c] ss:$16 sps:$4 sm:$0xff]  }
 0x4e9   :  { %4159 = vmatpush1.bf16.msra.mxu0 %v8285_v6  ;;  %4241 = vmatpush1.bf16.msra.mxu1 %v8288_v7  ;;  %v8369_v6 = vld [vmem:[#allocation8 + $0x1080] ss:$16 sps:$4 sm:$0xff]   ;;  %v8372_v7 = vld [vmem:[#allocation8 + $0x1088] ss:$16 sps:$4 sm:$0xff]  }
 0x4ea   :  { %4160 = vmatprep.subr.bf16.mxu0 %v8293_v40  ;;  %4242 = vmatprep.subr.bf16.mxu1 %v8296_v8  ;;  %v8377_v40 = vld [vmem:[#allocation8 + $0x10a4] ss:$16 sps:$4 sm:$0xff]   ;;  %v8380_v8 = vld [vmem:[#allocation8 + $0x10ac] ss:$16 sps:$4 sm:$0xff]  }
 0x4ed   :  { %4161 = vmatpush1.bf16.msra.mxu0 %v8291_v9  ;;  %4243 = vmatpush1.bf16.msra.mxu1 %v8294_v10  ;;  %v8375_v9 = vld [vmem:[#allocation8 + $0x10a0] ss:$16 sps:$4 sm:$0xff]   ;;  %v8378_v10 = vld [vmem:[#allocation8 + $0x10a8] ss:$16 sps:$4 sm:$0xff]  }
 0x4ee   :  { %4162 = vmatprep.subr.bf16.mxu0 %v8299_v11  ;;  %4244 = vmatprep.subr.bf16.mxu1 %v8302_v12  ;;  %v8383_v11 = vld [vmem:[#allocation8 + $0x10c4] ss:$16 sps:$4 sm:$0xff]   ;;  %v8386_v12 = vld [vmem:[#allocation8 + $0x10cc] ss:$16 sps:$4 sm:$0xff]  }
 0x4f1   :  { %4163 = vmatpush1.bf16.msra.mxu0 %v8297_v48  ;;  %4245 = vmatpush1.bf16.msra.mxu1 %v8300_v13  ;;  %v8381_v48 = vld [vmem:[#allocation8 + $0x10c0] ss:$16 sps:$4 sm:$0xff]   ;;  %v8384_v13 = vld [vmem:[#allocation8 + $0x10c8] ss:$16 sps:$4 sm:$0xff]  }
 0x4f2   :  { %4164 = vmatprep.subr.bf16.mxu0 %v8305_v14  ;;  %4246 = vmatprep.subr.bf16.mxu1 %v8308_v15  ;;  %v8389_v14 = vld [vmem:[#allocation8 + $0x10e4] ss:$16 sps:$4 sm:$0xff]   ;;  %v8392_v15 = vld [vmem:[#allocation8 + $0x10ec] ss:$16 sps:$4 sm:$0xff]  }
 0x4f5   :  { %4165 = vmatpush1.bf16.msra.mxu0 %v8303_v17  ;;  %4247 = vmatpush1.bf16.msra.mxu1 %v8306_v53  ;;  %v8387_v17 = vld [vmem:[#allocation8 + $0x10e0] ss:$16 sps:$4 sm:$0xff]   ;;  %v8390_v53 = vld [vmem:[#allocation8 + $0x10e8] ss:$16 sps:$4 sm:$0xff]  }
 0x4f6   :  { %4166 = vmatprep.subr.bf16.mxu0 %v8311_v18  ;;  %4248 = vmatprep.subr.bf16.mxu1 %v8314_v20  ;;  %v8395_v18 = vld [vmem:[#allocation8 + $0x1104] ss:$16 sps:$4 sm:$0xff]   ;;  %v8398_v20 = vld [vmem:[#allocation8 + $0x110c] ss:$16 sps:$4 sm:$0xff]  }
 0x4f9   :  { %4167 = vmatpush1.bf16.msra.mxu0 %v8309_v21  ;;  %4249 = vmatpush1.bf16.msra.mxu1 %v8312_v22  ;;  %v8393_v21 = vld [vmem:[#allocation8 + $0x1100] ss:$16 sps:$4 sm:$0xff]   ;;  %v8396_v22 = vld [vmem:[#allocation8 + $0x1108] ss:$16 sps:$4 sm:$0xff]  }
 0x4fa   :  { %4168 = vmatprep.subr.bf16.mxu0 %v8317_v23  ;;  %4250 = vmatprep.subr.bf16.mxu1 %v8320_v25  ;;  %v8401_v23 = vld [vmem:[#allocation8 + $0x1124] ss:$16 sps:$4 sm:$0xff]   ;;  %v8404_v25 = vld [vmem:[#allocation8 + $0x112c] ss:$16 sps:$4 sm:$0xff]  }
 0x4fd   :  { %4169 = vmatpush1.bf16.msra.mxu0 %v8315_v26  ;;  %4251 = vmatpush1.bf16.msra.mxu1 %v8318_v27  ;;  %v8399_v26 = vld [vmem:[#allocation8 + $0x1120] ss:$16 sps:$4 sm:$0xff]   ;;  %v8402_v27 = vld [vmem:[#allocation8 + $0x1128] ss:$16 sps:$4 sm:$0xff]  }
 0x4fe   :  { %4170 = vmatprep.subr.bf16.mxu0 %v8323_v28  ;;  %4252 = vmatprep.subr.bf16.mxu1 %v8326_v29  ;;  %v8407_v28 = vld [vmem:[#allocation8 + $0x1144] ss:$16 sps:$4 sm:$0xff]   ;;  %v8410_v29 = vld [vmem:[#allocation8 + $0x114c] ss:$16 sps:$4 sm:$0xff]  }
 0x501   :  { %4171 = vmatpush1.bf16.msra.mxu0 %v8321_v30  ;;  %4253 = vmatpush1.bf16.msra.mxu1 %v8324_v31  ;;  %v8405_v30 = vld [vmem:[#allocation8 + $0x1140] ss:$16 sps:$4 sm:$0xff]   ;;  %v8408_v31 = vld [vmem:[#allocation8 + $0x1148] ss:$16 sps:$4 sm:$0xff]  }
 0x502   :  { %4172 = vmatprep.subr.bf16.mxu0 %v8329_v32  ;;  %4254 = vmatprep.subr.bf16.mxu1 %v8332_v33  ;;  %v8413_v32 = vld [vmem:[#allocation8 + $0x1164] ss:$16 sps:$4 sm:$0xff]   ;;  %v8416_v33 = vld [vmem:[#allocation8 + $0x116c] ss:$16 sps:$4 sm:$0xff]  }
 0x505   :  { %4173 = vmatpush1.bf16.msra.mxu0 %v8327_v34  ;;  %4255 = vmatpush1.bf16.msra.mxu1 %v8330_v35  ;;  %v8411_v34 = vld [vmem:[#allocation8 + $0x1160] ss:$16 sps:$4 sm:$0xff]   ;;  %v8414_v35 = vld [vmem:[#allocation8 + $0x1168] ss:$16 sps:$4 sm:$0xff]  }
 0x506   :  { %4174 = vmatprep.subr.bf16.mxu0 %v8335_v37  ;;  %4256 = vmatprep.subr.bf16.mxu1 %v8338_v42  ;;  %v8422_v37 = vld [vmem:[#allocation8 + $0x118c] ss:$16 sps:$4 sm:$0xff]   ;;  %v8417_v42 = vld [vmem:[#allocation8 + $0x1180] ss:$16 sps:$4 sm:$0xff]  }
 0x509   :  { %4175 = vmatpush1.bf16.msra.mxu0 %v8333_v0  ;;  %4257 = vmatpush1.bf16.msra.mxu1 %v8336_v43  ;;  %v8420_v0 = vld [vmem:[#allocation8 + $0x1188] ss:$16 sps:$4 sm:$0xff]   ;;  %v8425_v43 = vld [vmem:[#allocation8 + $0x11a4] ss:$16 sps:$4 sm:$0xff]  }
 0x50a   :  { %4176 = vmatprep.subr.bf16.mxu0 %v8341_v45  ;;  %4258 = vmatprep.subr.bf16.mxu1 %v8344_v46  ;;  %v8423_v45 = vld [vmem:[#allocation8 + $0x11a0] ss:$16 sps:$4 sm:$0xff]   ;;  %v8426_v46 = vld [vmem:[#allocation8 + $0x11a8] ss:$16 sps:$4 sm:$0xff]  }
 0x50d   :  { %4177 = vmatpush1.bf16.msra.mxu0 %v8339_v16  ;;  %4259 = vmatpush1.bf16.msra.mxu1 %v8342_v47  ;;  %v8431_v16 = vld [vmem:[#allocation8 + $0x11c4] ss:$16 sps:$4 sm:$0xff]   ;;  %v8434_v47 = vld [vmem:[#allocation8 + $0x11cc] ss:$16 sps:$4 sm:$0xff]  }
 0x50e   :  { %5069 = vmatprep.subr.bf16.mxu0 %v8347_v19  ;;  %5151 = vmatprep.subr.bf16.mxu1 %v8350_v50  ;;  %v8432_v19 = vld [vmem:[#allocation8 + $0x11c8] ss:$16 sps:$4 sm:$0xff]   ;;  %v8437_v50 = vld [vmem:[#allocation8 + $0x11e4] ss:$16 sps:$4 sm:$0xff]  }
 0x510   :  { %4179 = vmatmul.mubr.bf16.vlgmr.msra.gmra.mrb[16].mxu0 %v3311_v54  ;;  %4261 = vmatmul.mubr.bf16.vlgmr.msra.gmra.mrb[16].mxu1 %v3311_v54  ;;  %v8438_v54 = vld [vmem:[#allocation8 + $0x11e8] ss:$16 sps:$4 sm:$0xff]  }
 0x511   :  { %5070 = vmatpush1.bf16.msra.mxu0 %v8345_v51  ;;  %5152 = vmatpush1.bf16.msra.mxu1 %v8348_v52  ;;  %v8440_v51 = vld [vmem:[#allocation8 + $0x11ec] ss:$16 sps:$4 sm:$0xff]   ;;  %v8435_v52 = vld [vmem:[#allocation8 + $0x11e0] ss:$16 sps:$4 sm:$0xff]  }
 0x512   :  { %5071 = vmatprep.subr.bf16.mxu0 %v8353_v24  ;;  %5153 = vmatprep.subr.bf16.mxu1 %v8356_v57  ;;  %v8443_v24 = vld [vmem:[#allocation8 + $0x1204] ss:$16 sps:$4 sm:$0xff]   ;;  %v8446_v57 = vld [vmem:[#allocation8 + $0x120c] ss:$16 sps:$4 sm:$0xff]  }
 0x515   :  { %5072 = vmatpush1.bf16.msra.mxu0 %v8351_v58  ;;  %5154 = vmatpush1.bf16.msra.mxu1 %v8354_v59  ;;  %v9163_v58 = vld [vmem:[#allocation10 + $0xc] sm:$0xf] }
 0x516   :  { %5073 = vmatprep.subr.bf16.mxu0 %v8359_v60  ;;  %5155 = vmatprep.subr.bf16.mxu1 %v8362_v61  ;;  %v3448_v59 = vrot.slane %v9163_v58, %v9100_v39  ;;  %v3452_v60 = vrot.slane %v9163_v58, %v9105_v41  ;;  %v3460_v61 = vrot.slane %v9163_v58, %v9112_v56 }
 0x519   :  { %5074 = vmatpush1.bf16.msra.mxu0 %v8357_v62  ;;  %5156 = vmatpush1.bf16.msra.mxu1 %v8360_v63 }
 0x51a   :  { %5075 = vmatprep.subr.bf16.mxu0 %v8365_v1  ;;  %5157 = vmatprep.subr.bf16.mxu1 %v8368_v2 }
 0x51d   :  { %5076 = vmatpush1.bf16.msra.mxu0 %v8363_v38  ;;  %5158 = vmatpush1.bf16.msra.mxu1 %v8366_v3 }
 0x51e   :  { %5077 = vmatprep.subr.bf16.mxu0 %v8371_v4  ;;  %5159 = vmatprep.subr.bf16.mxu1 %v8374_v5 }
 0x521   :  { %5078 = vmatpush1.bf16.msra.mxu0 %v8369_v6  ;;  %5160 = vmatpush1.bf16.msra.mxu1 %v8372_v7 }
 0x522   :  { %5079 = vmatprep.subr.bf16.mxu0 %v8377_v40  ;;  %5161 = vmatprep.subr.bf16.mxu1 %v8380_v8 }
 0x525   :  { %5080 = vmatpush1.bf16.msra.mxu0 %v8375_v9  ;;  %5162 = vmatpush1.bf16.msra.mxu1 %v8378_v10 }
 0x526   :  { %5081 = vmatprep.subr.bf16.mxu0 %v8383_v11  ;;  %5163 = vmatprep.subr.bf16.mxu1 %v8386_v12  ;;  %v8441_v12 = vld [vmem:[#allocation8 + $0x1200] ss:$16 sps:$4 sm:$0xff]  }
 0x529   :  { %5082 = vmatpush1.bf16.msra.mxu0 %v8381_v48  ;;  %5164 = vmatpush1.bf16.msra.mxu1 %v8384_v13  ;;  %v8444_v48 = vld [vmem:[#allocation8 + $0x1208] ss:$16 sps:$4 sm:$0xff]  }
 0x52a   :  { %5083 = vmatprep.subr.bf16.mxu0 %v8389_v14  ;;  %5165 = vmatprep.subr.bf16.mxu1 %v8392_v15  ;;  %v8449_v14 = vld [vmem:[#allocation8 + $0x1224] ss:$16 sps:$4 sm:$0xff]   ;;  %v8452_v15 = vld [vmem:[#allocation8 + $0x122c] ss:$16 sps:$4 sm:$0xff]  }
 0x52d   :  { %5084 = vmatpush1.bf16.msra.mxu0 %v8387_v17  ;;  %5166 = vmatpush1.bf16.msra.mxu1 %v8390_v53  ;;  %v8447_v53 = vld [vmem:[#allocation8 + $0x1220] ss:$16 sps:$4 sm:$0xff]  }
 0x52e   :  { %5085 = vmatprep.subr.bf16.mxu0 %v8395_v18  ;;  %5167 = vmatprep.subr.bf16.mxu1 %v8398_v20  ;;  %v8450_v18 = vld [vmem:[#allocation8 + $0x1228] ss:$16 sps:$4 sm:$0xff]   ;;  %v8455_v20 = vld [vmem:[#allocation8 + $0x1244] ss:$16 sps:$4 sm:$0xff]  }
 0x531   :  { %5086 = vmatpush1.bf16.msra.mxu0 %v8393_v21  ;;  %5168 = vmatpush1.bf16.msra.mxu1 %v8396_v22  ;;  %v8458_v21 = vld [vmem:[#allocation8 + $0x124c] ss:$16 sps:$4 sm:$0xff]   ;;  %v8453_v22 = vld [vmem:[#allocation8 + $0x1240] ss:$16 sps:$4 sm:$0xff]  }
 0x532   :  { %5087 = vmatprep.subr.bf16.mxu0 %v8401_v23  ;;  %5169 = vmatprep.subr.bf16.mxu1 %v8404_v25  ;;  %v8456_v23 = vld [vmem:[#allocation8 + $0x1248] ss:$16 sps:$4 sm:$0xff]   ;;  %v8461_v25 = vld [vmem:[#allocation8 + $0x1264] ss:$16 sps:$4 sm:$0xff]  }
 0x535   :  { %5088 = vmatpush1.bf16.msra.mxu0 %v8399_v26  ;;  %5170 = vmatpush1.bf16.msra.mxu1 %v8402_v27  ;;  %v8464_v26 = vld [vmem:[#allocation8 + $0x126c] ss:$16 sps:$4 sm:$0xff]   ;;  %v8459_v27 = vld [vmem:[#allocation8 + $0x1260] ss:$16 sps:$4 sm:$0xff]  }
 0x536   :  { %5089 = vmatprep.subr.bf16.mxu0 %v8407_v28  ;;  %5171 = vmatprep.subr.bf16.mxu1 %v8410_v29  ;;  %v8462_v28 = vld [vmem:[#allocation8 + $0x1268] ss:$16 sps:$4 sm:$0xff]   ;;  %v8467_v29 = vld [vmem:[#allocation8 + $0x1284] ss:$16 sps:$4 sm:$0xff]  }
 0x539   :  { %5090 = vmatpush1.bf16.msra.mxu0 %v8405_v30  ;;  %5172 = vmatpush1.bf16.msra.mxu1 %v8408_v31  ;;  %v8470_v30 = vld [vmem:[#allocation8 + $0x128c] ss:$16 sps:$4 sm:$0xff]   ;;  %v8465_v31 = vld [vmem:[#allocation8 + $0x1280] ss:$16 sps:$4 sm:$0xff]  }
 0x53a   :  { %5091 = vmatprep.subr.bf16.mxu0 %v8413_v32  ;;  %5173 = vmatprep.subr.bf16.mxu1 %v8416_v33  ;;  %v8468_v32 = vld [vmem:[#allocation8 + $0x1288] ss:$16 sps:$4 sm:$0xff]   ;;  %v8473_v33 = vld [vmem:[#allocation8 + $0x12a4] ss:$16 sps:$4 sm:$0xff]  }
 0x53d   :  { %5092 = vmatpush1.bf16.msra.mxu0 %v8411_v34  ;;  %5174 = vmatpush1.bf16.msra.mxu1 %v8414_v35  ;;  %v8476_v34 = vld [vmem:[#allocation8 + $0x12ac] ss:$16 sps:$4 sm:$0xff]   ;;  %v8471_v35 = vld [vmem:[#allocation8 + $0x12a0] ss:$16 sps:$4 sm:$0xff]  }
 0x53e   :  { %5093 = vmatprep.subr.bf16.mxu0 %v8419_v36  ;;  %5175 = vmatprep.subr.bf16.mxu1 %v8422_v37  ;;  %v8474_v36 = vld [vmem:[#allocation8 + $0x12a8] ss:$16 sps:$4 sm:$0xff]   ;;  %v8479_v37 = vld [vmem:[#allocation8 + $0x12c4] ss:$16 sps:$4 sm:$0xff]  }
 0x541   :  { %5094 = vmatpush1.bf16.msra.mxu0 %v8417_v42  ;;  %5176 = vmatpush1.bf16.msra.mxu1 %v8420_v0  ;;  %v8482_v42 = vld [vmem:[#allocation8 + $0x12cc] ss:$16 sps:$4 sm:$0xff]   ;;  %v8477_v0 = vld [vmem:[#allocation8 + $0x12c0] ss:$16 sps:$4 sm:$0xff]  }
 0x542   :  { %5095 = vmatprep.subr.bf16.mxu0 %v8425_v43  ;;  %5177 = vmatprep.subr.bf16.mxu1 %v8428_v44  ;;  %v8480_v43 = vld [vmem:[#allocation8 + $0x12c8] ss:$16 sps:$4 sm:$0xff]   ;;  %v8485_v44 = vld [vmem:[#allocation8 + $0x12e4] ss:$16 sps:$4 sm:$0xff]  }
 0x545   :  { %5096 = vmatpush1.bf16.msra.mxu0 %v8423_v45  ;;  %5178 = vmatpush1.bf16.msra.mxu1 %v8426_v46  ;;  %v8488_v45 = vld [vmem:[#allocation8 + $0x12ec] ss:$16 sps:$4 sm:$0xff]   ;;  %v8483_v46 = vld [vmem:[#allocation8 + $0x12e0] ss:$16 sps:$4 sm:$0xff]  }
 0x546   :  { %5097 = vmatprep.subr.bf16.mxu0 %v8431_v16  ;;  %5179 = vmatprep.subr.bf16.mxu1 %v8434_v47  ;;  %v8486_v16 = vld [vmem:[#allocation8 + $0x12e8] ss:$16 sps:$4 sm:$0xff]   ;;  %v8491_v47 = vld [vmem:[#allocation8 + $0x1304] ss:$16 sps:$4 sm:$0xff]  }
 0x549   :  { %5098 = vmatpush1.bf16.msra.mxu0 %v8429_v49  ;;  %5180 = vmatpush1.bf16.msra.mxu1 %v8432_v19  ;;  %v8494_v49 = vld [vmem:[#allocation8 + $0x130c] ss:$16 sps:$4 sm:$0xff]   ;;  %v8489_v19 = vld [vmem:[#allocation8 + $0x1300] ss:$16 sps:$4 sm:$0xff]  }
 0x54a   :  { %5099 = vmatprep.subr.bf16.mxu0 %v8437_v50  ;;  %5181 = vmatprep.subr.bf16.mxu1 %v8440_v51  ;;  %v8492_v50 = vld [vmem:[#allocation8 + $0x1308] ss:$16 sps:$4 sm:$0xff]   ;;  %v8497_v51 = vld [vmem:[#allocation8 + $0x1324] ss:$16 sps:$4 sm:$0xff]  }
 0x54d   :  { %5100 = vmatpush1.bf16.msra.mxu0 %v8435_v52  ;;  %5182 = vmatpush1.bf16.msra.mxu1 %v8438_v54  ;;  %v8500_v52 = vld [vmem:[#allocation8 + $0x132c] ss:$16 sps:$4 sm:$0xff]   ;;  %v8495_v54 = vld [vmem:[#allocation8 + $0x1320] ss:$16 sps:$4 sm:$0xff]  }
 0x54e   :  { %5110 = vmatprep.subr.bf16.mxu0 %v8443_v24  ;;  %5192 = vmatprep.subr.bf16.mxu1 %v8446_v57  ;;  %v8498_v24 = vld [vmem:[#allocation8 + $0x1328] ss:$16 sps:$4 sm:$0xff]   ;;  %v8503_v57 = vld [vmem:[#allocation8 + $0x1344] ss:$16 sps:$4 sm:$0xff]  }
 0x5e3   :  { %v4180_v62 = vpop.f32.mrb[16].mxu0  ;;  %v9171_v63 = vpop.f32.mrb[16].mxu1 }
 0x5e4   :  { %v7456_v1 = vadd.f32 %v4180_v62, %v3448_v59  ;;  %v4182_v2 = vpop.f32.mrb[17].mxu0  ;;  %v4264_v38 = vpop.f32.mrb[17].mxu1  ;;  %v8506_v59 = vld [vmem:[#allocation8 + $0x134c] ss:$16 sps:$4 sm:$0xff]   ;;  %v8509_v62 = vld [vmem:[#allocation8 + $0x1364] ss:$16 sps:$4 sm:$0xff]  }
 0x5e5   :  { %v7457_v3 = vadd.f32 %v4182_v2, %v3452_v60  ;;  %v7459_v4 = vadd.f32 %v4264_v38, %v3460_v61  ;;  %v4184_v5 = vpop.f32.mrb[18].mxu0  ;;  %v4266_v6 = vpop.f32.mrb[18].mxu1  ;;  %v8501_v60 = vld [vmem:[#allocation8 + $0x1340] ss:$16 sps:$4 sm:$0xff]   ;;  %v8504_v61 = vld [vmem:[#allocation8 + $0x1348] ss:$16 sps:$4 sm:$0xff]  }
 0x5e6   :  { %v4269_v7 = vmax.f32 %v7456_v1, 0.0  ;;  %v4185_v40 = vpop.f32.mrb[19].mxu0  ;;  %v4267_v8 = vpop.f32.mrb[19].mxu1  ;;  %v8512_v1 = vld [vmem:[#allocation8 + $0x136c] ss:$16 sps:$4 sm:$0xff]  }
 0x5e7   :  { %v4270_v9 = vmax.f32 %v7457_v3, 0.0  ;;  %v4272_v10 = vmax.f32 %v7459_v4, 0.0  ;;  %v8507_v2 = vld [vmem:[#allocation8 + $0x1360] ss:$16 sps:$4 sm:$0xff]   ;;  %v8510_v38 = vld [vmem:[#allocation8 + $0x1368] ss:$16 sps:$4 sm:$0xff]  }
 0x5e8   :  { %v4273_v13 = vpack.c.bf16 %v4269_v7, %v4269_v7  ;;  %v8515_v3 = vld [vmem:[#allocation8 + $0x1384] ss:$16 sps:$4 sm:$0xff]   ;;  %v8518_v4 = vld [vmem:[#allocation8 + $0x138c] ss:$16 sps:$4 sm:$0xff]   ;;  %v8513_v5 = vld [vmem:[#allocation8 + $0x1380] ss:$16 sps:$4 sm:$0xff]  }
 0x5e9   :  { %v4274_v11 = vpack.c.bf16 %v4270_v9, %v4270_v9  ;;  %v4276_v17 = vpack.c.bf16 %v4272_v10, %v4272_v10  ;;  %v8516_v6 = vld [vmem:[#allocation8 + $0x1388] ss:$16 sps:$4 sm:$0xff]   ;;  %v8521_v7 = vld [vmem:[#allocation8 + $0x13a4] ss:$16 sps:$4 sm:$0xff]   ;;  %v8524_v40 = vld [vmem:[#allocation8 + $0x13ac] ss:$16 sps:$4 sm:$0xff]   ;;  %v3456_v10 = vrot.slane %v9163_v58, %v9119_v55 }
 0x5ea   :  { %v8519_v8 = vld [vmem:[#allocation8 + $0x13a0] ss:$16 sps:$4 sm:$0xff]   ;;  %v8522_v9 = vld [vmem:[#allocation8 + $0x13a8] ss:$16 sps:$4 sm:$0xff]   ;;  %v8539_v58 = vld [vmem:[#allocation8 + $0x1404] ss:$16 sps:$4 sm:$0xff]  }
 0x5eb   :  { %5101 = vmatprep.mubr.bf16.mxu0 %v4274_v11  ;;  %5183 = vmatprep.mubr.bf16.mxu1 %v4274_v11  ;;  %v8527_v11 = vld [vmem:[#allocation8 + $0x13c4] ss:$16 sps:$4 sm:$0xff]  }
 0x5ec   :  { %5102 = vmatmul.mubr.bf16.vlgmr.msra.gmra.mrb[20].mxu0 %v4273_v13  ;;  %5184 = vmatmul.mubr.bf16.vlgmr.msra.gmra.mrb[20].mxu1 %v4273_v13  ;;  %v8528_v13 = vld [vmem:[#allocation8 + $0x13c8] ss:$16 sps:$4 sm:$0xff]  }
 0x5ed   :  { %5111 = vmatpush1.bf16.msra.mxu0 %v8441_v12  ;;  %5193 = vmatpush1.bf16.msra.mxu1 %v8444_v48  ;;  %v8530_v12 = vld [vmem:[#allocation8 + $0x13cc] ss:$16 sps:$4 sm:$0xff]   ;;  %v8525_v48 = vld [vmem:[#allocation8 + $0x13c0] ss:$16 sps:$4 sm:$0xff]  }
 0x5ee   :  { %5142 = vmatprep.mubr.bf16.mxu0 %v4276_v17  ;;  %5224 = vmatprep.mubr.bf16.mxu1 %v4276_v17  ;;  %v8536_v17 = vld [vmem:[#allocation8 + $0x13ec] ss:$16 sps:$4 sm:$0xff]  }
 0x5ef   :  { %5112 = vmatprep.subr.bf16.mxu0 %v8449_v14  ;;  %5194 = vmatprep.subr.bf16.mxu1 %v8452_v15  ;;  %v7458_v14 = vadd.f32 %v9171_v63, %v3456_v10  ;;  %v8533_v15 = vld [vmem:[#allocation8 + $0x13e4] ss:$16 sps:$4 sm:$0xff]  }
 0x5f0   :  { %v8545_v63 = vld [vmem:[#allocation8 + $0x1424] ss:$16 sps:$4 sm:$0xff]  }
 0x5f1   :  { %5113 = vmatpush1.bf16.msra.mxu0 %v8447_v53  ;;  %5195 = vmatpush1.bf16.msra.mxu1 %v8450_v18  ;;  %v8531_v53 = vld [vmem:[#allocation8 + $0x13e0] ss:$16 sps:$4 sm:$0xff]   ;;  %v8534_v18 = vld [vmem:[#allocation8 + $0x13e8] ss:$16 sps:$4 sm:$0xff]   ;;  %v8611_v10 = vld [vmem:[#allocation8 + $0x1584] ss:$16 sps:$4 sm:$0xff]  }
 0x5f2   :  { %5114 = vmatprep.subr.bf16.mxu0 %v8455_v20  ;;  %5196 = vmatprep.subr.bf16.mxu1 %v8458_v21  ;;  %v4271_v20 = vmax.f32 %v7458_v14, 0.0  ;;  %v8542_v21 = vld [vmem:[#allocation8 + $0x140c] ss:$16 sps:$4 sm:$0xff]  }
 0x5f3   :  { %v8620_v14 = vld [vmem:[#allocation8 + $0x15ac] ss:$16 sps:$4 sm:$0xff]  }
 0x5f5   :  { %5115 = vmatpush1.bf16.msra.mxu0 %v8453_v22  ;;  %5197 = vmatpush1.bf16.msra.mxu1 %v8456_v23  ;;  %v8537_v22 = vld [vmem:[#allocation8 + $0x1400] ss:$16 sps:$4 sm:$0xff]   ;;  %v8540_v23 = vld [vmem:[#allocation8 + $0x1408] ss:$16 sps:$4 sm:$0xff]  }
 0x5f6   :  { %5116 = vmatprep.subr.bf16.mxu0 %v8461_v25  ;;  %5198 = vmatprep.subr.bf16.mxu1 %v8464_v26  ;;  %v4275_v25 = vpack.c.bf16 %v4271_v20, %v4271_v20  ;;  %v8548_v26 = vld [vmem:[#allocation8 + $0x142c] ss:$16 sps:$4 sm:$0xff]   ;;  %v8621_v20 = vld [vmem:[#allocation8 + $0x15c0] ss:$16 sps:$4 sm:$0xff]  }
 0x5f9   :  { %5117 = vmatpush1.bf16.msra.mxu0 %v8459_v27  ;;  %5199 = vmatpush1.bf16.msra.mxu1 %v8462_v28  ;;  %v8543_v27 = vld [vmem:[#allocation8 + $0x1420] ss:$16 sps:$4 sm:$0xff]   ;;  %v8546_v28 = vld [vmem:[#allocation8 + $0x1428] ss:$16 sps:$4 sm:$0xff]  }
 0x5fa   :  { %5118 = vmatprep.subr.bf16.mxu0 %v8467_v29  ;;  %5200 = vmatprep.subr.bf16.mxu1 %v8470_v30  ;;  %v8551_v29 = vld [vmem:[#allocation8 + $0x1444] ss:$16 sps:$4 sm:$0xff]   ;;  %v8554_v30 = vld [vmem:[#allocation8 + $0x144c] ss:$16 sps:$4 sm:$0xff]  }
 0x5fd   :  { %5119 = vmatpush1.bf16.msra.mxu0 %v8465_v31  ;;  %5201 = vmatpush1.bf16.msra.mxu1 %v8468_v32  ;;  %v8549_v31 = vld [vmem:[#allocation8 + $0x1440] ss:$16 sps:$4 sm:$0xff]   ;;  %v8552_v32 = vld [vmem:[#allocation8 + $0x1448] ss:$16 sps:$4 sm:$0xff]  }
 0x5fe   :  { %5120 = vmatprep.subr.bf16.mxu0 %v8473_v33  ;;  %5202 = vmatprep.subr.bf16.mxu1 %v8476_v34  ;;  %v8557_v33 = vld [vmem:[#allocation8 + $0x1464] ss:$16 sps:$4 sm:$0xff]   ;;  %v8560_v34 = vld [vmem:[#allocation8 + $0x146c] ss:$16 sps:$4 sm:$0xff]  }
 0x601   :  { %5121 = vmatpush1.bf16.msra.mxu0 %v8471_v35  ;;  %5203 = vmatpush1.bf16.msra.mxu1 %v8474_v36  ;;  %v8555_v35 = vld [vmem:[#allocation8 + $0x1460] ss:$16 sps:$4 sm:$0xff]   ;;  %v8558_v36 = vld [vmem:[#allocation8 + $0x1468] ss:$16 sps:$4 sm:$0xff]  }
 0x602   :  { %5122 = vmatprep.subr.bf16.mxu0 %v8479_v37  ;;  %5204 = vmatprep.subr.bf16.mxu1 %v8482_v42  ;;  %v8563_v37 = vld [vmem:[#allocation8 + $0x1484] ss:$16 sps:$4 sm:$0xff]   ;;  %v8566_v42 = vld [vmem:[#allocation8 + $0x148c] ss:$16 sps:$4 sm:$0xff]  }
 0x605   :  { %5123 = vmatpush1.bf16.msra.mxu0 %v8477_v0  ;;  %5205 = vmatpush1.bf16.msra.mxu1 %v8480_v43  ;;  %v8561_v0 = vld [vmem:[#allocation8 + $0x1480] ss:$16 sps:$4 sm:$0xff]   ;;  %v8564_v43 = vld [vmem:[#allocation8 + $0x1488] ss:$16 sps:$4 sm:$0xff]  }
 0x606   :  { %5124 = vmatprep.subr.bf16.mxu0 %v8485_v44  ;;  %5206 = vmatprep.subr.bf16.mxu1 %v8488_v45  ;;  %v8569_v44 = vld [vmem:[#allocation8 + $0x14a4] ss:$16 sps:$4 sm:$0xff]   ;;  %v8572_v45 = vld [vmem:[#allocation8 + $0x14ac] ss:$16 sps:$4 sm:$0xff]  }
 0x609   :  { %5125 = vmatpush1.bf16.msra.mxu0 %v8483_v46  ;;  %5207 = vmatpush1.bf16.msra.mxu1 %v8486_v16  ;;  %v8567_v46 = vld [vmem:[#allocation8 + $0x14a0] ss:$16 sps:$4 sm:$0xff]   ;;  %v8570_v16 = vld [vmem:[#allocation8 + $0x14a8] ss:$16 sps:$4 sm:$0xff]  }
 0x60a   :  { %5126 = vmatprep.subr.bf16.mxu0 %v8491_v47  ;;  %5208 = vmatprep.subr.bf16.mxu1 %v8494_v49  ;;  %v8575_v47 = vld [vmem:[#allocation8 + $0x14c4] ss:$16 sps:$4 sm:$0xff]   ;;  %v8578_v49 = vld [vmem:[#allocation8 + $0x14cc] ss:$16 sps:$4 sm:$0xff]  }
 0x60d   :  { %5127 = vmatpush1.bf16.msra.mxu0 %v8489_v19  ;;  %5209 = vmatpush1.bf16.msra.mxu1 %v8492_v50  ;;  %v8573_v19 = vld [vmem:[#allocation8 + $0x14c0] ss:$16 sps:$4 sm:$0xff]   ;;  %v8576_v50 = vld [vmem:[#allocation8 + $0x14c8] ss:$16 sps:$4 sm:$0xff]  }
 0x60e   :  { %5128 = vmatprep.subr.bf16.mxu0 %v8497_v51  ;;  %5210 = vmatprep.subr.bf16.mxu1 %v8500_v52  ;;  %v8581_v51 = vld [vmem:[#allocation8 + $0x14e4] ss:$16 sps:$4 sm:$0xff]   ;;  %v8584_v52 = vld [vmem:[#allocation8 + $0x14ec] ss:$16 sps:$4 sm:$0xff]  }
 0x611   :  { %5129 = vmatpush1.bf16.msra.mxu0 %v8495_v54  ;;  %5211 = vmatpush1.bf16.msra.mxu1 %v8498_v24  ;;  %v8579_v54 = vld [vmem:[#allocation8 + $0x14e0] ss:$16 sps:$4 sm:$0xff]   ;;  %v8582_v24 = vld [vmem:[#allocation8 + $0x14e8] ss:$16 sps:$4 sm:$0xff]  }
 0x612   :  { %5130 = vmatprep.subr.bf16.mxu0 %v8503_v57  ;;  %5212 = vmatprep.subr.bf16.mxu1 %v8506_v59  ;;  %v8587_v57 = vld [vmem:[#allocation8 + $0x1504] ss:$16 sps:$4 sm:$0xff]   ;;  %v8590_v59 = vld [vmem:[#allocation8 + $0x150c] ss:$16 sps:$4 sm:$0xff]  }
 0x615   :  { %5131 = vmatpush1.bf16.msra.mxu0 %v8501_v60  ;;  %5213 = vmatpush1.bf16.msra.mxu1 %v8504_v61  ;;  %v8585_v60 = vld [vmem:[#allocation8 + $0x1500] ss:$16 sps:$4 sm:$0xff]   ;;  %v8588_v61 = vld [vmem:[#allocation8 + $0x1508] ss:$16 sps:$4 sm:$0xff]  }
 0x616   :  { %5132 = vmatprep.subr.bf16.mxu0 %v8509_v62  ;;  %5214 = vmatprep.subr.bf16.mxu1 %v8512_v1  ;;  %v8593_v62 = vld [vmem:[#allocation8 + $0x1524] ss:$16 sps:$4 sm:$0xff]   ;;  %v8596_v1 = vld [vmem:[#allocation8 + $0x152c] ss:$16 sps:$4 sm:$0xff]  }
 0x619   :  { %5133 = vmatpush1.bf16.msra.mxu0 %v8507_v2  ;;  %5215 = vmatpush1.bf16.msra.mxu1 %v8510_v38  ;;  %v8591_v2 = vld [vmem:[#allocation8 + $0x1520] ss:$16 sps:$4 sm:$0xff]   ;;  %v8594_v38 = vld [vmem:[#allocation8 + $0x1528] ss:$16 sps:$4 sm:$0xff]  }
 0x61a   :  { %5134 = vmatprep.subr.bf16.mxu0 %v8515_v3  ;;  %5216 = vmatprep.subr.bf16.mxu1 %v8518_v4  ;;  %v8599_v3 = vld [vmem:[#allocation8 + $0x1544] ss:$16 sps:$4 sm:$0xff]   ;;  %v8602_v4 = vld [vmem:[#allocation8 + $0x154c] ss:$16 sps:$4 sm:$0xff]  }
 0x61d   :  { %5135 = vmatpush1.bf16.msra.mxu0 %v8513_v5  ;;  %5217 = vmatpush1.bf16.msra.mxu1 %v8516_v6  ;;  %v8597_v5 = vld [vmem:[#allocation8 + $0x1540] ss:$16 sps:$4 sm:$0xff]   ;;  %v8600_v6 = vld [vmem:[#allocation8 + $0x1548] ss:$16 sps:$4 sm:$0xff]  }
 0x61e   :  { %5136 = vmatprep.subr.bf16.mxu0 %v8521_v7  ;;  %5218 = vmatprep.subr.bf16.mxu1 %v8524_v40  ;;  %v8605_v7 = vld [vmem:[#allocation8 + $0x1564] ss:$16 sps:$4 sm:$0xff]   ;;  %v8608_v40 = vld [vmem:[#allocation8 + $0x156c] ss:$16 sps:$4 sm:$0xff]  }
 0x621   :  { %5137 = vmatpush1.bf16.msra.mxu0 %v8519_v8  ;;  %5219 = vmatpush1.bf16.msra.mxu1 %v8522_v9  ;;  %v8603_v8 = vld [vmem:[#allocation8 + $0x1560] ss:$16 sps:$4 sm:$0xff]   ;;  %v8606_v9 = vld [vmem:[#allocation8 + $0x1568] ss:$16 sps:$4 sm:$0xff]  }
 0x622   :  { %5138 = vmatprep.subr.bf16.mxu0 %v8527_v11  ;;  %5220 = vmatprep.subr.bf16.mxu1 %v8530_v12  ;;  %v8614_v11 = vld [vmem:[#allocation8 + $0x158c] ss:$16 sps:$4 sm:$0xff]   ;;  %v8609_v12 = vld [vmem:[#allocation8 + $0x1580] ss:$16 sps:$4 sm:$0xff]  }
 0x625   :  { %5139 = vmatpush1.bf16.msra.mxu0 %v8525_v48  ;;  %5221 = vmatpush1.bf16.msra.mxu1 %v8528_v13  ;;  %v8612_v48 = vld [vmem:[#allocation8 + $0x1588] ss:$16 sps:$4 sm:$0xff]   ;;  %v8617_v13 = vld [vmem:[#allocation8 + $0x15a4] ss:$16 sps:$4 sm:$0xff]  }
 0x626   :  { %5140 = vmatprep.subr.bf16.mxu0 %v8533_v15  ;;  %5222 = vmatprep.subr.bf16.mxu1 %v8536_v17  ;;  %v8615_v15 = vld [vmem:[#allocation8 + $0x15a0] ss:$16 sps:$4 sm:$0xff]   ;;  %v8618_v17 = vld [vmem:[#allocation8 + $0x15a8] ss:$16 sps:$4 sm:$0xff]  }
 0x629   :  { %5141 = vmatpush1.bf16.msra.mxu0 %v8531_v53  ;;  %5223 = vmatpush1.bf16.msra.mxu1 %v8534_v18  ;;  %v8623_v53 = vld [vmem:[#allocation8 + $0x15c4] ss:$16 sps:$4 sm:$0xff]   ;;  %v8626_v18 = vld [vmem:[#allocation8 + $0x15cc] ss:$16 sps:$4 sm:$0xff]  }
 0x62a   :  { %6033 = vmatprep.subr.bf16.mxu0 %v8539_v58  ;;  %6115 = vmatprep.subr.bf16.mxu1 %v8542_v21  ;;  %v8624_v58 = vld [vmem:[#allocation8 + $0x15c8] ss:$16 sps:$4 sm:$0xff]   ;;  %v8629_v21 = vld [vmem:[#allocation8 + $0x15e4] ss:$16 sps:$4 sm:$0xff]  }
 0x62c   :  { %5143 = vmatmul.mubr.bf16.vlgmr.msra.gmra.mrb[20].mxu0 %v4275_v25  ;;  %5225 = vmatmul.mubr.bf16.vlgmr.msra.gmra.mrb[20].mxu1 %v4275_v25  ;;  %v8630_v25 = vld [vmem:[#allocation8 + $0x15e8] ss:$16 sps:$4 sm:$0xff]  }
 0x62d   :  { %6034 = vmatpush1.bf16.msra.mxu0 %v8537_v22  ;;  %6116 = vmatpush1.bf16.msra.mxu1 %v8540_v23  ;;  %v8632_v22 = vld [vmem:[#allocation8 + $0x15ec] ss:$16 sps:$4 sm:$0xff]   ;;  %v8627_v23 = vld [vmem:[#allocation8 + $0x15e0] ss:$16 sps:$4 sm:$0xff]  }
 0x62e   :  { %6035 = vmatprep.subr.bf16.mxu0 %v8545_v63  ;;  %6117 = vmatprep.subr.bf16.mxu1 %v8548_v26  ;;  %v8635_v63 = vld [vmem:[#allocation8 + $0x1604] ss:$16 sps:$4 sm:$0xff]   ;;  %v8638_v26 = vld [vmem:[#allocation8 + $0x160c] ss:$16 sps:$4 sm:$0xff]  }
 0x631   :  { %6036 = vmatpush1.bf16.msra.mxu0 %v8543_v27  ;;  %6118 = vmatpush1.bf16.msra.mxu1 %v8546_v28  ;;  %v9176_v27 = vld [vmem:[#allocation10 + $0x10] sm:$0xf] }
 0x632   :  { %6037 = vmatprep.subr.bf16.mxu0 %v8551_v29  ;;  %6119 = vmatprep.subr.bf16.mxu1 %v8554_v30  ;;  %v4412_v28 = vrot.slane %v9176_v27, %v9100_v39  ;;  %v4416_v29 = vrot.slane %v9176_v27, %v9105_v41  ;;  %v4424_v30 = vrot.slane %v9176_v27, %v9112_v56 }
 0x635   :  { %6038 = vmatpush1.bf16.msra.mxu0 %v8549_v31  ;;  %6120 = vmatpush1.bf16.msra.mxu1 %v8552_v32 }
 0x636   :  { %6039 = vmatprep.subr.bf16.mxu0 %v8557_v33  ;;  %6121 = vmatprep.subr.bf16.mxu1 %v8560_v34 }
 0x639   :  { %6040 = vmatpush1.bf16.msra.mxu0 %v8555_v35  ;;  %6122 = vmatpush1.bf16.msra.mxu1 %v8558_v36 }
 0x63a   :  { %6041 = vmatprep.subr.bf16.mxu0 %v8563_v37  ;;  %6123 = vmatprep.subr.bf16.mxu1 %v8566_v42 }
 0x63d   :  { %6042 = vmatpush1.bf16.msra.mxu0 %v8561_v0  ;;  %6124 = vmatpush1.bf16.msra.mxu1 %v8564_v43 }
 0x63e   :  { %6043 = vmatprep.subr.bf16.mxu0 %v8569_v44  ;;  %6125 = vmatprep.subr.bf16.mxu1 %v8572_v45 }
 0x641   :  { %6044 = vmatpush1.bf16.msra.mxu0 %v8567_v46  ;;  %6126 = vmatpush1.bf16.msra.mxu1 %v8570_v16 }
 0x642   :  { %6045 = vmatprep.subr.bf16.mxu0 %v8575_v47  ;;  %6127 = vmatprep.subr.bf16.mxu1 %v8578_v49  ;;  %v8633_v49 = vld [vmem:[#allocation8 + $0x1600] ss:$16 sps:$4 sm:$0xff]  }
 0x645   :  { %6046 = vmatpush1.bf16.msra.mxu0 %v8573_v19  ;;  %6128 = vmatpush1.bf16.msra.mxu1 %v8576_v50  ;;  %v8636_v19 = vld [vmem:[#allocation8 + $0x1608] ss:$16 sps:$4 sm:$0xff]  }
 0x646   :  { %6047 = vmatprep.subr.bf16.mxu0 %v8581_v51  ;;  %6129 = vmatprep.subr.bf16.mxu1 %v8584_v52  ;;  %v8641_v51 = vld [vmem:[#allocation8 + $0x1624] ss:$16 sps:$4 sm:$0xff]   ;;  %v8644_v52 = vld [vmem:[#allocation8 + $0x162c] ss:$16 sps:$4 sm:$0xff]  }
 0x649   :  { %6048 = vmatpush1.bf16.msra.mxu0 %v8579_v54  ;;  %6130 = vmatpush1.bf16.msra.mxu1 %v8582_v24  ;;  %v8639_v24 = vld [vmem:[#allocation8 + $0x1620] ss:$16 sps:$4 sm:$0xff]  }
 0x64a   :  { %6049 = vmatprep.subr.bf16.mxu0 %v8587_v57  ;;  %6131 = vmatprep.subr.bf16.mxu1 %v8590_v59  ;;  %v8642_v57 = vld [vmem:[#allocation8 + $0x1628] ss:$16 sps:$4 sm:$0xff]   ;;  %v8647_v59 = vld [vmem:[#allocation8 + $0x1644] ss:$16 sps:$4 sm:$0xff]  }
 0x64d   :  { %6050 = vmatpush1.bf16.msra.mxu0 %v8585_v60  ;;  %6132 = vmatpush1.bf16.msra.mxu1 %v8588_v61  ;;  %v8650_v60 = vld [vmem:[#allocation8 + $0x164c] ss:$16 sps:$4 sm:$0xff]   ;;  %v8645_v61 = vld [vmem:[#allocation8 + $0x1640] ss:$16 sps:$4 sm:$0xff]  }
 0x64e   :  { %6051 = vmatprep.subr.bf16.mxu0 %v8593_v62  ;;  %6133 = vmatprep.subr.bf16.mxu1 %v8596_v1  ;;  %v8648_v62 = vld [vmem:[#allocation8 + $0x1648] ss:$16 sps:$4 sm:$0xff]   ;;  %v8653_v1 = vld [vmem:[#allocation8 + $0x1664] ss:$16 sps:$4 sm:$0xff]  }
 0x651   :  { %6052 = vmatpush1.bf16.msra.mxu0 %v8591_v2  ;;  %6134 = vmatpush1.bf16.msra.mxu1 %v8594_v38  ;;  %v8656_v2 = vld [vmem:[#allocation8 + $0x166c] ss:$16 sps:$4 sm:$0xff]   ;;  %v8651_v38 = vld [vmem:[#allocation8 + $0x1660] ss:$16 sps:$4 sm:$0xff]  }
 0x652   :  { %6053 = vmatprep.subr.bf16.mxu0 %v8599_v3  ;;  %6135 = vmatprep.subr.bf16.mxu1 %v8602_v4  ;;  %v8654_v3 = vld [vmem:[#allocation8 + $0x1668] ss:$16 sps:$4 sm:$0xff]   ;;  %v8659_v4 = vld [vmem:[#allocation8 + $0x1684] ss:$16 sps:$4 sm:$0xff]  }
 0x655   :  { %6054 = vmatpush1.bf16.msra.mxu0 %v8597_v5  ;;  %6136 = vmatpush1.bf16.msra.mxu1 %v8600_v6  ;;  %v8662_v5 = vld [vmem:[#allocation8 + $0x168c] ss:$16 sps:$4 sm:$0xff]   ;;  %v8657_v6 = vld [vmem:[#allocation8 + $0x1680] ss:$16 sps:$4 sm:$0xff]  }
 0x656   :  { %6055 = vmatprep.subr.bf16.mxu0 %v8605_v7  ;;  %6137 = vmatprep.subr.bf16.mxu1 %v8608_v40  ;;  %v8660_v7 = vld [vmem:[#allocation8 + $0x1688] ss:$16 sps:$4 sm:$0xff]   ;;  %v8665_v40 = vld [vmem:[#allocation8 + $0x16a4] ss:$16 sps:$4 sm:$0xff]  }
 0x659   :  { %6056 = vmatpush1.bf16.msra.mxu0 %v8603_v8  ;;  %6138 = vmatpush1.bf16.msra.mxu1 %v8606_v9  ;;  %v8668_v8 = vld [vmem:[#allocation8 + $0x16ac] ss:$16 sps:$4 sm:$0xff]   ;;  %v8663_v9 = vld [vmem:[#allocation8 + $0x16a0] ss:$16 sps:$4 sm:$0xff]  }
 0x65a   :  { %6057 = vmatprep.subr.bf16.mxu0 %v8611_v10  ;;  %6139 = vmatprep.subr.bf16.mxu1 %v8614_v11  ;;  %v8666_v10 = vld [vmem:[#allocation8 + $0x16a8] ss:$16 sps:$4 sm:$0xff]   ;;  %v8671_v11 = vld [vmem:[#allocation8 + $0x16c4] ss:$16 sps:$4 sm:$0xff]  }
 0x65d   :  { %6058 = vmatpush1.bf16.msra.mxu0 %v8609_v12  ;;  %6140 = vmatpush1.bf16.msra.mxu1 %v8612_v48  ;;  %v8674_v12 = vld [vmem:[#allocation8 + $0x16cc] ss:$16 sps:$4 sm:$0xff]   ;;  %v8669_v48 = vld [vmem:[#allocation8 + $0x16c0] ss:$16 sps:$4 sm:$0xff]  }
 0x65e   :  { %6059 = vmatprep.subr.bf16.mxu0 %v8617_v13  ;;  %6141 = vmatprep.subr.bf16.mxu1 %v8620_v14  ;;  %v8672_v13 = vld [vmem:[#allocation8 + $0x16c8] ss:$16 sps:$4 sm:$0xff]   ;;  %v8677_v14 = vld [vmem:[#allocation8 + $0x16e4] ss:$16 sps:$4 sm:$0xff]  }
 0x661   :  { %6060 = vmatpush1.bf16.msra.mxu0 %v8615_v15  ;;  %6142 = vmatpush1.bf16.msra.mxu1 %v8618_v17  ;;  %v8680_v15 = vld [vmem:[#allocation8 + $0x16ec] ss:$16 sps:$4 sm:$0xff]   ;;  %v8675_v17 = vld [vmem:[#allocation8 + $0x16e0] ss:$16 sps:$4 sm:$0xff]  }
 0x662   :  { %6061 = vmatprep.subr.bf16.mxu0 %v8623_v53  ;;  %6143 = vmatprep.subr.bf16.mxu1 %v8626_v18  ;;  %v8678_v53 = vld [vmem:[#allocation8 + $0x16e8] ss:$16 sps:$4 sm:$0xff]   ;;  %v8683_v18 = vld [vmem:[#allocation8 + $0x1704] ss:$16 sps:$4 sm:$0xff]  }
 0x665   :  { %6062 = vmatpush1.bf16.msra.mxu0 %v8621_v20  ;;  %6144 = vmatpush1.bf16.msra.mxu1 %v8624_v58  ;;  %v8686_v20 = vld [vmem:[#allocation8 + $0x170c] ss:$16 sps:$4 sm:$0xff]   ;;  %v8681_v58 = vld [vmem:[#allocation8 + $0x1700] ss:$16 sps:$4 sm:$0xff]  }
 0x666   :  { %6063 = vmatprep.subr.bf16.mxu0 %v8629_v21  ;;  %6145 = vmatprep.subr.bf16.mxu1 %v8632_v22  ;;  %v8684_v21 = vld [vmem:[#allocation8 + $0x1708] ss:$16 sps:$4 sm:$0xff]   ;;  %v8689_v22 = vld [vmem:[#allocation8 + $0x1724] ss:$16 sps:$4 sm:$0xff]  }
 0x669   :  { %6064 = vmatpush1.bf16.msra.mxu0 %v8627_v23  ;;  %6146 = vmatpush1.bf16.msra.mxu1 %v8630_v25  ;;  %v8692_v23 = vld [vmem:[#allocation8 + $0x172c] ss:$16 sps:$4 sm:$0xff]   ;;  %v8687_v25 = vld [vmem:[#allocation8 + $0x1720] ss:$16 sps:$4 sm:$0xff]  }
 0x66a   :  { %6074 = vmatprep.subr.bf16.mxu0 %v8635_v63  ;;  %6156 = vmatprep.subr.bf16.mxu1 %v8638_v26  ;;  %v8690_v63 = vld [vmem:[#allocation8 + $0x1728] ss:$16 sps:$4 sm:$0xff]   ;;  %v8695_v26 = vld [vmem:[#allocation8 + $0x1744] ss:$16 sps:$4 sm:$0xff]  }
 0x6ff   :  { %v5144_v31 = vpop.f32.mrb[20].mxu0  ;;  %v9184_v32 = vpop.f32.mrb[20].mxu1 }
 0x700   :  { %v7460_v33 = vadd.f32 %v5144_v31, %v4412_v28  ;;  %v5146_v34 = vpop.f32.mrb[21].mxu0  ;;  %v5228_v35 = vpop.f32.mrb[21].mxu1  ;;  %v8698_v28 = vld [vmem:[#allocation8 + $0x174c] ss:$16 sps:$4 sm:$0xff]   ;;  %v8701_v31 = vld [vmem:[#allocation8 + $0x1764] ss:$16 sps:$4 sm:$0xff]  }
 0x701   :  { %v7461_v36 = vadd.f32 %v5146_v34, %v4416_v29  ;;  %v7463_v37 = vadd.f32 %v5228_v35, %v4424_v30  ;;  %v5148_v42 = vpop.f32.mrb[22].mxu0  ;;  %v5230_v0 = vpop.f32.mrb[22].mxu1  ;;  %v8693_v29 = vld [vmem:[#allocation8 + $0x1740] ss:$16 sps:$4 sm:$0xff]   ;;  %v8696_v30 = vld [vmem:[#allocation8 + $0x1748] ss:$16 sps:$4 sm:$0xff]  }
 0x702   :  { %v5233_v43 = vmax.f32 %v7460_v33, 0.0  ;;  %v5149_v44 = vpop.f32.mrb[23].mxu0  ;;  %v5231_v45 = vpop.f32.mrb[23].mxu1  ;;  %v8704_v33 = vld [vmem:[#allocation8 + $0x176c] ss:$16 sps:$4 sm:$0xff]  }
 0x703   :  { %v5234_v46 = vmax.f32 %v7461_v36, 0.0  ;;  %v5236_v16 = vmax.f32 %v7463_v37, 0.0  ;;  %v8699_v34 = vld [vmem:[#allocation8 + $0x1760] ss:$16 sps:$4 sm:$0xff]   ;;  %v8702_v35 = vld [vmem:[#allocation8 + $0x1768] ss:$16 sps:$4 sm:$0xff]  }
 0x704   :  { %v5237_v50 = vpack.c.bf16 %v5233_v43, %v5233_v43  ;;  %v8707_v36 = vld [vmem:[#allocation8 + $0x1784] ss:$16 sps:$4 sm:$0xff]   ;;  %v8710_v37 = vld [vmem:[#allocation8 + $0x178c] ss:$16 sps:$4 sm:$0xff]   ;;  %v8705_v42 = vld [vmem:[#allocation8 + $0x1780] ss:$16 sps:$4 sm:$0xff]  }
 0x705   :  { %v5238_v47 = vpack.c.bf16 %v5234_v46, %v5234_v46  ;;  %v5240_v54 = vpack.c.bf16 %v5236_v16, %v5236_v16  ;;  %v8708_v0 = vld [vmem:[#allocation8 + $0x1788] ss:$16 sps:$4 sm:$0xff]   ;;  %v8713_v43 = vld [vmem:[#allocation8 + $0x17a4] ss:$16 sps:$4 sm:$0xff]   ;;  %v8716_v44 = vld [vmem:[#allocation8 + $0x17ac] ss:$16 sps:$4 sm:$0xff]   ;;  %v4420_v16 = vrot.slane %v9176_v27, %v9119_v55 }
 0x706   :  { %v8711_v45 = vld [vmem:[#allocation8 + $0x17a0] ss:$16 sps:$4 sm:$0xff]   ;;  %v8714_v46 = vld [vmem:[#allocation8 + $0x17a8] ss:$16 sps:$4 sm:$0xff]  }
 0x707   :  { %6065 = vmatprep.mubr.bf16.mxu0 %v5238_v47  ;;  %6147 = vmatprep.mubr.bf16.mxu1 %v5238_v47  ;;  %v8719_v47 = vld [vmem:[#allocation8 + $0x17c4] ss:$16 sps:$4 sm:$0xff]   ;;  %v8729_v27 = vld [vmem:[#allocation11 + $0x40] sm:$0xff]  }
 0x708   :  { %6066 = vmatmul.mubr.bf16.vlgmr.msra.gmra.mrb[24].mxu0 %v5237_v50  ;;  %6148 = vmatmul.mubr.bf16.vlgmr.msra.gmra.mrb[24].mxu1 %v5237_v50  ;;  %v8720_v50 = vld [vmem:[#allocation8 + $0x17c8] ss:$16 sps:$4 sm:$0xff]  }
 0x709   :  { %6075 = vmatpush1.bf16.msra.mxu0 %v8633_v49  ;;  %6157 = vmatpush1.bf16.msra.mxu1 %v8636_v19  ;;  %v8722_v49 = vld [vmem:[#allocation8 + $0x17cc] ss:$16 sps:$4 sm:$0xff]   ;;  %v8717_v19 = vld [vmem:[#allocation8 + $0x17c0] ss:$16 sps:$4 sm:$0xff]  }
 0x70a   :  { %6106 = vmatprep.mubr.bf16.mxu0 %v5240_v54  ;;  %6188 = vmatprep.mubr.bf16.mxu1 %v5240_v54  ;;  %v8728_v54 = vld [vmem:[#allocation8 + $0x17ec] ss:$16 sps:$4 sm:$0xff]  }
 0x70b   :  { %6076 = vmatprep.subr.bf16.mxu0 %v8641_v51  ;;  %6158 = vmatprep.subr.bf16.mxu1 %v8644_v52  ;;  %v7462_v51 = vadd.f32 %v9184_v32, %v4420_v16  ;;  %v8725_v52 = vld [vmem:[#allocation8 + $0x17e4] ss:$16 sps:$4 sm:$0xff]  }
 0x70c   :  { %v8733_v32 = vld [vmem:[#allocation11 + $0x48] sm:$0xff]  }
 0x70d   :  { %6077 = vmatpush1.bf16.msra.mxu0 %v8639_v24  ;;  %6159 = vmatpush1.bf16.msra.mxu1 %v8642_v57  ;;  %v8723_v24 = vld [vmem:[#allocation8 + $0x17e0] ss:$16 sps:$4 sm:$0xff]   ;;  %v8726_v57 = vld [vmem:[#allocation8 + $0x17e8] ss:$16 sps:$4 sm:$0xff]  }
 0x70e   :  { %6078 = vmatprep.subr.bf16.mxu0 %v8647_v59  ;;  %6160 = vmatprep.subr.bf16.mxu1 %v8650_v60  ;;  %v5235_v59 = vmax.f32 %v7462_v51, 0.0  ;;  %v8730_v60 = vld [vmem:[#allocation11 + $0xc0] sm:$0xff]  }
 0x711   :  { %6079 = vmatpush1.bf16.msra.mxu0 %v8645_v61  ;;  %6161 = vmatpush1.bf16.msra.mxu1 %v8648_v62  ;;  %v8731_v61 = vld [vmem:[#allocation11] sm:$0xff]  }
 0x712   :  { %6080 = vmatprep.subr.bf16.mxu0 %v8653_v1  ;;  %6162 = vmatprep.subr.bf16.mxu1 %v8656_v2  ;;  %v8732_v62 = vld [vmem:[#allocation11 + $0x80] sm:$0xff]   ;;  %v5239_v1 = vpack.c.bf16 %v5235_v59, %v5235_v59  ;;  %v8734_v2 = vld [vmem:[#allocation11 + $0xc8] sm:$0xff]  }
 0x715   :  { %6081 = vmatpush1.bf16.msra.mxu0 %v8651_v38  ;;  %6163 = vmatpush1.bf16.msra.mxu1 %v8654_v3  ;;  %v8735_v38 = vld [vmem:[#allocation11 + $0x8] sm:$0xff]  }
 0x716   :  { %6082 = vmatprep.subr.bf16.mxu0 %v8659_v4  ;;  %6164 = vmatprep.subr.bf16.mxu1 %v8662_v5  ;;  %v8736_v3 = vld [vmem:[#allocation11 + $0x88] sm:$0xff]   ;;  %v8737_v4 = vld [vmem:[#allocation11 + $0x50] sm:$0xff]  }
 0x717   :  { %v8738_v5 = vld [vmem:[#allocation11 + $0xd0] sm:$0xff]  }
 0x719   :  { %6083 = vmatpush1.bf16.msra.mxu0 %v8657_v6  ;;  %6165 = vmatpush1.bf16.msra.mxu1 %v8660_v7  ;;  %v8739_v6 = vld [vmem:[#allocation11 + $0x10] sm:$0xff]  }
 0x71a   :  { %6084 = vmatprep.subr.bf16.mxu0 %v8665_v40  ;;  %6166 = vmatprep.subr.bf16.mxu1 %v8668_v8  ;;  %v8740_v7 = vld [vmem:[#allocation11 + $0x90] sm:$0xff]   ;;  %v8741_v40 = vld [vmem:[#allocation11 + $0x58] sm:$0xff]  }
 0x71b   :  { %v8742_v8 = vld [vmem:[#allocation11 + $0xd8] sm:$0xff]  }
 0x71d   :  { %6085 = vmatpush1.bf16.msra.mxu0 %v8663_v9  ;;  %6167 = vmatpush1.bf16.msra.mxu1 %v8666_v10  ;;  %v8743_v9 = vld [vmem:[#allocation11 + $0x18] sm:$0xff]  }
 0x71e   :  { %6086 = vmatprep.subr.bf16.mxu0 %v8671_v11  ;;  %6168 = vmatprep.subr.bf16.mxu1 %v8674_v12  ;;  %v8744_v10 = vld [vmem:[#allocation11 + $0x98] sm:$0xff]   ;;  %v8745_v11 = vld [vmem:[#allocation11 + $0x60] sm:$0xff]  }
 0x71f   :  { %v8746_v12 = vld [vmem:[#allocation11 + $0xe0] sm:$0xff]  }
 0x721   :  { %6087 = vmatpush1.bf16.msra.mxu0 %v8669_v48  ;;  %6169 = vmatpush1.bf16.msra.mxu1 %v8672_v13  ;;  %v8747_v48 = vld [vmem:[#allocation11 + $0x20] sm:$0xff]  }
 0x722   :  { %6088 = vmatprep.subr.bf16.mxu0 %v8677_v14  ;;  %6170 = vmatprep.subr.bf16.mxu1 %v8680_v15  ;;  %v8748_v13 = vld [vmem:[#allocation11 + $0xa0] sm:$0xff]   ;;  %v8749_v14 = vld [vmem:[#allocation11 + $0x68] sm:$0xff]  }
 0x723   :  { %v8750_v15 = vld [vmem:[#allocation11 + $0xe8] sm:$0xff]  }
 0x725   :  { %6089 = vmatpush1.bf16.msra.mxu0 %v8675_v17  ;;  %6171 = vmatpush1.bf16.msra.mxu1 %v8678_v53  ;;  %v8751_v17 = vld [vmem:[#allocation11 + $0x28] sm:$0xff]  }
 0x726   :  { %6090 = vmatprep.subr.bf16.mxu0 %v8683_v18  ;;  %6172 = vmatprep.subr.bf16.mxu1 %v8686_v20  ;;  %v8752_v53 = vld [vmem:[#allocation11 + $0xa8] sm:$0xff]   ;;  %v8753_v18 = vld [vmem:[#allocation11 + $0x70] sm:$0xff]  }
 0x727   :  { %v8754_v20 = vld [vmem:[#allocation11 + $0xf0] sm:$0xff]  }
 0x729   :  { %6091 = vmatpush1.bf16.msra.mxu0 %v8681_v58  ;;  %6173 = vmatpush1.bf16.msra.mxu1 %v8684_v21  ;;  %v8755_v58 = vld [vmem:[#allocation11 + $0x30] sm:$0xff]  }
 0x72a   :  { %6092 = vmatprep.subr.bf16.mxu0 %v8689_v22  ;;  %6174 = vmatprep.subr.bf16.mxu1 %v8692_v23  ;;  %v8756_v21 = vld [vmem:[#allocation11 + $0xb0] sm:$0xff]   ;;  %v8757_v22 = vld [vmem:[#allocation11 + $0x78] sm:$0xff]  }
 0x72b   :  { %v8758_v23 = vld [vmem:[#allocation11 + $0xf8] sm:$0xff]  }
 0x72d   :  { %6093 = vmatpush1.bf16.msra.mxu0 %v8687_v25  ;;  %6175 = vmatpush1.bf16.msra.mxu1 %v8690_v63  ;;  %v8759_v25 = vld [vmem:[#allocation11 + $0x38] sm:$0xff]  }
 0x72e   :  { %6094 = vmatprep.subr.bf16.mxu0 %v8695_v26  ;;  %6176 = vmatprep.subr.bf16.mxu1 %v8698_v28  ;;  %v8760_v63 = vld [vmem:[#allocation11 + $0xb8] sm:$0xff]  }
 0x72f   :  { %v5371_v26 = vld [vmem:[#allocation10 + $0x14] sm:$0xf] }
 0x730   :  { %v5376_v28 = vrot.slane %v5371_v26, %v9100_v39 }
 0x731   :  { %6095 = vmatpush1.bf16.msra.mxu0 %v8693_v29  ;;  %6177 = vmatpush1.bf16.msra.mxu1 %v8696_v30  ;;  %v5384_v29 = vrot.slane %v5371_v26, %v9119_v55  ;;  %v5380_v30 = vrot.slane %v5371_v26, %v9105_v41 }
 0x732   :  { %6096 = vmatprep.subr.bf16.mxu0 %v8701_v31  ;;  %6178 = vmatprep.subr.bf16.mxu1 %v8704_v33  ;;  %v5388_v31 = vrot.slane %v5371_v26, %v9112_v56 }
 0x735   :  { %6097 = vmatpush1.bf16.msra.mxu0 %v8699_v34  ;;  %6179 = vmatpush1.bf16.msra.mxu1 %v8702_v35 }
 0x736   :  { %6098 = vmatprep.subr.bf16.mxu0 %v8707_v36  ;;  %6180 = vmatprep.subr.bf16.mxu1 %v8710_v37 }
 0x739   :  { %6099 = vmatpush1.bf16.msra.mxu0 %v8705_v42  ;;  %6181 = vmatpush1.bf16.msra.mxu1 %v8708_v0 }
 0x73a   :  { %6100 = vmatprep.subr.bf16.mxu0 %v8713_v43  ;;  %6182 = vmatprep.subr.bf16.mxu1 %v8716_v44 }
 0x73d   :  { %6101 = vmatpush1.bf16.msra.mxu0 %v8711_v45  ;;  %6183 = vmatpush1.bf16.msra.mxu1 %v8714_v46 }
 0x73e   :  { %6102 = vmatprep.subr.bf16.mxu0 %v8719_v47  ;;  %6184 = vmatprep.subr.bf16.mxu1 %v8722_v49 }
 0x741   :  { %6103 = vmatpush1.bf16.msra.mxu0 %v8717_v19  ;;  %6185 = vmatpush1.bf16.msra.mxu1 %v8720_v50 }
 0x742   :  { %6104 = vmatprep.subr.bf16.mxu0 %v8725_v52  ;;  %6186 = vmatprep.subr.bf16.mxu1 %v8728_v54  ;;  %v7367_v54 = vld [vmem:[#allocation13] ss:$0 sm:$0xff] }
 0x745   :  { %6105 = vmatpush1.bf16.msra.mxu0 %v8723_v24  ;;  %6187 = vmatpush1.bf16.msra.mxu1 %v8726_v57 }
 0x746   :  { %7400 = vmatprep.subr.bf16.mxu0 %v8729_v27  ;;  %7422 = vmatprep.subr.bf16.mxu1 %v8730_v60 }
 0x748   :  { %6107 = vmatmul.mubr.bf16.vlgmr.msra.gmra.mrb[24].mxu0 %v5239_v1  ;;  %6189 = vmatmul.mubr.bf16.vlgmr.msra.gmra.mrb[24].mxu1 %v5239_v1 }
 0x749   :  { %7401 = vmatpush3.bf16.msra.mxu0 %v8731_v61  ;;  %7423 = vmatpush3.bf16.msra.mxu1 %v8732_v62 }
 0x74a   :  { %7402 = vmatprep.subr.bf16.mxu0 %v8733_v32  ;;  %7424 = vmatprep.subr.bf16.mxu1 %v8734_v2 }
 0x74d   :  { %7403 = vmatpush3.bf16.msra.mxu0 %v8735_v38  ;;  %7425 = vmatpush3.bf16.msra.mxu1 %v8736_v3 }
 0x74e   :  { %7404 = vmatprep.subr.bf16.mxu0 %v8737_v4  ;;  %7426 = vmatprep.subr.bf16.mxu1 %v8738_v5 }
 0x751   :  { %7405 = vmatpush3.bf16.msra.mxu0 %v8739_v6  ;;  %7427 = vmatpush3.bf16.msra.mxu1 %v8740_v7 }
 0x752   :  { %7406 = vmatprep.subr.bf16.mxu0 %v8741_v40  ;;  %7428 = vmatprep.subr.bf16.mxu1 %v8742_v8 }
 0x755   :  { %7407 = vmatpush3.bf16.msra.mxu0 %v8743_v9  ;;  %7429 = vmatpush3.bf16.msra.mxu1 %v8744_v10 }
 0x756   :  { %7408 = vmatprep.subr.bf16.mxu0 %v8745_v11  ;;  %7430 = vmatprep.subr.bf16.mxu1 %v8746_v12 }
 0x759   :  { %7409 = vmatpush3.bf16.msra.mxu0 %v8747_v48  ;;  %7431 = vmatpush3.bf16.msra.mxu1 %v8748_v13 }
 0x75a   :  { %7410 = vmatprep.subr.bf16.mxu0 %v8749_v14  ;;  %7432 = vmatprep.subr.bf16.mxu1 %v8750_v15 }
 0x75d   :  { %7411 = vmatpush3.bf16.msra.mxu0 %v8751_v17  ;;  %7433 = vmatpush3.bf16.msra.mxu1 %v8752_v53 }
 0x75e   :  { %7412 = vmatprep.subr.bf16.mxu0 %v8753_v18  ;;  %7434 = vmatprep.subr.bf16.mxu1 %v8754_v20 }
 0x761   :  { %7413 = vmatpush3.bf16.msra.mxu0 %v8755_v58  ;;  %7435 = vmatpush3.bf16.msra.mxu1 %v8756_v21 }
 0x762   :  { %7414 = vmatprep.subr.bf16.mxu0 %v8757_v22  ;;  %7436 = vmatprep.subr.bf16.mxu1 %v8758_v23 }
 0x765   :  { %7415 = vmatpush3.bf16.msra.mxu0 %v8759_v25  ;;  %7437 = vmatpush3.bf16.msra.mxu1 %v8760_v63 }
 0x81b   :  { %v6108_v33 = vpop.f32.mrb[24].mxu0  ;;  %v6190_v34 = vpop.f32.mrb[24].mxu1 }
 0x81c   :  { %v7464_v35 = vadd.f32 %v6108_v33, %v5376_v28  ;;  %v7466_v36 = vadd.f32 %v6190_v34, %v5384_v29  ;;  %v6110_v37 = vpop.f32.mrb[25].mxu0  ;;  %v6192_v42 = vpop.f32.mrb[25].mxu1 }
 0x81d   :  { %v7465_v0 = vadd.f32 %v6110_v37, %v5380_v30  ;;  %v7467_v43 = vadd.f32 %v6192_v42, %v5388_v31  ;;  %v6112_v44 = vpop.f32.mrb[26].mxu0  ;;  %v6194_v45 = vpop.f32.mrb[26].mxu1 }
 0x81e   :  { %v6197_v46 = vmax.f32 %v7464_v35, 0.0  ;;  %v6199_v16 = vmax.f32 %v7466_v36, 0.0  ;;  %v6113_v47 = vpop.f32.mrb[27].mxu0  ;;  %v6195_v39 = vpop.f32.mrb[27].mxu1 }
 0x81f   :  { %v6198_v49 = vmax.f32 %v7465_v0, 0.0  ;;  %v6200_v55 = vmax.f32 %v7467_v43, 0.0 }
 0x820   :  { %v6201_v50 = vpack.c.bf16 %v6197_v46, %v6197_v46  ;;  %v6203_v56 = vpack.c.bf16 %v6199_v16, %v6199_v16 }
 0x821   :  { %v6202_v19 = vpack.c.bf16 %v6198_v49, %v6198_v49  ;;  %v6204_v41 = vpack.c.bf16 %v6200_v55, %v6200_v55 }
 0x823   :  { %6500 = vmatprep.mubr.bf16.mxu0 %v6202_v19  ;;  %6540 = vmatprep.mubr.bf16.mxu1 %v6204_v41 }
 0x824   :  { %6501 = vmatmul.mubr.bf16.vlgmr.msra.gmra.mrb[28].mxu0 %v6201_v50  ;;  %6541 = vmatmul.mubr.bf16.vlgmr.msra.gmra.mrb[28].mxu1 %v6203_v56 }
 0x8f7   :  { %v7416_v51 = vpop.f32.mrb[28].mxu0  ;;  %v7438_v52 = vpop.f32.mrb[28].mxu1 }
 0x8f8   :  { %v7417_v24 = vpop.f32.mrb[29].mxu0  ;;  %v7439_v57 = vpop.f32.mrb[29].mxu1 }
 0x8f9   :  { %v7418_v59 = vadd.f32 %v7417_v24, %v7416_v51  ;;  %v7440_v27 = vadd.f32 %v7439_v57, %v7438_v52  ;;  %v7419_v60 = vpop.f32.mrb[30].mxu0  ;;  %v7441_v61 = vpop.f32.mrb[30].mxu1 }
 0x8fa   :  { %v7420_v62 = vpop.f32.mrb[31].mxu0  ;;  %v7442_v1 = vpop.f32.mrb[31].mxu1 }
 0x8fb   :  { %v6503_v32 = vadd.f32 %v7418_v59, %v7367_v54 }
 0x8fd   :  { %v6543_v2 = vadd.f32 %v7440_v27, %v6503_v32 }
 0x8ff   :  { %6548 = vst [vmem:[#allocation14] sm:$0xff] %v6543_v2 }
 0x900   :  { %8926 = shalt.err (!%p8923_p4)
}
 0x901   :  { %s8927_s29 = scalar_lea.hbm %s9212_s7, 128 }
 0x902   :  { %p8928_p5 = scmp.ne.s32.totalorder %s9212_s7, %s8927_s29  ;;  %p8931_p6 = scmp.lt.u32.totalorder %s8927_s29, %s9212_s7 }
 0x904   :  { %p8933_p7 = pnand %p8931_p6, %p8928_p5 }
 0x906   :  { %8936 = shalt.err (!%p8933_p7)
}
 0x907   :  { %6558 = dma.vmem_to_hbm [thread:$0]  %s6556_s30, 128, %s9212_s7, [#allocation4]  }
 0x908   :  { %8945 = dma.done.wait [#allocation4], 128  }
 0x909   :  { %8946 = vsyncadd [#allocation4], 4294967168 }
 0x90a   :  { %6562 = vsyncpa [#allocation3], 1 }
 0x90b   :  { %6563 = vsyncpa [#allocation6], 1 }
 0x90c   :  { %6564 = vsyncpa [#allocation9], 1 }
 0x90d   :  { %6565 = vsyncpa [#allocation12], 1 }
 0x90e   :  { %6566 = vsyncpa [#allocation4], 1 }

</bundles_post_ra>
